<compile_context>
chip_gen: v7x
topology: tpu7x:2x2x1
jax: 0.10.0
libtpu: 0.0.40
codegen_flags: <defaults>
</compile_context>

<pallas_src>
import functools

import numpy as np
import jax
import jax.numpy as jnp
from jax import lax
from jax.experimental import pallas as pl
from jax.experimental.pallas import tpu as pltpu

_EPS = 1e-5
_NT = (((1,), (1,)), ((), ()))   # dot_general: contract the last (lane) axis


def _bn_lanes(x, gb):
    """Training-mode BatchNorm on a (C, L) slab (batch folded into lanes).
    gb: (C, 2) packed [gamma, beta].  Stats over the lane axis == (N, spatial)."""
    mean = jnp.mean(x, axis=1, keepdims=True)
    var = jnp.mean((x - mean) * (x - mean), axis=1, keepdims=True)
    inv = lax.rsqrt(var + _EPS)
    return (x - mean) * inv * gb[:, 0:1] + gb[:, 1:2]


def _bn_rows(x, g_row, b_row):
    """BatchNorm with the channel axis on columns. x:(R, C'); stats over rows."""
    mean = jnp.mean(x, axis=0, keepdims=True)
    var = jnp.mean((x - mean) * (x - mean), axis=0, keepdims=True)
    inv = lax.rsqrt(var + _EPS)
    return (x - mean) * inv * g_row + b_row


def _dual_gcn_kernel(
    # activations / static geometry matrices
    x_ref, p1_ref, p2_ref, p3_ref, up_ref,
    # local depthwise pyramid (3 stages)
    dww_ref, dwbn_ref,
    # SpatialGCN
    kqvw_ref, kqvb_ref, sgwgw_ref, sgwgbn_ref, sgoutw_ref, sgoutb_ref, sgoutbn_ref,
    # global feature GCN
    phiw_ref, phibn_ref, thetaw_ref, thetabn_ref, adjw_ref, adjbn_ref,
    gwgw_ref, gwgbn_ref, conv3w_ref, bn3_ref,
    # final fuse
    finw_ref, finbn_ref,
    # output
    o_ref,
    *, n, hw, inter, m, local_dims):
    f32 = jnp.float32
    x = x_ref[...]                                        # (C, n*hw)

    # ---------------- local branch: 3x (depthwise 3x3 s2 conv + BN) ----------
    p_refs = (p1_ref, p2_ref, p3_ref)
    cur = x
    for s in range(3):
        l_in, l_out = local_dims[s]
        w9 = dww_ref[s]                                   # (C, 9)
        sel = p_refs[s][...]                              # (l_in, 9*l_out)
        outs = []
        for b in range(n):
            xb = cur[:, b * l_in:(b + 1) * l_in]          # (C, l_in)
            patches = jnp.dot(xb, sel, preferred_element_type=f32)   # (C, 9*l_out)
            acc = patches[:, 0:l_out] * w9[:, 0:1]
            for t in range(1, 9):
                acc = acc + patches[:, t * l_out:(t + 1) * l_out] * w9[:, t:t + 1]
            outs.append(acc)
        cur = _bn_lanes(jnp.concatenate(outs, axis=1), dwbn_ref[s])   # (C, n*l_out)

    # ---------------- SpatialGCN on the coarsest map --------------------------
    l3 = local_dims[2][1]
    sg_in = cur                                           # (C, n*l3)
    kqv = jnp.dot(kqvw_ref[...], sg_in, preferred_element_type=f32) + kqvb_ref[...]
    nk = kqv[0 * inter:1 * inter, :]
    nv = kqv[1 * inter:2 * inter, :]
    nq = kqv[2 * inter:3 * inter, :]
    av_parts = []
    for b in range(n):
        qb = nq[:, b * l3:(b + 1) * l3]                   # (inter, l3)
        vb = nv[:, b * l3:(b + 1) * l3]
        kb = nk[:, b * l3:(b + 1) * l3]
        # a_hat[j, i] = sum_p v[j,p] q[i,p] == bmm(q, v^T)^T -> softmax over axis 0
        a_hat = lax.dot_general(vb, qb, _NT, preferred_element_type=f32)
        a_hat = a_hat - jnp.max(a_hat, axis=0, keepdims=True)
        e = jnp.exp(a_hat)
        p_hat = e * pl.reciprocal(jnp.sum(e, axis=0, keepdims=True), approx=True)
        # (softmax(q v^T))^T @ k  -> (inter, l3), already lane-dense
        av_parts.append(jnp.dot(p_hat, kb, preferred_element_type=f32))
    av = jnp.concatenate(av_parts, axis=1)                # (inter, n*l3)
    avw = _bn_lanes(jnp.dot(sgwgw_ref[...], av, preferred_element_type=f32),
                    sgwgbn_ref[...])
    sg = jnp.dot(sgoutw_ref[...], avw, preferred_element_type=f32) + sgoutb_ref[...]
    sg = _bn_lanes(sg, sgoutbn_ref[...])
    sg = jnp.maximum(sg + sg_in, 0.0)                     # (C, n*l3)

    # bilinear align_corners upsample (precomputed weights, one matmul/batch)
    up = up_ref[...]                                      # (l3, hw)
    local = jnp.concatenate(
        [jnp.dot(sg[:, b * l3:(b + 1) * l3], up, preferred_element_type=f32)
         for b in range(n)], axis=1)                      # (C, n*hw)
    spatial_local = x * local + x

    # ---------------- global (feature-space) GCN -----------------------------
    x_sqz = _bn_lanes(jnp.dot(phiw_ref[...], x, preferred_element_type=f32),
                      phibn_ref[...])                     # (2m, n*hw)
    bmat = _bn_lanes(jnp.dot(thetaw_ref[...], x, preferred_element_type=f32),
                     thetabn_ref[...])                    # (m,  n*hw)

    adj_w = adjw_ref[...]
    z_idt, z_adj = [], []
    for b in range(n):
        xs = x_sqz[:, b * hw:(b + 1) * hw]
        bm = bmat[:, b * hw:(b + 1) * hw]
        zi = lax.dot_general(xs, bm, _NT, preferred_element_type=f32)   # (2m, m)
        z_idt.append(zi)
        # conv_adj evaluated directly in the transposed (length, channel) layout
        z_adj.append(lax.dot_general(zi, adj_w, _NT, preferred_element_type=f32))
    z_adj = jnp.concatenate(z_adj, axis=0)                # (n*2m, m): channels on cols
    adj_gb = adjbn_ref[...]                               # (2, m): [gamma; beta]
    z_adj = _bn_rows(z_adj, adj_gb[0:1, :], adj_gb[1:2, :])

    gwg_w = gwgw_ref[...]
    z3 = [jnp.dot(gwg_w, z_adj[b * 2 * m:(b + 1) * 2 * m, :] + z_idt[b],
                  preferred_element_type=f32) for b in range(n)]        # (2m, m)
    z3 = _bn_lanes(jnp.concatenate(z3, axis=1), gwgbn_ref[...])         # (2m, n*m)

    y = jnp.concatenate(
        [jnp.dot(z3[:, b * m:(b + 1) * m], bmat[:, b * hw:(b + 1) * hw],
                 preferred_element_type=f32) for b in range(n)], axis=1)  # (2m, n*hw)
    y = _bn_lanes(jnp.dot(conv3w_ref[...], y, preferred_element_type=f32),
                  bn3_ref[...])                           # (C, n*hw)
    g_out = jnp.maximum(x + y, 0.0)

    # ---------------- final fuse conv + BN ------------------------------------
    cat = jnp.concatenate([spatial_local, g_out], axis=0)   # (2C, n*hw)
    out = _bn_lanes(jnp.dot(finw_ref[...], cat, preferred_element_type=f32),
                    finbn_ref[...])
    o_ref[...] = out.astype(o_ref.dtype)


# ------------------------ static geometry matrices --------------------------

def _make_im2col_matrix(h, w):
    """0/1 selection matrix for a 3x3 / stride-2 / pad-1 depthwise conv:
    shape (h*w, 9*ho*wo) so that x(C, h*w) @ P yields the 9 taps stacked on lanes."""
    ho, wo = (h + 1) // 2, (w + 1) // 2
    sel = np.zeros((h * w, 9 * ho * wo), np.float32)
    for dy in range(3):
        for dx in range(3):
            t = dy * 3 + dx
            for oh in range(ho):
                iy = 2 * oh + dy - 1
                if iy < 0 or iy >= h:
                    continue
                for ow in range(wo):
                    ix = 2 * ow + dx - 1
                    if ix < 0 or ix >= w:
                        continue
                    sel[iy * w + ix, t * ho * wo + oh * wo + ow] = 1.0
    return jnp.asarray(sel), ho, wo


def _make_upsample_matrix(hs, ws, ho, wo):
    """(hs*ws, ho*wo) bilinear align_corners=True interpolation weights."""
    up = np.zeros((hs * ws, ho * wo), np.float32)
    ys = np.linspace(0.0, hs - 1.0, ho) if ho > 1 else np.zeros((ho,))
    xs = np.linspace(0.0, ws - 1.0, wo) if wo > 1 else np.zeros((wo,))
    for oy in range(ho):
        y0 = int(np.floor(ys[oy])); y1 = min(y0 + 1, hs - 1); wy = float(ys[oy] - y0)
        for ox in range(wo):
            x0 = int(np.floor(xs[ox])); x1 = min(x0 + 1, ws - 1); wx = float(xs[ox] - x0)
            o = oy * wo + ox
            up[y0 * ws + x0, o] += (1.0 - wy) * (1.0 - wx)
            up[y0 * ws + x1, o] += (1.0 - wy) * wx
            up[y1 * ws + x0, o] += wy * (1.0 - wx)
            up[y1 * ws + x1, o] += wy * wx
    return jnp.asarray(up)


# ------------------------------ model forward --------------------------------

def dual_gcn(x, params):
    n, c, h, w = x.shape
    hw = h * w
    inter = c // 2
    m = params['theta_w'].shape[0]

    # static (shape-only) geometry matrices
    p1, h1, w1 = _make_im2col_matrix(h, w)
    p2, h2, w2 = _make_im2col_matrix(h1, w1)
    p3, h3, w3 = _make_im2col_matrix(h2, w2)
    up = _make_upsample_matrix(h3, w3, h, w)
    local_dims = ((h * w, h1 * w1), (h1 * w1, h2 * w2), (h2 * w2, h3 * w3))

    # channel-major slab with batch folded into the lane axis
    x_slab = jnp.transpose(x, (1, 0, 2, 3)).reshape(c, n * hw)

    kernel = functools.partial(
        _dual_gcn_kernel, n=n, hw=hw, inter=inter, m=m, local_dims=local_dims)
    out_slab = pl.pallas_call(
        kernel,
        out_shape=jax.ShapeDtypeStruct((c, n * hw), x.dtype),
        compiler_params=pltpu.CompilerParams(vmem_limit_bytes=32 * 1024 * 1024),
    )(x_slab, p1, p2, p3, up,
      params['dw_w'], params['dw_bn'],
      params['kqv_w'], params['kqv_b'], params['sg_wg_w'], params['sg_wg_bn'],
      params['sg_out_w'], params['sg_out_b'], params['sg_out_bn'],
      params['phi_w'], params['phi_bn'], params['theta_w'], params['theta_bn'],
      params['adj_w'], params['adj_bn'],
      params['gcn_wg_w'], params['gcn_wg_bn'], params['conv3_w'], params['bn3'],
      params['final_w'], params['final_bn'])
    return out_slab.reshape(c, n, h, w).transpose(1, 0, 2, 3)


# -------------------------------- init / main --------------------------------

def init_params(key, planes=8, ratio=4):
    m = planes // ratio
    mm2 = 2 * m
    inter = planes // 2
    ks = jax.random.split(key, 12)

    def nrm(k, shape, scale=0.1):
        return scale * jax.random.normal(k, shape, dtype=jnp.float32)

    def bn(rows):  # packed (rows, 2): col0 = gamma (ones), col1 = beta (zeros)
        return jnp.concatenate([jnp.ones((rows, 1), jnp.float32),
                                jnp.zeros((rows, 1), jnp.float32)], axis=1)

    return {
        # local pyramid: 3x depthwise Conv2d(3x3, s2, p1, groups=planes, no bias) + BN2d
        'dw_w': nrm(ks[0], (3, planes, 9)),
        'dw_bn': jnp.stack([bn(planes)] * 3, axis=0),            # (3, planes, 2)
        # SpatialGCN: node_k / node_v / node_q 1x1 convs concatenated (k, v, q)
        'kqv_w': nrm(ks[1], (3 * inter, planes)),
        'kqv_b': nrm(ks[2], (3 * inter, 1), 0.01),
        'sg_wg_w': nrm(ks[3], (inter, inter)),
        'sg_wg_bn': bn(inter),
        'sg_out_w': nrm(ks[4], (planes, inter)),
        'sg_out_b': nrm(ks[5], (planes, 1), 0.01),
        'sg_out_bn': bn(planes),
        # global feature GCN
        'phi_w': nrm(ks[6], (mm2, planes)),
        'phi_bn': bn(mm2),
        'theta_w': nrm(ks[7], (m, planes)),
        'theta_bn': bn(m),
        'adj_w': nrm(ks[8], (m, m)),
        'adj_bn': jnp.concatenate([jnp.ones((1, m), jnp.float32),
                                   jnp.zeros((1, m), jnp.float32)], axis=0),  # (2, m)
        'gcn_wg_w': nrm(ks[9], (mm2, mm2)),
        'gcn_wg_bn': bn(mm2),
        'conv3_w': nrm(ks[10], (planes, mm2)),
        'bn3': bn(planes),
        # final fuse: Conv2d(2*planes -> planes, 1x1, no bias) + BN2d
        'final_w': nrm(ks[11], (planes, 2 * planes)),
        'final_bn': bn(planes),
    }


if __name__ == "__main__":
    planes = 8            # ratio=4 -> m=2, 2m=4; SpatialGCN inter=4
    key = jax.random.PRNGKey(0)
    kx, kp = jax.random.split(key)
    x = jax.random.normal(kx, (2, planes, 16, 16), dtype=jnp.float32)
    params = init_params(kp, planes=planes, ratio=4)

    fwd = jax.jit(dual_gcn)
    out = jax.block_until_ready(fwd(x, params))
    assert out.shape == (2, planes, 16, 16)
    assert bool(jnp.all(jnp.isfinite(out)))
    print("KERNEL_OK")
</pallas_src>

<mosaic_0001>
module attributes {stable_mosaic.version = 11 : i64} {
  func.func @_dual_gcn_kernel(%arg0: memref<8x512xf32, #tpu.memory_space<vmem>>, %arg1: memref<256x576xf32, #tpu.memory_space<vmem>>, %arg2: memref<64x144xf32, #tpu.memory_space<vmem>>, %arg3: memref<16x36xf32, #tpu.memory_space<vmem>>, %arg4: memref<4x256xf32, #tpu.memory_space<vmem>>, %arg5: memref<3x8x9xf32, #tpu.memory_space<vmem>>, %arg6: memref<3x8x2xf32, #tpu.memory_space<vmem>>, %arg7: memref<12x8xf32, #tpu.memory_space<vmem>>, %arg8: memref<12x1xf32, #tpu.memory_space<vmem>>, %arg9: memref<4x4xf32, #tpu.memory_space<vmem>>, %arg10: memref<4x2xf32, #tpu.memory_space<vmem>>, %arg11: memref<8x4xf32, #tpu.memory_space<vmem>>, %arg12: memref<8x1xf32, #tpu.memory_space<vmem>>, %arg13: memref<8x2xf32, #tpu.memory_space<vmem>>, %arg14: memref<4x8xf32, #tpu.memory_space<vmem>>, %arg15: memref<4x2xf32, #tpu.memory_space<vmem>>, %arg16: memref<2x8xf32, #tpu.memory_space<vmem>>, %arg17: memref<2x2xf32, #tpu.memory_space<vmem>>, %arg18: memref<2x2xf32, #tpu.memory_space<vmem>>, %arg19: memref<2x2xf32, #tpu.memory_space<vmem>>, %arg20: memref<4x4xf32, #tpu.memory_space<vmem>>, %arg21: memref<4x2xf32, #tpu.memory_space<vmem>>, %arg22: memref<8x4xf32, #tpu.memory_space<vmem>>, %arg23: memref<8x2xf32, #tpu.memory_space<vmem>>, %arg24: memref<8x16xf32, #tpu.memory_space<vmem>>, %arg25: memref<8x2xf32, #tpu.memory_space<vmem>>, %arg26: memref<8x512xf32, #tpu.memory_space<vmem>>) attributes {dimension_semantics = [], scalar_prefetch = 0 : i64, scratch_operands = 0 : i64, tpu.core_type = #tpu.core_type<tc>} {
    %c0 = arith.constant 0 : index
    %c0_0 = arith.constant 0 : index
    %0 = vector.load %arg0[%c0, %c0_0] : memref<8x512xf32, #tpu.memory_space<vmem>>, vector<8x512xf32>
    %c0_1 = arith.constant 0 : index
    %c0_2 = arith.constant 0 : index
    %c0_3 = arith.constant 0 : index
    %1 = vector.load %arg5[%c0_1, %c0_2, %c0_3] : memref<3x8x9xf32, #tpu.memory_space<vmem>>, vector<1x8x9xf32>
    %2 = vector.shape_cast %1 : vector<1x8x9xf32> to vector<8x9xf32>
    %c0_4 = arith.constant 0 : index
    %c0_5 = arith.constant 0 : index
    %3 = vector.load %arg1[%c0_4, %c0_5] : memref<256x576xf32, #tpu.memory_space<vmem>>, vector<256x576xf32>
    %4 = vector.extract_strided_slice %0 {offsets = [0, 0], sizes = [8, 256], strides = [1, 1]} : vector<8x512xf32> to vector<8x256xf32>
    %cst = arith.constant dense<0.000000e+00> : vector<8x576xf32>
    %5 = tpu.matmul %4, %3, %cst {dimension_numbers = #tpu.dot_dimension_numbers<[1], [0], [0], [1], [0, 0, 1, 1], [], []>} : vector<8x256xf32>, vector<256x576xf32>, vector<8x576xf32> -> vector<8x576xf32>
    %6 = vector.extract_strided_slice %5 {offsets = [0, 0], sizes = [8, 64], strides = [1, 1]} : vector<8x576xf32> to vector<8x64xf32>
    %7 = vector.extract_strided_slice %2 {offsets = [0, 0], sizes = [8, 1], strides = [1, 1]} : vector<8x9xf32> to vector<8x1xf32>
    %8 = vector.broadcast %7 : vector<8x1xf32> to vector<8x64xf32>
    %9 = arith.mulf %6, %8 : vector<8x64xf32>
    %10 = vector.extract_strided_slice %5 {offsets = [0, 64], sizes = [8, 64], strides = [1, 1]} : vector<8x576xf32> to vector<8x64xf32>
    %11 = vector.extract_strided_slice %2 {offsets = [0, 1], sizes = [8, 1], strides = [1, 1]} : vector<8x9xf32> to vector<8x1xf32>
    %12 = vector.broadcast %11 : vector<8x1xf32> to vector<8x64xf32>
    %13 = arith.mulf %10, %12 : vector<8x64xf32>
    %14 = arith.addf %9, %13 : vector<8x64xf32>
    %15 = vector.extract_strided_slice %5 {offsets = [0, 128], sizes = [8, 64], strides = [1, 1]} : vector<8x576xf32> to vector<8x64xf32>
    %16 = vector.extract_strided_slice %2 {offsets = [0, 2], sizes = [8, 1], strides = [1, 1]} : vector<8x9xf32> to vector<8x1xf32>
    %17 = vector.broadcast %16 : vector<8x1xf32> to vector<8x64xf32>
    %18 = arith.mulf %15, %17 : vector<8x64xf32>
    %19 = arith.addf %14, %18 : vector<8x64xf32>
    %20 = vector.extract_strided_slice %5 {offsets = [0, 192], sizes = [8, 64], strides = [1, 1]} : vector<8x576xf32> to vector<8x64xf32>
    %21 = vector.extract_strided_slice %2 {offsets = [0, 3], sizes = [8, 1], strides = [1, 1]} : vector<8x9xf32> to vector<8x1xf32>
    %22 = vector.broadcast %21 : vector<8x1xf32> to vector<8x64xf32>
    %23 = arith.mulf %20, %22 : vector<8x64xf32>
    %24 = arith.addf %19, %23 : vector<8x64xf32>
    %25 = vector.extract_strided_slice %5 {offsets = [0, 256], sizes = [8, 64], strides = [1, 1]} : vector<8x576xf32> to vector<8x64xf32>
    %26 = vector.extract_strided_slice %2 {offsets = [0, 4], sizes = [8, 1], strides = [1, 1]} : vector<8x9xf32> to vector<8x1xf32>
    %27 = vector.broadcast %26 : vector<8x1xf32> to vector<8x64xf32>
    %28 = arith.mulf %25, %27 : vector<8x64xf32>
    %29 = arith.addf %24, %28 : vector<8x64xf32>
    %30 = vector.extract_strided_slice %5 {offsets = [0, 320], sizes = [8, 64], strides = [1, 1]} : vector<8x576xf32> to vector<8x64xf32>
    %31 = vector.extract_strided_slice %2 {offsets = [0, 5], sizes = [8, 1], strides = [1, 1]} : vector<8x9xf32> to vector<8x1xf32>
    %32 = vector.broadcast %31 : vector<8x1xf32> to vector<8x64xf32>
    %33 = arith.mulf %30, %32 : vector<8x64xf32>
    %34 = arith.addf %29, %33 : vector<8x64xf32>
    %35 = vector.extract_strided_slice %5 {offsets = [0, 384], sizes = [8, 64], strides = [1, 1]} : vector<8x576xf32> to vector<8x64xf32>
    %36 = vector.extract_strided_slice %2 {offsets = [0, 6], sizes = [8, 1], strides = [1, 1]} : vector<8x9xf32> to vector<8x1xf32>
    %37 = vector.broadcast %36 : vector<8x1xf32> to vector<8x64xf32>
    %38 = arith.mulf %35, %37 : vector<8x64xf32>
    %39 = arith.addf %34, %38 : vector<8x64xf32>
    %40 = vector.extract_strided_slice %5 {offsets = [0, 448], sizes = [8, 64], strides = [1, 1]} : vector<8x576xf32> to vector<8x64xf32>
    %41 = vector.extract_strided_slice %2 {offsets = [0, 7], sizes = [8, 1], strides = [1, 1]} : vector<8x9xf32> to vector<8x1xf32>
    %42 = vector.broadcast %41 : vector<8x1xf32> to vector<8x64xf32>
    %43 = arith.mulf %40, %42 : vector<8x64xf32>
    %44 = arith.addf %39, %43 : vector<8x64xf32>
    %45 = vector.extract_strided_slice %5 {offsets = [0, 512], sizes = [8, 64], strides = [1, 1]} : vector<8x576xf32> to vector<8x64xf32>
    %46 = vector.extract_strided_slice %2 {offsets = [0, 8], sizes = [8, 1], strides = [1, 1]} : vector<8x9xf32> to vector<8x1xf32>
    %47 = vector.broadcast %46 : vector<8x1xf32> to vector<8x64xf32>
    %48 = arith.mulf %45, %47 : vector<8x64xf32>
    %49 = arith.addf %44, %48 : vector<8x64xf32>
    %50 = vector.extract_strided_slice %0 {offsets = [0, 256], sizes = [8, 256], strides = [1, 1]} : vector<8x512xf32> to vector<8x256xf32>
    %cst_6 = arith.constant dense<0.000000e+00> : vector<8x576xf32>
    %51 = tpu.matmul %50, %3, %cst_6 {dimension_numbers = #tpu.dot_dimension_numbers<[1], [0], [0], [1], [0, 0, 1, 1], [], []>} : vector<8x256xf32>, vector<256x576xf32>, vector<8x576xf32> -> vector<8x576xf32>
    %52 = vector.extract_strided_slice %51 {offsets = [0, 0], sizes = [8, 64], strides = [1, 1]} : vector<8x576xf32> to vector<8x64xf32>
    %53 = vector.extract_strided_slice %2 {offsets = [0, 0], sizes = [8, 1], strides = [1, 1]} : vector<8x9xf32> to vector<8x1xf32>
    %54 = vector.broadcast %53 : vector<8x1xf32> to vector<8x64xf32>
    %55 = arith.mulf %52, %54 : vector<8x64xf32>
    %56 = vector.extract_strided_slice %51 {offsets = [0, 64], sizes = [8, 64], strides = [1, 1]} : vector<8x576xf32> to vector<8x64xf32>
    %57 = vector.extract_strided_slice %2 {offsets = [0, 1], sizes = [8, 1], strides = [1, 1]} : vector<8x9xf32> to vector<8x1xf32>
    %58 = vector.broadcast %57 : vector<8x1xf32> to vector<8x64xf32>
    %59 = arith.mulf %56, %58 : vector<8x64xf32>
    %60 = arith.addf %55, %59 : vector<8x64xf32>
    %61 = vector.extract_strided_slice %51 {offsets = [0, 128], sizes = [8, 64], strides = [1, 1]} : vector<8x576xf32> to vector<8x64xf32>
    %62 = vector.extract_strided_slice %2 {offsets = [0, 2], sizes = [8, 1], strides = [1, 1]} : vector<8x9xf32> to vector<8x1xf32>
    %63 = vector.broadcast %62 : vector<8x1xf32> to vector<8x64xf32>
    %64 = arith.mulf %61, %63 : vector<8x64xf32>
    %65 = arith.addf %60, %64 : vector<8x64xf32>
    %66 = vector.extract_strided_slice %51 {offsets = [0, 192], sizes = [8, 64], strides = [1, 1]} : vector<8x576xf32> to vector<8x64xf32>
    %67 = vector.extract_strided_slice %2 {offsets = [0, 3], sizes = [8, 1], strides = [1, 1]} : vector<8x9xf32> to vector<8x1xf32>
    %68 = vector.broadcast %67 : vector<8x1xf32> to vector<8x64xf32>
    %69 = arith.mulf %66, %68 : vector<8x64xf32>
    %70 = arith.addf %65, %69 : vector<8x64xf32>
    %71 = vector.extract_strided_slice %51 {offsets = [0, 256], sizes = [8, 64], strides = [1, 1]} : vector<8x576xf32> to vector<8x64xf32>
    %72 = vector.extract_strided_slice %2 {offsets = [0, 4], sizes = [8, 1], strides = [1, 1]} : vector<8x9xf32> to vector<8x1xf32>
    %73 = vector.broadcast %72 : vector<8x1xf32> to vector<8x64xf32>
    %74 = arith.mulf %71, %73 : vector<8x64xf32>
    %75 = arith.addf %70, %74 : vector<8x64xf32>
    %76 = vector.extract_strided_slice %51 {offsets = [0, 320], sizes = [8, 64], strides = [1, 1]} : vector<8x576xf32> to vector<8x64xf32>
    %77 = vector.extract_strided_slice %2 {offsets = [0, 5], sizes = [8, 1], strides = [1, 1]} : vector<8x9xf32> to vector<8x1xf32>
    %78 = vector.broadcast %77 : vector<8x1xf32> to vector<8x64xf32>
    %79 = arith.mulf %76, %78 : vector<8x64xf32>
    %80 = arith.addf %75, %79 : vector<8x64xf32>
    %81 = vector.extract_strided_slice %51 {offsets = [0, 384], sizes = [8, 64], strides = [1, 1]} : vector<8x576xf32> to vector<8x64xf32>
    %82 = vector.extract_strided_slice %2 {offsets = [0, 6], sizes = [8, 1], strides = [1, 1]} : vector<8x9xf32> to vector<8x1xf32>
    %83 = vector.broadcast %82 : vector<8x1xf32> to vector<8x64xf32>
    %84 = arith.mulf %81, %83 : vector<8x64xf32>
    %85 = arith.addf %80, %84 : vector<8x64xf32>
    %86 = vector.extract_strided_slice %51 {offsets = [0, 448], sizes = [8, 64], strides = [1, 1]} : vector<8x576xf32> to vector<8x64xf32>
    %87 = vector.extract_strided_slice %2 {offsets = [0, 7], sizes = [8, 1], strides = [1, 1]} : vector<8x9xf32> to vector<8x1xf32>
    %88 = vector.broadcast %87 : vector<8x1xf32> to vector<8x64xf32>
    %89 = arith.mulf %86, %88 : vector<8x64xf32>
    %90 = arith.addf %85, %89 : vector<8x64xf32>
    %91 = vector.extract_strided_slice %51 {offsets = [0, 512], sizes = [8, 64], strides = [1, 1]} : vector<8x576xf32> to vector<8x64xf32>
    %92 = vector.extract_strided_slice %2 {offsets = [0, 8], sizes = [8, 1], strides = [1, 1]} : vector<8x9xf32> to vector<8x1xf32>
    %93 = vector.broadcast %92 : vector<8x1xf32> to vector<8x64xf32>
    %94 = arith.mulf %91, %93 : vector<8x64xf32>
    %95 = arith.addf %90, %94 : vector<8x64xf32>
    %96 = tpu.concatenate %49, %95 in 1 : vector<8x64xf32>, vector<8x64xf32> -> vector<8x128xf32>
    %c0_7 = arith.constant 0 : index
    %c0_8 = arith.constant 0 : index
    %c0_9 = arith.constant 0 : index
    %97 = vector.load %arg6[%c0_7, %c0_8, %c0_9] : memref<3x8x2xf32, #tpu.memory_space<vmem>>, vector<1x8x2xf32>
    %98 = vector.shape_cast %97 : vector<1x8x2xf32> to vector<8x2xf32>
    %cst_10 = arith.constant dense<0.000000e+00> : vector<8xf32>
    %99 = vector.multi_reduction <add>, %96, %cst_10 [1] : vector<8x128xf32> to vector<8xf32>
    %100 = vector.shape_cast %99 : vector<8xf32> to vector<8x1xf32>
    %cst_11 = arith.constant 1.280000e+02 : f32
    %101 = vector.broadcast %cst_11 : f32 to vector<8x1xf32>
    %102 = arith.divf %100, %101 : vector<8x1xf32>
    %103 = vector.broadcast %102 : vector<8x1xf32> to vector<8x128xf32>
    %104 = arith.subf %96, %103 : vector<8x128xf32>
    %105 = vector.broadcast %102 : vector<8x1xf32> to vector<8x128xf32>
    %106 = arith.subf %96, %105 : vector<8x128xf32>
    %107 = arith.mulf %104, %106 : vector<8x128xf32>
    %cst_12 = arith.constant dense<0.000000e+00> : vector<8xf32>
    %108 = vector.multi_reduction <add>, %107, %cst_12 [1] : vector<8x128xf32> to vector<8xf32>
    %109 = vector.shape_cast %108 : vector<8xf32> to vector<8x1xf32>
    %cst_13 = arith.constant 1.280000e+02 : f32
    %110 = vector.broadcast %cst_13 : f32 to vector<8x1xf32>
    %111 = arith.divf %109, %110 : vector<8x1xf32>
    %cst_14 = arith.constant 9.99999974E-6 : f32
    %112 = vector.broadcast %cst_14 : f32 to vector<8x1xf32>
    %113 = arith.addf %111, %112 : vector<8x1xf32>
    %114 = math.rsqrt %113 : vector<8x1xf32>
    %115 = vector.broadcast %102 : vector<8x1xf32> to vector<8x128xf32>
    %116 = arith.subf %96, %115 : vector<8x128xf32>
    %117 = vector.broadcast %114 : vector<8x1xf32> to vector<8x128xf32>
    %118 = arith.mulf %116, %117 : vector<8x128xf32>
    %119 = vector.extract_strided_slice %98 {offsets = [0, 0], sizes = [8, 1], strides = [1, 1]} : vector<8x2xf32> to vector<8x1xf32>
    %120 = vector.broadcast %119 : vector<8x1xf32> to vector<8x128xf32>
    %121 = arith.mulf %118, %120 : vector<8x128xf32>
    %122 = vector.extract_strided_slice %98 {offsets = [0, 1], sizes = [8, 1], strides = [1, 1]} : vector<8x2xf32> to vector<8x1xf32>
    %123 = vector.broadcast %122 : vector<8x1xf32> to vector<8x128xf32>
    %124 = arith.addf %121, %123 : vector<8x128xf32>
    %c1 = arith.constant 1 : index
    %c0_15 = arith.constant 0 : index
    %c0_16 = arith.constant 0 : index
    %125 = vector.load %arg5[%c1, %c0_15, %c0_16] : memref<3x8x9xf32, #tpu.memory_space<vmem>>, vector<1x8x9xf32>
    %126 = vector.shape_cast %125 : vector<1x8x9xf32> to vector<8x9xf32>
    %c0_17 = arith.constant 0 : index
    %c0_18 = arith.constant 0 : index
    %127 = vector.load %arg2[%c0_17, %c0_18] : memref<64x144xf32, #tpu.memory_space<vmem>>, vector<64x144xf32>
    %128 = vector.extract_strided_slice %124 {offsets = [0, 0], sizes = [8, 64], strides = [1, 1]} : vector<8x128xf32> to vector<8x64xf32>
    %cst_19 = arith.constant dense<0.000000e+00> : vector<8x144xf32>
    %129 = tpu.matmul %128, %127, %cst_19 {dimension_numbers = #tpu.dot_dimension_numbers<[1], [0], [0], [1], [0, 0, 1, 1], [], []>} : vector<8x64xf32>, vector<64x144xf32>, vector<8x144xf32> -> vector<8x144xf32>
    %130 = vector.extract_strided_slice %129 {offsets = [0, 0], sizes = [8, 16], strides = [1, 1]} : vector<8x144xf32> to vector<8x16xf32>
    %131 = vector.extract_strided_slice %126 {offsets = [0, 0], sizes = [8, 1], strides = [1, 1]} : vector<8x9xf32> to vector<8x1xf32>
    %132 = vector.broadcast %131 : vector<8x1xf32> to vector<8x16xf32>
    %133 = arith.mulf %130, %132 : vector<8x16xf32>
    %134 = vector.extract_strided_slice %129 {offsets = [0, 16], sizes = [8, 16], strides = [1, 1]} : vector<8x144xf32> to vector<8x16xf32>
    %135 = vector.extract_strided_slice %126 {offsets = [0, 1], sizes = [8, 1], strides = [1, 1]} : vector<8x9xf32> to vector<8x1xf32>
    %136 = vector.broadcast %135 : vector<8x1xf32> to vector<8x16xf32>
    %137 = arith.mulf %134, %136 : vector<8x16xf32>
    %138 = arith.addf %133, %137 : vector<8x16xf32>
    %139 = vector.extract_strided_slice %129 {offsets = [0, 32], sizes = [8, 16], strides = [1, 1]} : vector<8x144xf32> to vector<8x16xf32>
    %140 = vector.extract_strided_slice %126 {offsets = [0, 2], sizes = [8, 1], strides = [1, 1]} : vector<8x9xf32> to vector<8x1xf32>
    %141 = vector.broadcast %140 : vector<8x1xf32> to vector<8x16xf32>
    %142 = arith.mulf %139, %141 : vector<8x16xf32>
    %143 = arith.addf %138, %142 : vector<8x16xf32>
    %144 = vector.extract_strided_slice %129 {offsets = [0, 48], sizes = [8, 16], strides = [1, 1]} : vector<8x144xf32> to vector<8x16xf32>
    %145 = vector.extract_strided_slice %126 {offsets = [0, 3], sizes = [8, 1], strides = [1, 1]} : vector<8x9xf32> to vector<8x1xf32>
    %146 = vector.broadcast %145 : vector<8x1xf32> to vector<8x16xf32>
    %147 = arith.mulf %144, %146 : vector<8x16xf32>
    %148 = arith.addf %143, %147 : vector<8x16xf32>
    %149 = vector.extract_strided_slice %129 {offsets = [0, 64], sizes = [8, 16], strides = [1, 1]} : vector<8x144xf32> to vector<8x16xf32>
    %150 = vector.extract_strided_slice %126 {offsets = [0, 4], sizes = [8, 1], strides = [1, 1]} : vector<8x9xf32> to vector<8x1xf32>
    %151 = vector.broadcast %150 : vector<8x1xf32> to vector<8x16xf32>
    %152 = arith.mulf %149, %151 : vector<8x16xf32>
    %153 = arith.addf %148, %152 : vector<8x16xf32>
    %154 = vector.extract_strided_slice %129 {offsets = [0, 80], sizes = [8, 16], strides = [1, 1]} : vector<8x144xf32> to vector<8x16xf32>
    %155 = vector.extract_strided_slice %126 {offsets = [0, 5], sizes = [8, 1], strides = [1, 1]} : vector<8x9xf32> to vector<8x1xf32>
    %156 = vector.broadcast %155 : vector<8x1xf32> to vector<8x16xf32>
    %157 = arith.mulf %154, %156 : vector<8x16xf32>
    %158 = arith.addf %153, %157 : vector<8x16xf32>
    %159 = vector.extract_strided_slice %129 {offsets = [0, 96], sizes = [8, 16], strides = [1, 1]} : vector<8x144xf32> to vector<8x16xf32>
    %160 = vector.extract_strided_slice %126 {offsets = [0, 6], sizes = [8, 1], strides = [1, 1]} : vector<8x9xf32> to vector<8x1xf32>
    %161 = vector.broadcast %160 : vector<8x1xf32> to vector<8x16xf32>
    %162 = arith.mulf %159, %161 : vector<8x16xf32>
    %163 = arith.addf %158, %162 : vector<8x16xf32>
    %164 = vector.extract_strided_slice %129 {offsets = [0, 112], sizes = [8, 16], strides = [1, 1]} : vector<8x144xf32> to vector<8x16xf32>
    %165 = vector.extract_strided_slice %126 {offsets = [0, 7], sizes = [8, 1], strides = [1, 1]} : vector<8x9xf32> to vector<8x1xf32>
    %166 = vector.broadcast %165 : vector<8x1xf32> to vector<8x16xf32>
    %167 = arith.mulf %164, %166 : vector<8x16xf32>
    %168 = arith.addf %163, %167 : vector<8x16xf32>
    %169 = vector.extract_strided_slice %129 {offsets = [0, 128], sizes = [8, 16], strides = [1, 1]} : vector<8x144xf32> to vector<8x16xf32>
    %170 = vector.extract_strided_slice %126 {offsets = [0, 8], sizes = [8, 1], strides = [1, 1]} : vector<8x9xf32> to vector<8x1xf32>
    %171 = vector.broadcast %170 : vector<8x1xf32> to vector<8x16xf32>
    %172 = arith.mulf %169, %171 : vector<8x16xf32>
    %173 = arith.addf %168, %172 : vector<8x16xf32>
    %174 = vector.extract_strided_slice %124 {offsets = [0, 64], sizes = [8, 64], strides = [1, 1]} : vector<8x128xf32> to vector<8x64xf32>
    %cst_20 = arith.constant dense<0.000000e+00> : vector<8x144xf32>
    %175 = tpu.matmul %174, %127, %cst_20 {dimension_numbers = #tpu.dot_dimension_numbers<[1], [0], [0], [1], [0, 0, 1, 1], [], []>} : vector<8x64xf32>, vector<64x144xf32>, vector<8x144xf32> -> vector<8x144xf32>
    %176 = vector.extract_strided_slice %175 {offsets = [0, 0], sizes = [8, 16], strides = [1, 1]} : vector<8x144xf32> to vector<8x16xf32>
    %177 = vector.extract_strided_slice %126 {offsets = [0, 0], sizes = [8, 1], strides = [1, 1]} : vector<8x9xf32> to vector<8x1xf32>
    %178 = vector.broadcast %177 : vector<8x1xf32> to vector<8x16xf32>
    %179 = arith.mulf %176, %178 : vector<8x16xf32>
    %180 = vector.extract_strided_slice %175 {offsets = [0, 16], sizes = [8, 16], strides = [1, 1]} : vector<8x144xf32> to vector<8x16xf32>
    %181 = vector.extract_strided_slice %126 {offsets = [0, 1], sizes = [8, 1], strides = [1, 1]} : vector<8x9xf32> to vector<8x1xf32>
    %182 = vector.broadcast %181 : vector<8x1xf32> to vector<8x16xf32>
    %183 = arith.mulf %180, %182 : vector<8x16xf32>
    %184 = arith.addf %179, %183 : vector<8x16xf32>
    %185 = vector.extract_strided_slice %175 {offsets = [0, 32], sizes = [8, 16], strides = [1, 1]} : vector<8x144xf32> to vector<8x16xf32>
    %186 = vector.extract_strided_slice %126 {offsets = [0, 2], sizes = [8, 1], strides = [1, 1]} : vector<8x9xf32> to vector<8x1xf32>
    %187 = vector.broadcast %186 : vector<8x1xf32> to vector<8x16xf32>
    %188 = arith.mulf %185, %187 : vector<8x16xf32>
    %189 = arith.addf %184, %188 : vector<8x16xf32>
    %190 = vector.extract_strided_slice %175 {offsets = [0, 48], sizes = [8, 16], strides = [1, 1]} : vector<8x144xf32> to vector<8x16xf32>
    %191 = vector.extract_strided_slice %126 {offsets = [0, 3], sizes = [8, 1], strides = [1, 1]} : vector<8x9xf32> to vector<8x1xf32>
    %192 = vector.broadcast %191 : vector<8x1xf32> to vector<8x16xf32>
    %193 = arith.mulf %190, %192 : vector<8x16xf32>
    %194 = arith.addf %189, %193 : vector<8x16xf32>
    %195 = vector.extract_strided_slice %175 {offsets = [0, 64], sizes = [8, 16], strides = [1, 1]} : vector<8x144xf32> to vector<8x16xf32>
    %196 = vector.extract_strided_slice %126 {offsets = [0, 4], sizes = [8, 1], strides = [1, 1]} : vector<8x9xf32> to vector<8x1xf32>
    %197 = vector.broadcast %196 : vector<8x1xf32> to vector<8x16xf32>
    %198 = arith.mulf %195, %197 : vector<8x16xf32>
    %199 = arith.addf %194, %198 : vector<8x16xf32>
    %200 = vector.extract_strided_slice %175 {offsets = [0, 80], sizes = [8, 16], strides = [1, 1]} : vector<8x144xf32> to vector<8x16xf32>
    %201 = vector.extract_strided_slice %126 {offsets = [0, 5], sizes = [8, 1], strides = [1, 1]} : vector<8x9xf32> to vector<8x1xf32>
    %202 = vector.broadcast %201 : vector<8x1xf32> to vector<8x16xf32>
    %203 = arith.mulf %200, %202 : vector<8x16xf32>
    %204 = arith.addf %199, %203 : vector<8x16xf32>
    %205 = vector.extract_strided_slice %175 {offsets = [0, 96], sizes = [8, 16], strides = [1, 1]} : vector<8x144xf32> to vector<8x16xf32>
    %206 = vector.extract_strided_slice %126 {offsets = [0, 6], sizes = [8, 1], strides = [1, 1]} : vector<8x9xf32> to vector<8x1xf32>
    %207 = vector.broadcast %206 : vector<8x1xf32> to vector<8x16xf32>
    %208 = arith.mulf %205, %207 : vector<8x16xf32>
    %209 = arith.addf %204, %208 : vector<8x16xf32>
    %210 = vector.extract_strided_slice %175 {offsets = [0, 112], sizes = [8, 16], strides = [1, 1]} : vector<8x144xf32> to vector<8x16xf32>
    %211 = vector.extract_strided_slice %126 {offsets = [0, 7], sizes = [8, 1], strides = [1, 1]} : vector<8x9xf32> to vector<8x1xf32>
    %212 = vector.broadcast %211 : vector<8x1xf32> to vector<8x16xf32>
    %213 = arith.mulf %210, %212 : vector<8x16xf32>
    %214 = arith.addf %209, %213 : vector<8x16xf32>
    %215 = vector.extract_strided_slice %175 {offsets = [0, 128], sizes = [8, 16], strides = [1, 1]} : vector<8x144xf32> to vector<8x16xf32>
    %216 = vector.extract_strided_slice %126 {offsets = [0, 8], sizes = [8, 1], strides = [1, 1]} : vector<8x9xf32> to vector<8x1xf32>
    %217 = vector.broadcast %216 : vector<8x1xf32> to vector<8x16xf32>
    %218 = arith.mulf %215, %217 : vector<8x16xf32>
    %219 = arith.addf %214, %218 : vector<8x16xf32>
    %220 = tpu.concatenate %173, %219 in 1 : vector<8x16xf32>, vector<8x16xf32> -> vector<8x32xf32>
    %c1_21 = arith.constant 1 : index
    %c0_22 = arith.constant 0 : index
    %c0_23 = arith.constant 0 : index
    %221 = vector.load %arg6[%c1_21, %c0_22, %c0_23] : memref<3x8x2xf32, #tpu.memory_space<vmem>>, vector<1x8x2xf32>
    %222 = vector.shape_cast %221 : vector<1x8x2xf32> to vector<8x2xf32>
    %cst_24 = arith.constant dense<0.000000e+00> : vector<8xf32>
    %223 = vector.multi_reduction <add>, %220, %cst_24 [1] : vector<8x32xf32> to vector<8xf32>
    %224 = vector.shape_cast %223 : vector<8xf32> to vector<8x1xf32>
    %cst_25 = arith.constant 3.200000e+01 : f32
    %225 = vector.broadcast %cst_25 : f32 to vector<8x1xf32>
    %226 = arith.divf %224, %225 : vector<8x1xf32>
    %227 = vector.broadcast %226 : vector<8x1xf32> to vector<8x32xf32>
    %228 = arith.subf %220, %227 : vector<8x32xf32>
    %229 = vector.broadcast %226 : vector<8x1xf32> to vector<8x32xf32>
    %230 = arith.subf %220, %229 : vector<8x32xf32>
    %231 = arith.mulf %228, %230 : vector<8x32xf32>
    %cst_26 = arith.constant dense<0.000000e+00> : vector<8xf32>
    %232 = vector.multi_reduction <add>, %231, %cst_26 [1] : vector<8x32xf32> to vector<8xf32>
    %233 = vector.shape_cast %232 : vector<8xf32> to vector<8x1xf32>
    %cst_27 = arith.constant 3.200000e+01 : f32
    %234 = vector.broadcast %cst_27 : f32 to vector<8x1xf32>
    %235 = arith.divf %233, %234 : vector<8x1xf32>
    %cst_28 = arith.constant 9.99999974E-6 : f32
    %236 = vector.broadcast %cst_28 : f32 to vector<8x1xf32>
    %237 = arith.addf %235, %236 : vector<8x1xf32>
    %238 = math.rsqrt %237 : vector<8x1xf32>
    %239 = vector.broadcast %226 : vector<8x1xf32> to vector<8x32xf32>
    %240 = arith.subf %220, %239 : vector<8x32xf32>
    %241 = vector.broadcast %238 : vector<8x1xf32> to vector<8x32xf32>
    %242 = arith.mulf %240, %241 : vector<8x32xf32>
    %243 = vector.extract_strided_slice %222 {offsets = [0, 0], sizes = [8, 1], strides = [1, 1]} : vector<8x2xf32> to vector<8x1xf32>
    %244 = vector.broadcast %243 : vector<8x1xf32> to vector<8x32xf32>
    %245 = arith.mulf %242, %244 : vector<8x32xf32>
    %246 = vector.extract_strided_slice %222 {offsets = [0, 1], sizes = [8, 1], strides = [1, 1]} : vector<8x2xf32> to vector<8x1xf32>
    %247 = vector.broadcast %246 : vector<8x1xf32> to vector<8x32xf32>
    %248 = arith.addf %245, %247 : vector<8x32xf32>
    %c2 = arith.constant 2 : index
    %c0_29 = arith.constant 0 : index
    %c0_30 = arith.constant 0 : index
    %249 = vector.load %arg5[%c2, %c0_29, %c0_30] : memref<3x8x9xf32, #tpu.memory_space<vmem>>, vector<1x8x9xf32>
    %250 = vector.shape_cast %249 : vector<1x8x9xf32> to vector<8x9xf32>
    %c0_31 = arith.constant 0 : index
    %c0_32 = arith.constant 0 : index
    %251 = vector.load %arg3[%c0_31, %c0_32] : memref<16x36xf32, #tpu.memory_space<vmem>>, vector<16x36xf32>
    %252 = vector.extract_strided_slice %248 {offsets = [0, 0], sizes = [8, 16], strides = [1, 1]} : vector<8x32xf32> to vector<8x16xf32>
    %cst_33 = arith.constant dense<0.000000e+00> : vector<8x36xf32>
    %253 = tpu.matmul %252, %251, %cst_33 {dimension_numbers = #tpu.dot_dimension_numbers<[1], [0], [0], [1], [0, 0, 1, 1], [], []>} : vector<8x16xf32>, vector<16x36xf32>, vector<8x36xf32> -> vector<8x36xf32>
    %254 = vector.extract_strided_slice %253 {offsets = [0, 0], sizes = [8, 4], strides = [1, 1]} : vector<8x36xf32> to vector<8x4xf32>
    %255 = vector.extract_strided_slice %250 {offsets = [0, 0], sizes = [8, 1], strides = [1, 1]} : vector<8x9xf32> to vector<8x1xf32>
    %256 = vector.broadcast %255 : vector<8x1xf32> to vector<8x4xf32>
    %257 = arith.mulf %254, %256 : vector<8x4xf32>
    %258 = vector.extract_strided_slice %253 {offsets = [0, 4], sizes = [8, 4], strides = [1, 1]} : vector<8x36xf32> to vector<8x4xf32>
    %259 = vector.extract_strided_slice %250 {offsets = [0, 1], sizes = [8, 1], strides = [1, 1]} : vector<8x9xf32> to vector<8x1xf32>
    %260 = vector.broadcast %259 : vector<8x1xf32> to vector<8x4xf32>
    %261 = arith.mulf %258, %260 : vector<8x4xf32>
    %262 = arith.addf %257, %261 : vector<8x4xf32>
    %263 = vector.extract_strided_slice %253 {offsets = [0, 8], sizes = [8, 4], strides = [1, 1]} : vector<8x36xf32> to vector<8x4xf32>
    %264 = vector.extract_strided_slice %250 {offsets = [0, 2], sizes = [8, 1], strides = [1, 1]} : vector<8x9xf32> to vector<8x1xf32>
    %265 = vector.broadcast %264 : vector<8x1xf32> to vector<8x4xf32>
    %266 = arith.mulf %263, %265 : vector<8x4xf32>
    %267 = arith.addf %262, %266 : vector<8x4xf32>
    %268 = vector.extract_strided_slice %253 {offsets = [0, 12], sizes = [8, 4], strides = [1, 1]} : vector<8x36xf32> to vector<8x4xf32>
    %269 = vector.extract_strided_slice %250 {offsets = [0, 3], sizes = [8, 1], strides = [1, 1]} : vector<8x9xf32> to vector<8x1xf32>
    %270 = vector.broadcast %269 : vector<8x1xf32> to vector<8x4xf32>
    %271 = arith.mulf %268, %270 : vector<8x4xf32>
    %272 = arith.addf %267, %271 : vector<8x4xf32>
    %273 = vector.extract_strided_slice %253 {offsets = [0, 16], sizes = [8, 4], strides = [1, 1]} : vector<8x36xf32> to vector<8x4xf32>
    %274 = vector.extract_strided_slice %250 {offsets = [0, 4], sizes = [8, 1], strides = [1, 1]} : vector<8x9xf32> to vector<8x1xf32>
    %275 = vector.broadcast %274 : vector<8x1xf32> to vector<8x4xf32>
    %276 = arith.mulf %273, %275 : vector<8x4xf32>
    %277 = arith.addf %272, %276 : vector<8x4xf32>
    %278 = vector.extract_strided_slice %253 {offsets = [0, 20], sizes = [8, 4], strides = [1, 1]} : vector<8x36xf32> to vector<8x4xf32>
    %279 = vector.extract_strided_slice %250 {offsets = [0, 5], sizes = [8, 1], strides = [1, 1]} : vector<8x9xf32> to vector<8x1xf32>
    %280 = vector.broadcast %279 : vector<8x1xf32> to vector<8x4xf32>
    %281 = arith.mulf %278, %280 : vector<8x4xf32>
    %282 = arith.addf %277, %281 : vector<8x4xf32>
    %283 = vector.extract_strided_slice %253 {offsets = [0, 24], sizes = [8, 4], strides = [1, 1]} : vector<8x36xf32> to vector<8x4xf32>
    %284 = vector.extract_strided_slice %250 {offsets = [0, 6], sizes = [8, 1], strides = [1, 1]} : vector<8x9xf32> to vector<8x1xf32>
    %285 = vector.broadcast %284 : vector<8x1xf32> to vector<8x4xf32>
    %286 = arith.mulf %283, %285 : vector<8x4xf32>
    %287 = arith.addf %282, %286 : vector<8x4xf32>
    %288 = vector.extract_strided_slice %253 {offsets = [0, 28], sizes = [8, 4], strides = [1, 1]} : vector<8x36xf32> to vector<8x4xf32>
    %289 = vector.extract_strided_slice %250 {offsets = [0, 7], sizes = [8, 1], strides = [1, 1]} : vector<8x9xf32> to vector<8x1xf32>
    %290 = vector.broadcast %289 : vector<8x1xf32> to vector<8x4xf32>
    %291 = arith.mulf %288, %290 : vector<8x4xf32>
    %292 = arith.addf %287, %291 : vector<8x4xf32>
    %293 = vector.extract_strided_slice %253 {offsets = [0, 32], sizes = [8, 4], strides = [1, 1]} : vector<8x36xf32> to vector<8x4xf32>
    %294 = vector.extract_strided_slice %250 {offsets = [0, 8], sizes = [8, 1], strides = [1, 1]} : vector<8x9xf32> to vector<8x1xf32>
    %295 = vector.broadcast %294 : vector<8x1xf32> to vector<8x4xf32>
    %296 = arith.mulf %293, %295 : vector<8x4xf32>
    %297 = arith.addf %292, %296 : vector<8x4xf32>
    %298 = vector.extract_strided_slice %248 {offsets = [0, 16], sizes = [8, 16], strides = [1, 1]} : vector<8x32xf32> to vector<8x16xf32>
    %cst_34 = arith.constant dense<0.000000e+00> : vector<8x36xf32>
    %299 = tpu.matmul %298, %251, %cst_34 {dimension_numbers = #tpu.dot_dimension_numbers<[1], [0], [0], [1], [0, 0, 1, 1], [], []>} : vector<8x16xf32>, vector<16x36xf32>, vector<8x36xf32> -> vector<8x36xf32>
    %300 = vector.extract_strided_slice %299 {offsets = [0, 0], sizes = [8, 4], strides = [1, 1]} : vector<8x36xf32> to vector<8x4xf32>
    %301 = vector.extract_strided_slice %250 {offsets = [0, 0], sizes = [8, 1], strides = [1, 1]} : vector<8x9xf32> to vector<8x1xf32>
    %302 = vector.broadcast %301 : vector<8x1xf32> to vector<8x4xf32>
    %303 = arith.mulf %300, %302 : vector<8x4xf32>
    %304 = vector.extract_strided_slice %299 {offsets = [0, 4], sizes = [8, 4], strides = [1, 1]} : vector<8x36xf32> to vector<8x4xf32>
    %305 = vector.extract_strided_slice %250 {offsets = [0, 1], sizes = [8, 1], strides = [1, 1]} : vector<8x9xf32> to vector<8x1xf32>
    %306 = vector.broadcast %305 : vector<8x1xf32> to vector<8x4xf32>
    %307 = arith.mulf %304, %306 : vector<8x4xf32>
    %308 = arith.addf %303, %307 : vector<8x4xf32>
    %309 = vector.extract_strided_slice %299 {offsets = [0, 8], sizes = [8, 4], strides = [1, 1]} : vector<8x36xf32> to vector<8x4xf32>
    %310 = vector.extract_strided_slice %250 {offsets = [0, 2], sizes = [8, 1], strides = [1, 1]} : vector<8x9xf32> to vector<8x1xf32>
    %311 = vector.broadcast %310 : vector<8x1xf32> to vector<8x4xf32>
    %312 = arith.mulf %309, %311 : vector<8x4xf32>
    %313 = arith.addf %308, %312 : vector<8x4xf32>
    %314 = vector.extract_strided_slice %299 {offsets = [0, 12], sizes = [8, 4], strides = [1, 1]} : vector<8x36xf32> to vector<8x4xf32>
    %315 = vector.extract_strided_slice %250 {offsets = [0, 3], sizes = [8, 1], strides = [1, 1]} : vector<8x9xf32> to vector<8x1xf32>
    %316 = vector.broadcast %315 : vector<8x1xf32> to vector<8x4xf32>
    %317 = arith.mulf %314, %316 : vector<8x4xf32>
    %318 = arith.addf %313, %317 : vector<8x4xf32>
    %319 = vector.extract_strided_slice %299 {offsets = [0, 16], sizes = [8, 4], strides = [1, 1]} : vector<8x36xf32> to vector<8x4xf32>
    %320 = vector.extract_strided_slice %250 {offsets = [0, 4], sizes = [8, 1], strides = [1, 1]} : vector<8x9xf32> to vector<8x1xf32>
    %321 = vector.broadcast %320 : vector<8x1xf32> to vector<8x4xf32>
    %322 = arith.mulf %319, %321 : vector<8x4xf32>
    %323 = arith.addf %318, %322 : vector<8x4xf32>
    %324 = vector.extract_strided_slice %299 {offsets = [0, 20], sizes = [8, 4], strides = [1, 1]} : vector<8x36xf32> to vector<8x4xf32>
    %325 = vector.extract_strided_slice %250 {offsets = [0, 5], sizes = [8, 1], strides = [1, 1]} : vector<8x9xf32> to vector<8x1xf32>
    %326 = vector.broadcast %325 : vector<8x1xf32> to vector<8x4xf32>
    %327 = arith.mulf %324, %326 : vector<8x4xf32>
    %328 = arith.addf %323, %327 : vector<8x4xf32>
    %329 = vector.extract_strided_slice %299 {offsets = [0, 24], sizes = [8, 4], strides = [1, 1]} : vector<8x36xf32> to vector<8x4xf32>
    %330 = vector.extract_strided_slice %250 {offsets = [0, 6], sizes = [8, 1], strides = [1, 1]} : vector<8x9xf32> to vector<8x1xf32>
    %331 = vector.broadcast %330 : vector<8x1xf32> to vector<8x4xf32>
    %332 = arith.mulf %329, %331 : vector<8x4xf32>
    %333 = arith.addf %328, %332 : vector<8x4xf32>
    %334 = vector.extract_strided_slice %299 {offsets = [0, 28], sizes = [8, 4], strides = [1, 1]} : vector<8x36xf32> to vector<8x4xf32>
    %335 = vector.extract_strided_slice %250 {offsets = [0, 7], sizes = [8, 1], strides = [1, 1]} : vector<8x9xf32> to vector<8x1xf32>
    %336 = vector.broadcast %335 : vector<8x1xf32> to vector<8x4xf32>
    %337 = arith.mulf %334, %336 : vector<8x4xf32>
    %338 = arith.addf %333, %337 : vector<8x4xf32>
    %339 = vector.extract_strided_slice %299 {offsets = [0, 32], sizes = [8, 4], strides = [1, 1]} : vector<8x36xf32> to vector<8x4xf32>
    %340 = vector.extract_strided_slice %250 {offsets = [0, 8], sizes = [8, 1], strides = [1, 1]} : vector<8x9xf32> to vector<8x1xf32>
    %341 = vector.broadcast %340 : vector<8x1xf32> to vector<8x4xf32>
    %342 = arith.mulf %339, %341 : vector<8x4xf32>
    %343 = arith.addf %338, %342 : vector<8x4xf32>
    %344 = tpu.concatenate %297, %343 in 1 : vector<8x4xf32>, vector<8x4xf32> -> vector<8x8xf32>
    %c2_35 = arith.constant 2 : index
    %c0_36 = arith.constant 0 : index
    %c0_37 = arith.constant 0 : index
    %345 = vector.load %arg6[%c2_35, %c0_36, %c0_37] : memref<3x8x2xf32, #tpu.memory_space<vmem>>, vector<1x8x2xf32>
    %346 = vector.shape_cast %345 : vector<1x8x2xf32> to vector<8x2xf32>
    %cst_38 = arith.constant dense<0.000000e+00> : vector<8xf32>
    %347 = vector.multi_reduction <add>, %344, %cst_38 [1] : vector<8x8xf32> to vector<8xf32>
    %348 = vector.shape_cast %347 : vector<8xf32> to vector<8x1xf32>
    %cst_39 = arith.constant 8.000000e+00 : f32
    %349 = vector.broadcast %cst_39 : f32 to vector<8x1xf32>
    %350 = arith.divf %348, %349 : vector<8x1xf32>
    %351 = vector.broadcast %350 : vector<8x1xf32> to vector<8x8xf32>
    %352 = arith.subf %344, %351 : vector<8x8xf32>
    %353 = vector.broadcast %350 : vector<8x1xf32> to vector<8x8xf32>
    %354 = arith.subf %344, %353 : vector<8x8xf32>
    %355 = arith.mulf %352, %354 : vector<8x8xf32>
    %cst_40 = arith.constant dense<0.000000e+00> : vector<8xf32>
    %356 = vector.multi_reduction <add>, %355, %cst_40 [1] : vector<8x8xf32> to vector<8xf32>
    %357 = vector.shape_cast %356 : vector<8xf32> to vector<8x1xf32>
    %cst_41 = arith.constant 8.000000e+00 : f32
    %358 = vector.broadcast %cst_41 : f32 to vector<8x1xf32>
    %359 = arith.divf %357, %358 : vector<8x1xf32>
    %cst_42 = arith.constant 9.99999974E-6 : f32
    %360 = vector.broadcast %cst_42 : f32 to vector<8x1xf32>
    %361 = arith.addf %359, %360 : vector<8x1xf32>
    %362 = math.rsqrt %361 : vector<8x1xf32>
    %363 = vector.broadcast %350 : vector<8x1xf32> to vector<8x8xf32>
    %364 = arith.subf %344, %363 : vector<8x8xf32>
    %365 = vector.broadcast %362 : vector<8x1xf32> to vector<8x8xf32>
    %366 = arith.mulf %364, %365 : vector<8x8xf32>
    %367 = vector.extract_strided_slice %346 {offsets = [0, 0], sizes = [8, 1], strides = [1, 1]} : vector<8x2xf32> to vector<8x1xf32>
    %368 = vector.broadcast %367 : vector<8x1xf32> to vector<8x8xf32>
    %369 = arith.mulf %366, %368 : vector<8x8xf32>
    %370 = vector.extract_strided_slice %346 {offsets = [0, 1], sizes = [8, 1], strides = [1, 1]} : vector<8x2xf32> to vector<8x1xf32>
    %371 = vector.broadcast %370 : vector<8x1xf32> to vector<8x8xf32>
    %372 = arith.addf %369, %371 : vector<8x8xf32>
    %c0_43 = arith.constant 0 : index
    %c0_44 = arith.constant 0 : index
    %373 = vector.load %arg7[%c0_43, %c0_44] : memref<12x8xf32, #tpu.memory_space<vmem>>, vector<12x8xf32>
    %cst_45 = arith.constant dense<0.000000e+00> : vector<12x8xf32>
    %374 = tpu.matmul %373, %372, %cst_45 {dimension_numbers = #tpu.dot_dimension_numbers<[1], [0], [0], [1], [0, 0, 1, 1], [], []>} : vector<12x8xf32>, vector<8x8xf32>, vector<12x8xf32> -> vector<12x8xf32>
    %c0_46 = arith.constant 0 : index
    %c0_47 = arith.constant 0 : index
    %375 = vector.load %arg8[%c0_46, %c0_47] : memref<12x1xf32, #tpu.memory_space<vmem>>, vector<12x1xf32>
    %376 = vector.broadcast %375 : vector<12x1xf32> to vector<12x8xf32>
    %377 = arith.addf %374, %376 : vector<12x8xf32>
    %378 = vector.extract_strided_slice %377 {offsets = [0, 0], sizes = [4, 8], strides = [1, 1]} : vector<12x8xf32> to vector<4x8xf32>
    %379 = vector.extract_strided_slice %377 {offsets = [4, 0], sizes = [4, 8], strides = [1, 1]} : vector<12x8xf32> to vector<4x8xf32>
    %380 = vector.extract_strided_slice %377 {offsets = [8, 0], sizes = [4, 8], strides = [1, 1]} : vector<12x8xf32> to vector<4x8xf32>
    %381 = vector.extract_strided_slice %380 {offsets = [0, 0], sizes = [4, 4], strides = [1, 1]} : vector<4x8xf32> to vector<4x4xf32>
    %382 = vector.extract_strided_slice %379 {offsets = [0, 0], sizes = [4, 4], strides = [1, 1]} : vector<4x8xf32> to vector<4x4xf32>
    %383 = vector.extract_strided_slice %378 {offsets = [0, 0], sizes = [4, 4], strides = [1, 1]} : vector<4x8xf32> to vector<4x4xf32>
    %cst_48 = arith.constant dense<0.000000e+00> : vector<4x4xf32>
    %384 = tpu.matmul %382, %381, %cst_48 {dimension_numbers = #tpu.dot_dimension_numbers<[1], [1], [0], [0], [0, 0, 1, 0], [], []>} : vector<4x4xf32>, vector<4x4xf32>, vector<4x4xf32> -> vector<4x4xf32>
    %cst_49 = arith.constant dense<0xFF800000> : vector<4xf32>
    %385 = vector.multi_reduction <maximumf>, %384, %cst_49 [0] : vector<4x4xf32> to vector<4xf32>
    %386 = vector.shape_cast %385 : vector<4xf32> to vector<1x4xf32>
    %387 = vector.broadcast %386 : vector<1x4xf32> to vector<4x4xf32>
    %388 = arith.subf %384, %387 : vector<4x4xf32>
    %389 = math.exp %388 : vector<4x4xf32>
    %cst_50 = arith.constant dense<0.000000e+00> : vector<4xf32>
    %390 = vector.multi_reduction <add>, %389, %cst_50 [0] : vector<4x4xf32> to vector<4xf32>
    %391 = vector.shape_cast %390 : vector<4xf32> to vector<1x4xf32>
    %392 = tpu.reciprocal %391 {approx = true} : vector<1x4xf32> -> vector<1x4xf32>
    %393 = vector.broadcast %392 : vector<1x4xf32> to vector<4x4xf32>
    %394 = arith.mulf %389, %393 : vector<4x4xf32>
    %cst_51 = arith.constant dense<0.000000e+00> : vector<4x4xf32>
    %395 = tpu.matmul %394, %383, %cst_51 {dimension_numbers = #tpu.dot_dimension_numbers<[1], [0], [0], [1], [0, 0, 1, 1], [], []>} : vector<4x4xf32>, vector<4x4xf32>, vector<4x4xf32> -> vector<4x4xf32>
    %396 = vector.extract_strided_slice %380 {offsets = [0, 4], sizes = [4, 4], strides = [1, 1]} : vector<4x8xf32> to vector<4x4xf32>
    %397 = vector.extract_strided_slice %379 {offsets = [0, 4], sizes = [4, 4], strides = [1, 1]} : vector<4x8xf32> to vector<4x4xf32>
    %398 = vector.extract_strided_slice %378 {offsets = [0, 4], sizes = [4, 4], strides = [1, 1]} : vector<4x8xf32> to vector<4x4xf32>
    %cst_52 = arith.constant dense<0.000000e+00> : vector<4x4xf32>
    %399 = tpu.matmul %397, %396, %cst_52 {dimension_numbers = #tpu.dot_dimension_numbers<[1], [1], [0], [0], [0, 0, 1, 0], [], []>} : vector<4x4xf32>, vector<4x4xf32>, vector<4x4xf32> -> vector<4x4xf32>
    %cst_53 = arith.constant dense<0xFF800000> : vector<4xf32>
    %400 = vector.multi_reduction <maximumf>, %399, %cst_53 [0] : vector<4x4xf32> to vector<4xf32>
    %401 = vector.shape_cast %400 : vector<4xf32> to vector<1x4xf32>
    %402 = vector.broadcast %401 : vector<1x4xf32> to vector<4x4xf32>
    %403 = arith.subf %399, %402 : vector<4x4xf32>
    %404 = math.exp %403 : vector<4x4xf32>
    %cst_54 = arith.constant dense<0.000000e+00> : vector<4xf32>
    %405 = vector.multi_reduction <add>, %404, %cst_54 [0] : vector<4x4xf32> to vector<4xf32>
    %406 = vector.shape_cast %405 : vector<4xf32> to vector<1x4xf32>
    %407 = tpu.reciprocal %406 {approx = true} : vector<1x4xf32> -> vector<1x4xf32>
    %408 = vector.broadcast %407 : vector<1x4xf32> to vector<4x4xf32>
    %409 = arith.mulf %404, %408 : vector<4x4xf32>
    %cst_55 = arith.constant dense<0.000000e+00> : vector<4x4xf32>
    %410 = tpu.matmul %409, %398, %cst_55 {dimension_numbers = #tpu.dot_dimension_numbers<[1], [0], [0], [1], [0, 0, 1, 1], [], []>} : vector<4x4xf32>, vector<4x4xf32>, vector<4x4xf32> -> vector<4x4xf32>
    %411 = tpu.concatenate %395, %410 in 1 : vector<4x4xf32>, vector<4x4xf32> -> vector<4x8xf32>
    %c0_56 = arith.constant 0 : index
    %c0_57 = arith.constant 0 : index
    %412 = vector.load %arg9[%c0_56, %c0_57] : memref<4x4xf32, #tpu.memory_space<vmem>>, vector<4x4xf32>
    %cst_58 = arith.constant dense<0.000000e+00> : vector<4x8xf32>
    %413 = tpu.matmul %412, %411, %cst_58 {dimension_numbers = #tpu.dot_dimension_numbers<[1], [0], [0], [1], [0, 0, 1, 1], [], []>} : vector<4x4xf32>, vector<4x8xf32>, vector<4x8xf32> -> vector<4x8xf32>
    %c0_59 = arith.constant 0 : index
    %c0_60 = arith.constant 0 : index
    %414 = vector.load %arg10[%c0_59, %c0_60] : memref<4x2xf32, #tpu.memory_space<vmem>>, vector<4x2xf32>
    %cst_61 = arith.constant dense<0.000000e+00> : vector<4xf32>
    %415 = vector.multi_reduction <add>, %413, %cst_61 [1] : vector<4x8xf32> to vector<4xf32>
    %416 = vector.shape_cast %415 : vector<4xf32> to vector<4x1xf32>
    %cst_62 = arith.constant 8.000000e+00 : f32
    %417 = vector.broadcast %cst_62 : f32 to vector<4x1xf32>
    %418 = arith.divf %416, %417 : vector<4x1xf32>
    %419 = vector.broadcast %418 : vector<4x1xf32> to vector<4x8xf32>
    %420 = arith.subf %413, %419 : vector<4x8xf32>
    %421 = vector.broadcast %418 : vector<4x1xf32> to vector<4x8xf32>
    %422 = arith.subf %413, %421 : vector<4x8xf32>
    %423 = arith.mulf %420, %422 : vector<4x8xf32>
    %cst_63 = arith.constant dense<0.000000e+00> : vector<4xf32>
    %424 = vector.multi_reduction <add>, %423, %cst_63 [1] : vector<4x8xf32> to vector<4xf32>
    %425 = vector.shape_cast %424 : vector<4xf32> to vector<4x1xf32>
    %cst_64 = arith.constant 8.000000e+00 : f32
    %426 = vector.broadcast %cst_64 : f32 to vector<4x1xf32>
    %427 = arith.divf %425, %426 : vector<4x1xf32>
    %cst_65 = arith.constant 9.99999974E-6 : f32
    %428 = vector.broadcast %cst_65 : f32 to vector<4x1xf32>
    %429 = arith.addf %427, %428 : vector<4x1xf32>
    %430 = math.rsqrt %429 : vector<4x1xf32>
    %431 = vector.broadcast %418 : vector<4x1xf32> to vector<4x8xf32>
    %432 = arith.subf %413, %431 : vector<4x8xf32>
    %433 = vector.broadcast %430 : vector<4x1xf32> to vector<4x8xf32>
    %434 = arith.mulf %432, %433 : vector<4x8xf32>
    %435 = vector.extract_strided_slice %414 {offsets = [0, 0], sizes = [4, 1], strides = [1, 1]} : vector<4x2xf32> to vector<4x1xf32>
    %436 = vector.broadcast %435 : vector<4x1xf32> to vector<4x8xf32>
    %437 = arith.mulf %434, %436 : vector<4x8xf32>
    %438 = vector.extract_strided_slice %414 {offsets = [0, 1], sizes = [4, 1], strides = [1, 1]} : vector<4x2xf32> to vector<4x1xf32>
    %439 = vector.broadcast %438 : vector<4x1xf32> to vector<4x8xf32>
    %440 = arith.addf %437, %439 : vector<4x8xf32>
    %c0_66 = arith.constant 0 : index
    %c0_67 = arith.constant 0 : index
    %441 = vector.load %arg11[%c0_66, %c0_67] : memref<8x4xf32, #tpu.memory_space<vmem>>, vector<8x4xf32>
    %cst_68 = arith.constant dense<0.000000e+00> : vector<8x8xf32>
    %442 = tpu.matmul %441, %440, %cst_68 {dimension_numbers = #tpu.dot_dimension_numbers<[1], [0], [0], [1], [0, 0, 1, 1], [], []>} : vector<8x4xf32>, vector<4x8xf32>, vector<8x8xf32> -> vector<8x8xf32>
    %c0_69 = arith.constant 0 : index
    %c0_70 = arith.constant 0 : index
    %443 = vector.load %arg12[%c0_69, %c0_70] : memref<8x1xf32, #tpu.memory_space<vmem>>, vector<8x1xf32>
    %444 = vector.broadcast %443 : vector<8x1xf32> to vector<8x8xf32>
    %445 = arith.addf %442, %444 : vector<8x8xf32>
    %c0_71 = arith.constant 0 : index
    %c0_72 = arith.constant 0 : index
    %446 = vector.load %arg13[%c0_71, %c0_72] : memref<8x2xf32, #tpu.memory_space<vmem>>, vector<8x2xf32>
    %cst_73 = arith.constant dense<0.000000e+00> : vector<8xf32>
    %447 = vector.multi_reduction <add>, %445, %cst_73 [1] : vector<8x8xf32> to vector<8xf32>
    %448 = vector.shape_cast %447 : vector<8xf32> to vector<8x1xf32>
    %cst_74 = arith.constant 8.000000e+00 : f32
    %449 = vector.broadcast %cst_74 : f32 to vector<8x1xf32>
    %450 = arith.divf %448, %449 : vector<8x1xf32>
    %451 = vector.broadcast %450 : vector<8x1xf32> to vector<8x8xf32>
    %452 = arith.subf %445, %451 : vector<8x8xf32>
    %453 = vector.broadcast %450 : vector<8x1xf32> to vector<8x8xf32>
    %454 = arith.subf %445, %453 : vector<8x8xf32>
    %455 = arith.mulf %452, %454 : vector<8x8xf32>
    %cst_75 = arith.constant dense<0.000000e+00> : vector<8xf32>
    %456 = vector.multi_reduction <add>, %455, %cst_75 [1] : vector<8x8xf32> to vector<8xf32>
    %457 = vector.shape_cast %456 : vector<8xf32> to vector<8x1xf32>
    %cst_76 = arith.constant 8.000000e+00 : f32
    %458 = vector.broadcast %cst_76 : f32 to vector<8x1xf32>
    %459 = arith.divf %457, %458 : vector<8x1xf32>
    %cst_77 = arith.constant 9.99999974E-6 : f32
    %460 = vector.broadcast %cst_77 : f32 to vector<8x1xf32>
    %461 = arith.addf %459, %460 : vector<8x1xf32>
    %462 = math.rsqrt %461 : vector<8x1xf32>
    %463 = vector.broadcast %450 : vector<8x1xf32> to vector<8x8xf32>
    %464 = arith.subf %445, %463 : vector<8x8xf32>
    %465 = vector.broadcast %462 : vector<8x1xf32> to vector<8x8xf32>
    %466 = arith.mulf %464, %465 : vector<8x8xf32>
    %467 = vector.extract_strided_slice %446 {offsets = [0, 0], sizes = [8, 1], strides = [1, 1]} : vector<8x2xf32> to vector<8x1xf32>
    %468 = vector.broadcast %467 : vector<8x1xf32> to vector<8x8xf32>
    %469 = arith.mulf %466, %468 : vector<8x8xf32>
    %470 = vector.extract_strided_slice %446 {offsets = [0, 1], sizes = [8, 1], strides = [1, 1]} : vector<8x2xf32> to vector<8x1xf32>
    %471 = vector.broadcast %470 : vector<8x1xf32> to vector<8x8xf32>
    %472 = arith.addf %469, %471 : vector<8x8xf32>
    %473 = arith.addf %472, %372 : vector<8x8xf32>
    %cst_78 = arith.constant 0.000000e+00 : f32
    %474 = vector.broadcast %cst_78 : f32 to vector<8x8xf32>
    %475 = arith.maximumf %473, %474 : vector<8x8xf32>
    %c0_79 = arith.constant 0 : index
    %c0_80 = arith.constant 0 : index
    %476 = vector.load %arg4[%c0_79, %c0_80] : memref<4x256xf32, #tpu.memory_space<vmem>>, vector<4x256xf32>
    %477 = vector.extract_strided_slice %475 {offsets = [0, 0], sizes = [8, 4], strides = [1, 1]} : vector<8x8xf32> to vector<8x4xf32>
    %cst_81 = arith.constant dense<0.000000e+00> : vector<8x256xf32>
    %478 = tpu.matmul %477, %476, %cst_81 {dimension_numbers = #tpu.dot_dimension_numbers<[1], [0], [0], [1], [0, 0, 1, 1], [], []>} : vector<8x4xf32>, vector<4x256xf32>, vector<8x256xf32> -> vector<8x256xf32>
    %479 = vector.extract_strided_slice %475 {offsets = [0, 4], sizes = [8, 4], strides = [1, 1]} : vector<8x8xf32> to vector<8x4xf32>
    %cst_82 = arith.constant dense<0.000000e+00> : vector<8x256xf32>
    %480 = tpu.matmul %479, %476, %cst_82 {dimension_numbers = #tpu.dot_dimension_numbers<[1], [0], [0], [1], [0, 0, 1, 1], [], []>} : vector<8x4xf32>, vector<4x256xf32>, vector<8x256xf32> -> vector<8x256xf32>
    %481 = tpu.concatenate %478, %480 in 1 : vector<8x256xf32>, vector<8x256xf32> -> vector<8x512xf32>
    %482 = arith.mulf %0, %481 : vector<8x512xf32>
    %483 = arith.addf %482, %0 : vector<8x512xf32>
    %c0_83 = arith.constant 0 : index
    %c0_84 = arith.constant 0 : index
    %484 = vector.load %arg14[%c0_83, %c0_84] : memref<4x8xf32, #tpu.memory_space<vmem>>, vector<4x8xf32>
    %cst_85 = arith.constant dense<0.000000e+00> : vector<4x512xf32>
    %485 = tpu.matmul %484, %0, %cst_85 {dimension_numbers = #tpu.dot_dimension_numbers<[1], [0], [0], [1], [0, 0, 1, 1], [], []>} : vector<4x8xf32>, vector<8x512xf32>, vector<4x512xf32> -> vector<4x512xf32>
    %c0_86 = arith.constant 0 : index
    %c0_87 = arith.constant 0 : index
    %486 = vector.load %arg15[%c0_86, %c0_87] : memref<4x2xf32, #tpu.memory_space<vmem>>, vector<4x2xf32>
    %cst_88 = arith.constant dense<0.000000e+00> : vector<4xf32>
    %487 = vector.multi_reduction <add>, %485, %cst_88 [1] : vector<4x512xf32> to vector<4xf32>
    %488 = vector.shape_cast %487 : vector<4xf32> to vector<4x1xf32>
    %cst_89 = arith.constant 5.120000e+02 : f32
    %489 = vector.broadcast %cst_89 : f32 to vector<4x1xf32>
    %490 = arith.divf %488, %489 : vector<4x1xf32>
    %491 = vector.broadcast %490 : vector<4x1xf32> to vector<4x512xf32>
    %492 = arith.subf %485, %491 : vector<4x512xf32>
    %493 = vector.broadcast %490 : vector<4x1xf32> to vector<4x512xf32>
    %494 = arith.subf %485, %493 : vector<4x512xf32>
    %495 = arith.mulf %492, %494 : vector<4x512xf32>
    %cst_90 = arith.constant dense<0.000000e+00> : vector<4xf32>
    %496 = vector.multi_reduction <add>, %495, %cst_90 [1] : vector<4x512xf32> to vector<4xf32>
    %497 = vector.shape_cast %496 : vector<4xf32> to vector<4x1xf32>
    %cst_91 = arith.constant 5.120000e+02 : f32
    %498 = vector.broadcast %cst_91 : f32 to vector<4x1xf32>
    %499 = arith.divf %497, %498 : vector<4x1xf32>
    %cst_92 = arith.constant 9.99999974E-6 : f32
    %500 = vector.broadcast %cst_92 : f32 to vector<4x1xf32>
    %501 = arith.addf %499, %500 : vector<4x1xf32>
    %502 = math.rsqrt %501 : vector<4x1xf32>
    %503 = vector.broadcast %490 : vector<4x1xf32> to vector<4x512xf32>
    %504 = arith.subf %485, %503 : vector<4x512xf32>
    %505 = vector.broadcast %502 : vector<4x1xf32> to vector<4x512xf32>
    %506 = arith.mulf %504, %505 : vector<4x512xf32>
    %507 = vector.extract_strided_slice %486 {offsets = [0, 0], sizes = [4, 1], strides = [1, 1]} : vector<4x2xf32> to vector<4x1xf32>
    %508 = vector.broadcast %507 : vector<4x1xf32> to vector<4x512xf32>
    %509 = arith.mulf %506, %508 : vector<4x512xf32>
    %510 = vector.extract_strided_slice %486 {offsets = [0, 1], sizes = [4, 1], strides = [1, 1]} : vector<4x2xf32> to vector<4x1xf32>
    %511 = vector.broadcast %510 : vector<4x1xf32> to vector<4x512xf32>
    %512 = arith.addf %509, %511 : vector<4x512xf32>
    %c0_93 = arith.constant 0 : index
    %c0_94 = arith.constant 0 : index
    %513 = vector.load %arg16[%c0_93, %c0_94] : memref<2x8xf32, #tpu.memory_space<vmem>>, vector<2x8xf32>
    %cst_95 = arith.constant dense<0.000000e+00> : vector<2x512xf32>
    %514 = tpu.matmul %513, %0, %cst_95 {dimension_numbers = #tpu.dot_dimension_numbers<[1], [0], [0], [1], [0, 0, 1, 1], [], []>} : vector<2x8xf32>, vector<8x512xf32>, vector<2x512xf32> -> vector<2x512xf32>
    %c0_96 = arith.constant 0 : index
    %c0_97 = arith.constant 0 : index
    %515 = vector.load %arg17[%c0_96, %c0_97] : memref<2x2xf32, #tpu.memory_space<vmem>>, vector<2x2xf32>
    %cst_98 = arith.constant dense<0.000000e+00> : vector<2xf32>
    %516 = vector.multi_reduction <add>, %514, %cst_98 [1] : vector<2x512xf32> to vector<2xf32>
    %517 = vector.shape_cast %516 : vector<2xf32> to vector<2x1xf32>
    %cst_99 = arith.constant 5.120000e+02 : f32
    %518 = vector.broadcast %cst_99 : f32 to vector<2x1xf32>
    %519 = arith.divf %517, %518 : vector<2x1xf32>
    %520 = vector.broadcast %519 : vector<2x1xf32> to vector<2x512xf32>
    %521 = arith.subf %514, %520 : vector<2x512xf32>
    %522 = vector.broadcast %519 : vector<2x1xf32> to vector<2x512xf32>
    %523 = arith.subf %514, %522 : vector<2x512xf32>
    %524 = arith.mulf %521, %523 : vector<2x512xf32>
    %cst_100 = arith.constant dense<0.000000e+00> : vector<2xf32>
    %525 = vector.multi_reduction <add>, %524, %cst_100 [1] : vector<2x512xf32> to vector<2xf32>
    %526 = vector.shape_cast %525 : vector<2xf32> to vector<2x1xf32>
    %cst_101 = arith.constant 5.120000e+02 : f32
    %527 = vector.broadcast %cst_101 : f32 to vector<2x1xf32>
    %528 = arith.divf %526, %527 : vector<2x1xf32>
    %cst_102 = arith.constant 9.99999974E-6 : f32
    %529 = vector.broadcast %cst_102 : f32 to vector<2x1xf32>
    %530 = arith.addf %528, %529 : vector<2x1xf32>
    %531 = math.rsqrt %530 : vector<2x1xf32>
    %532 = vector.broadcast %519 : vector<2x1xf32> to vector<2x512xf32>
    %533 = arith.subf %514, %532 : vector<2x512xf32>
    %534 = vector.broadcast %531 : vector<2x1xf32> to vector<2x512xf32>
    %535 = arith.mulf %533, %534 : vector<2x512xf32>
    %536 = vector.extract_strided_slice %515 {offsets = [0, 0], sizes = [2, 1], strides = [1, 1]} : vector<2x2xf32> to vector<2x1xf32>
    %537 = vector.broadcast %536 : vector<2x1xf32> to vector<2x512xf32>
    %538 = arith.mulf %535, %537 : vector<2x512xf32>
    %539 = vector.extract_strided_slice %515 {offsets = [0, 1], sizes = [2, 1], strides = [1, 1]} : vector<2x2xf32> to vector<2x1xf32>
    %540 = vector.broadcast %539 : vector<2x1xf32> to vector<2x512xf32>
    %541 = arith.addf %538, %540 : vector<2x512xf32>
    %c0_103 = arith.constant 0 : index
    %c0_104 = arith.constant 0 : index
    %542 = vector.load %arg18[%c0_103, %c0_104] : memref<2x2xf32, #tpu.memory_space<vmem>>, vector<2x2xf32>
    %543 = vector.extract_strided_slice %512 {offsets = [0, 0], sizes = [4, 256], strides = [1, 1]} : vector<4x512xf32> to vector<4x256xf32>
    %544 = vector.extract_strided_slice %541 {offsets = [0, 0], sizes = [2, 256], strides = [1, 1]} : vector<2x512xf32> to vector<2x256xf32>
    %cst_105 = arith.constant dense<0.000000e+00> : vector<4x2xf32>
    %545 = tpu.matmul %543, %544, %cst_105 {dimension_numbers = #tpu.dot_dimension_numbers<[1], [1], [0], [0], [0, 0, 1, 0], [], []>} : vector<4x256xf32>, vector<2x256xf32>, vector<4x2xf32> -> vector<4x2xf32>
    %cst_106 = arith.constant dense<0.000000e+00> : vector<4x2xf32>
    %546 = tpu.matmul %545, %542, %cst_106 {dimension_numbers = #tpu.dot_dimension_numbers<[1], [1], [0], [0], [0, 0, 1, 0], [], []>} : vector<4x2xf32>, vector<2x2xf32>, vector<4x2xf32> -> vector<4x2xf32>
    %547 = vector.extract_strided_slice %512 {offsets = [0, 256], sizes = [4, 256], strides = [1, 1]} : vector<4x512xf32> to vector<4x256xf32>
    %548 = vector.extract_strided_slice %541 {offsets = [0, 256], sizes = [2, 256], strides = [1, 1]} : vector<2x512xf32> to vector<2x256xf32>
    %cst_107 = arith.constant dense<0.000000e+00> : vector<4x2xf32>
    %549 = tpu.matmul %547, %548, %cst_107 {dimension_numbers = #tpu.dot_dimension_numbers<[1], [1], [0], [0], [0, 0, 1, 0], [], []>} : vector<4x256xf32>, vector<2x256xf32>, vector<4x2xf32> -> vector<4x2xf32>
    %cst_108 = arith.constant dense<0.000000e+00> : vector<4x2xf32>
    %550 = tpu.matmul %549, %542, %cst_108 {dimension_numbers = #tpu.dot_dimension_numbers<[1], [1], [0], [0], [0, 0, 1, 0], [], []>} : vector<4x2xf32>, vector<2x2xf32>, vector<4x2xf32> -> vector<4x2xf32>
    %551 = tpu.concatenate %546, %550 in 0 : vector<4x2xf32>, vector<4x2xf32> -> vector<8x2xf32>
    %c0_109 = arith.constant 0 : index
    %c0_110 = arith.constant 0 : index
    %552 = vector.load %arg19[%c0_109, %c0_110] : memref<2x2xf32, #tpu.memory_space<vmem>>, vector<2x2xf32>
    %553 = vector.extract_strided_slice %552 {offsets = [0, 0], sizes = [1, 2], strides = [1, 1]} : vector<2x2xf32> to vector<1x2xf32>
    %554 = vector.extract_strided_slice %552 {offsets = [1, 0], sizes = [1, 2], strides = [1, 1]} : vector<2x2xf32> to vector<1x2xf32>
    %cst_111 = arith.constant dense<0.000000e+00> : vector<2xf32>
    %555 = vector.multi_reduction <add>, %551, %cst_111 [0] : vector<8x2xf32> to vector<2xf32>
    %556 = vector.shape_cast %555 : vector<2xf32> to vector<1x2xf32>
    %cst_112 = arith.constant 8.000000e+00 : f32
    %557 = vector.broadcast %cst_112 : f32 to vector<1x2xf32>
    %558 = arith.divf %556, %557 : vector<1x2xf32>
    %559 = vector.broadcast %558 : vector<1x2xf32> to vector<8x2xf32>
    %560 = arith.subf %551, %559 : vector<8x2xf32>
    %561 = vector.broadcast %558 : vector<1x2xf32> to vector<8x2xf32>
    %562 = arith.subf %551, %561 : vector<8x2xf32>
    %563 = arith.mulf %560, %562 : vector<8x2xf32>
    %cst_113 = arith.constant dense<0.000000e+00> : vector<2xf32>
    %564 = vector.multi_reduction <add>, %563, %cst_113 [0] : vector<8x2xf32> to vector<2xf32>
    %565 = vector.shape_cast %564 : vector<2xf32> to vector<1x2xf32>
    %cst_114 = arith.constant 8.000000e+00 : f32
    %566 = vector.broadcast %cst_114 : f32 to vector<1x2xf32>
    %567 = arith.divf %565, %566 : vector<1x2xf32>
    %cst_115 = arith.constant 9.99999974E-6 : f32
    %568 = vector.broadcast %cst_115 : f32 to vector<1x2xf32>
    %569 = arith.addf %567, %568 : vector<1x2xf32>
    %570 = math.rsqrt %569 : vector<1x2xf32>
    %571 = vector.broadcast %558 : vector<1x2xf32> to vector<8x2xf32>
    %572 = arith.subf %551, %571 : vector<8x2xf32>
    %573 = vector.broadcast %570 : vector<1x2xf32> to vector<8x2xf32>
    %574 = arith.mulf %572, %573 : vector<8x2xf32>
    %575 = vector.broadcast %553 : vector<1x2xf32> to vector<8x2xf32>
    %576 = arith.mulf %574, %575 : vector<8x2xf32>
    %577 = vector.broadcast %554 : vector<1x2xf32> to vector<8x2xf32>
    %578 = arith.addf %576, %577 : vector<8x2xf32>
    %c0_116 = arith.constant 0 : index
    %c0_117 = arith.constant 0 : index
    %579 = vector.load %arg20[%c0_116, %c0_117] : memref<4x4xf32, #tpu.memory_space<vmem>>, vector<4x4xf32>
    %580 = vector.extract_strided_slice %578 {offsets = [0, 0], sizes = [4, 2], strides = [1, 1]} : vector<8x2xf32> to vector<4x2xf32>
    %581 = arith.addf %580, %545 : vector<4x2xf32>
    %cst_118 = arith.constant dense<0.000000e+00> : vector<4x2xf32>
    %582 = tpu.matmul %579, %581, %cst_118 {dimension_numbers = #tpu.dot_dimension_numbers<[1], [0], [0], [1], [0, 0, 1, 1], [], []>} : vector<4x4xf32>, vector<4x2xf32>, vector<4x2xf32> -> vector<4x2xf32>
    %583 = vector.extract_strided_slice %578 {offsets = [4, 0], sizes = [4, 2], strides = [1, 1]} : vector<8x2xf32> to vector<4x2xf32>
    %584 = arith.addf %583, %549 : vector<4x2xf32>
    %cst_119 = arith.constant dense<0.000000e+00> : vector<4x2xf32>
    %585 = tpu.matmul %579, %584, %cst_119 {dimension_numbers = #tpu.dot_dimension_numbers<[1], [0], [0], [1], [0, 0, 1, 1], [], []>} : vector<4x4xf32>, vector<4x2xf32>, vector<4x2xf32> -> vector<4x2xf32>
    %586 = tpu.concatenate %582, %585 in 1 : vector<4x2xf32>, vector<4x2xf32> -> vector<4x4xf32>
    %c0_120 = arith.constant 0 : index
    %c0_121 = arith.constant 0 : index
    %587 = vector.load %arg21[%c0_120, %c0_121] : memref<4x2xf32, #tpu.memory_space<vmem>>, vector<4x2xf32>
    %cst_122 = arith.constant dense<0.000000e+00> : vector<4xf32>
    %588 = vector.multi_reduction <add>, %586, %cst_122 [1] : vector<4x4xf32> to vector<4xf32>
    %589 = vector.shape_cast %588 : vector<4xf32> to vector<4x1xf32>
    %cst_123 = arith.constant 4.000000e+00 : f32
    %590 = vector.broadcast %cst_123 : f32 to vector<4x1xf32>
    %591 = arith.divf %589, %590 : vector<4x1xf32>
    %592 = vector.broadcast %591 : vector<4x1xf32> to vector<4x4xf32>
    %593 = arith.subf %586, %592 : vector<4x4xf32>
    %594 = vector.broadcast %591 : vector<4x1xf32> to vector<4x4xf32>
    %595 = arith.subf %586, %594 : vector<4x4xf32>
    %596 = arith.mulf %593, %595 : vector<4x4xf32>
    %cst_124 = arith.constant dense<0.000000e+00> : vector<4xf32>
    %597 = vector.multi_reduction <add>, %596, %cst_124 [1] : vector<4x4xf32> to vector<4xf32>
    %598 = vector.shape_cast %597 : vector<4xf32> to vector<4x1xf32>
    %cst_125 = arith.constant 4.000000e+00 : f32
    %599 = vector.broadcast %cst_125 : f32 to vector<4x1xf32>
    %600 = arith.divf %598, %599 : vector<4x1xf32>
    %cst_126 = arith.constant 9.99999974E-6 : f32
    %601 = vector.broadcast %cst_126 : f32 to vector<4x1xf32>
    %602 = arith.addf %600, %601 : vector<4x1xf32>
    %603 = math.rsqrt %602 : vector<4x1xf32>
    %604 = vector.broadcast %591 : vector<4x1xf32> to vector<4x4xf32>
    %605 = arith.subf %586, %604 : vector<4x4xf32>
    %606 = vector.broadcast %603 : vector<4x1xf32> to vector<4x4xf32>
    %607 = arith.mulf %605, %606 : vector<4x4xf32>
    %608 = vector.extract_strided_slice %587 {offsets = [0, 0], sizes = [4, 1], strides = [1, 1]} : vector<4x2xf32> to vector<4x1xf32>
    %609 = vector.broadcast %608 : vector<4x1xf32> to vector<4x4xf32>
    %610 = arith.mulf %607, %609 : vector<4x4xf32>
    %611 = vector.extract_strided_slice %587 {offsets = [0, 1], sizes = [4, 1], strides = [1, 1]} : vector<4x2xf32> to vector<4x1xf32>
    %612 = vector.broadcast %611 : vector<4x1xf32> to vector<4x4xf32>
    %613 = arith.addf %610, %612 : vector<4x4xf32>
    %614 = vector.extract_strided_slice %613 {offsets = [0, 0], sizes = [4, 2], strides = [1, 1]} : vector<4x4xf32> to vector<4x2xf32>
    %615 = vector.extract_strided_slice %541 {offsets = [0, 0], sizes = [2, 256], strides = [1, 1]} : vector<2x512xf32> to vector<2x256xf32>
    %cst_127 = arith.constant dense<0.000000e+00> : vector<4x256xf32>
    %616 = tpu.matmul %614, %615, %cst_127 {dimension_numbers = #tpu.dot_dimension_numbers<[1], [0], [0], [1], [0, 0, 1, 1], [], []>} : vector<4x2xf32>, vector<2x256xf32>, vector<4x256xf32> -> vector<4x256xf32>
    %617 = vector.extract_strided_slice %613 {offsets = [0, 2], sizes = [4, 2], strides = [1, 1]} : vector<4x4xf32> to vector<4x2xf32>
    %618 = vector.extract_strided_slice %541 {offsets = [0, 256], sizes = [2, 256], strides = [1, 1]} : vector<2x512xf32> to vector<2x256xf32>
    %cst_128 = arith.constant dense<0.000000e+00> : vector<4x256xf32>
    %619 = tpu.matmul %617, %618, %cst_128 {dimension_numbers = #tpu.dot_dimension_numbers<[1], [0], [0], [1], [0, 0, 1, 1], [], []>} : vector<4x2xf32>, vector<2x256xf32>, vector<4x256xf32> -> vector<4x256xf32>
    %620 = tpu.concatenate %616, %619 in 1 : vector<4x256xf32>, vector<4x256xf32> -> vector<4x512xf32>
    %c0_129 = arith.constant 0 : index
    %c0_130 = arith.constant 0 : index
    %621 = vector.load %arg22[%c0_129, %c0_130] : memref<8x4xf32, #tpu.memory_space<vmem>>, vector<8x4xf32>
    %cst_131 = arith.constant dense<0.000000e+00> : vector<8x512xf32>
    %622 = tpu.matmul %621, %620, %cst_131 {dimension_numbers = #tpu.dot_dimension_numbers<[1], [0], [0], [1], [0, 0, 1, 1], [], []>} : vector<8x4xf32>, vector<4x512xf32>, vector<8x512xf32> -> vector<8x512xf32>
    %c0_132 = arith.constant 0 : index
    %c0_133 = arith.constant 0 : index
    %623 = vector.load %arg23[%c0_132, %c0_133] : memref<8x2xf32, #tpu.memory_space<vmem>>, vector<8x2xf32>
    %cst_134 = arith.constant dense<0.000000e+00> : vector<8xf32>
    %624 = vector.multi_reduction <add>, %622, %cst_134 [1] : vector<8x512xf32> to vector<8xf32>
    %625 = vector.shape_cast %624 : vector<8xf32> to vector<8x1xf32>
    %cst_135 = arith.constant 5.120000e+02 : f32
    %626 = vector.broadcast %cst_135 : f32 to vector<8x1xf32>
    %627 = arith.divf %625, %626 : vector<8x1xf32>
    %628 = vector.broadcast %627 : vector<8x1xf32> to vector<8x512xf32>
    %629 = arith.subf %622, %628 : vector<8x512xf32>
    %630 = vector.broadcast %627 : vector<8x1xf32> to vector<8x512xf32>
    %631 = arith.subf %622, %630 : vector<8x512xf32>
    %632 = arith.mulf %629, %631 : vector<8x512xf32>
    %cst_136 = arith.constant dense<0.000000e+00> : vector<8xf32>
    %633 = vector.multi_reduction <add>, %632, %cst_136 [1] : vector<8x512xf32> to vector<8xf32>
    %634 = vector.shape_cast %633 : vector<8xf32> to vector<8x1xf32>
    %cst_137 = arith.constant 5.120000e+02 : f32
    %635 = vector.broadcast %cst_137 : f32 to vector<8x1xf32>
    %636 = arith.divf %634, %635 : vector<8x1xf32>
    %cst_138 = arith.constant 9.99999974E-6 : f32
    %637 = vector.broadcast %cst_138 : f32 to vector<8x1xf32>
    %638 = arith.addf %636, %637 : vector<8x1xf32>
    %639 = math.rsqrt %638 : vector<8x1xf32>
    %640 = vector.broadcast %627 : vector<8x1xf32> to vector<8x512xf32>
    %641 = arith.subf %622, %640 : vector<8x512xf32>
    %642 = vector.broadcast %639 : vector<8x1xf32> to vector<8x512xf32>
    %643 = arith.mulf %641, %642 : vector<8x512xf32>
    %644 = vector.extract_strided_slice %623 {offsets = [0, 0], sizes = [8, 1], strides = [1, 1]} : vector<8x2xf32> to vector<8x1xf32>
    %645 = vector.broadcast %644 : vector<8x1xf32> to vector<8x512xf32>
    %646 = arith.mulf %643, %645 : vector<8x512xf32>
    %647 = vector.extract_strided_slice %623 {offsets = [0, 1], sizes = [8, 1], strides = [1, 1]} : vector<8x2xf32> to vector<8x1xf32>
    %648 = vector.broadcast %647 : vector<8x1xf32> to vector<8x512xf32>
    %649 = arith.addf %646, %648 : vector<8x512xf32>
    %650 = arith.addf %0, %649 : vector<8x512xf32>
    %cst_139 = arith.constant 0.000000e+00 : f32
    %651 = vector.broadcast %cst_139 : f32 to vector<8x512xf32>
    %652 = arith.maximumf %650, %651 : vector<8x512xf32>
    %653 = tpu.concatenate %483, %652 in 0 : vector<8x512xf32>, vector<8x512xf32> -> vector<16x512xf32>
    %c0_140 = arith.constant 0 : index
    %c0_141 = arith.constant 0 : index
    %654 = vector.load %arg24[%c0_140, %c0_141] : memref<8x16xf32, #tpu.memory_space<vmem>>, vector<8x16xf32>
    %cst_142 = arith.constant dense<0.000000e+00> : vector<8x512xf32>
    %655 = tpu.matmul %654, %653, %cst_142 {dimension_numbers = #tpu.dot_dimension_numbers<[1], [0], [0], [1], [0, 0, 1, 1], [], []>} : vector<8x16xf32>, vector<16x512xf32>, vector<8x512xf32> -> vector<8x512xf32>
    %c0_143 = arith.constant 0 : index
    %c0_144 = arith.constant 0 : index
    %656 = vector.load %arg25[%c0_143, %c0_144] : memref<8x2xf32, #tpu.memory_space<vmem>>, vector<8x2xf32>
    %cst_145 = arith.constant dense<0.000000e+00> : vector<8xf32>
    %657 = vector.multi_reduction <add>, %655, %cst_145 [1] : vector<8x512xf32> to vector<8xf32>
    %658 = vector.shape_cast %657 : vector<8xf32> to vector<8x1xf32>
    %cst_146 = arith.constant 5.120000e+02 : f32
    %659 = vector.broadcast %cst_146 : f32 to vector<8x1xf32>
    %660 = arith.divf %658, %659 : vector<8x1xf32>
    %661 = vector.broadcast %660 : vector<8x1xf32> to vector<8x512xf32>
    %662 = arith.subf %655, %661 : vector<8x512xf32>
    %663 = vector.broadcast %660 : vector<8x1xf32> to vector<8x512xf32>
    %664 = arith.subf %655, %663 : vector<8x512xf32>
    %665 = arith.mulf %662, %664 : vector<8x512xf32>
    %cst_147 = arith.constant dense<0.000000e+00> : vector<8xf32>
    %666 = vector.multi_reduction <add>, %665, %cst_147 [1] : vector<8x512xf32> to vector<8xf32>
    %667 = vector.shape_cast %666 : vector<8xf32> to vector<8x1xf32>
    %cst_148 = arith.constant 5.120000e+02 : f32
    %668 = vector.broadcast %cst_148 : f32 to vector<8x1xf32>
    %669 = arith.divf %667, %668 : vector<8x1xf32>
    %cst_149 = arith.constant 9.99999974E-6 : f32
    %670 = vector.broadcast %cst_149 : f32 to vector<8x1xf32>
    %671 = arith.addf %669, %670 : vector<8x1xf32>
    %672 = math.rsqrt %671 : vector<8x1xf32>
    %673 = vector.broadcast %660 : vector<8x1xf32> to vector<8x512xf32>
    %674 = arith.subf %655, %673 : vector<8x512xf32>
    %675 = vector.broadcast %672 : vector<8x1xf32> to vector<8x512xf32>
    %676 = arith.mulf %674, %675 : vector<8x512xf32>
    %677 = vector.extract_strided_slice %656 {offsets = [0, 0], sizes = [8, 1], strides = [1, 1]} : vector<8x2xf32> to vector<8x1xf32>
    %678 = vector.broadcast %677 : vector<8x1xf32> to vector<8x512xf32>
    %679 = arith.mulf %676, %678 : vector<8x512xf32>
    %680 = vector.extract_strided_slice %656 {offsets = [0, 1], sizes = [8, 1], strides = [1, 1]} : vector<8x2xf32> to vector<8x1xf32>
    %681 = vector.broadcast %680 : vector<8x1xf32> to vector<8x512xf32>
    %682 = arith.addf %679, %681 : vector<8x512xf32>
    %c0_150 = arith.constant 0 : index
    %c0_151 = arith.constant 0 : index
    %683 = vector.load %arg26[%c0_150, %c0_151] : memref<8x512xf32, #tpu.memory_space<vmem>>, vector<8x512xf32>
    tpu.vector_store %arg26[%c0_150, %c0_151], %682 {strides = array<i32>} : memref<8x512xf32, #tpu.memory_space<vmem>>, vector<8x512xf32>,
    return
  }
}

</mosaic_0001>

<bundles_post_ra>
// kernel: dual_gcn.1
= control target key start
LH: loop header
LB: loop body
LE: loop exit
PB: predicated region body
PF: predicated region fallthrough
CT: control target
= control target key end

     0   :  { %s5484_s0 = inlined_call_operand.vmem [shape: f32[8,512], index: 0, kind: input, shape index: {}]   ;;  %s5485_s1 = inlined_call_operand.hbm [shape: f32[256,576], index: 1, kind: input, shape index: {}]   ;;  %s5486_s2 = inlined_call_operand.vmem [shape: f32[64,144], index: 2, kind: input, shape index: {}]   ;;  %s5487_s3 = inlined_call_operand.vmem [shape: f32[16,36], index: 3, kind: input, shape index: {}]   ;;  %s5488_s4 = inlined_call_operand.vmem [shape: f32[4,256], index: 4, kind: input, shape index: {}]   ;;  %s5489_s5 = inlined_call_operand.vmem [shape: f32[3,8,9], index: 5, kind: input, shape index: {}]   ;;  %s5490_s6 = inlined_call_operand.vmem [shape: f32[3,8,2], index: 6, kind: input, shape index: {}]   ;;  %s5491_s7 = inlined_call_operand.vmem [shape: f32[12,8], index: 7, kind: input, shape index: {}]   ;;  %s5492_s8 = inlined_call_operand.vmem [shape: f32[12,1], index: 8, kind: input, shape index: {}]   ;;  %s5493_s9 = inlined_call_operand.vmem [shape: f32[4,4], index: 9, kind: input, shape index: {}]   ;;  %s5494_s10 = inlined_call_operand.vmem [shape: f32[4,2], index: 10, kind: input, shape index: {}]   ;;  %s5495_s11 = inlined_call_operand.vmem [shape: f32[8,4], index: 11, kind: input, shape index: {}]   ;;  %s5496_s12 = inlined_call_operand.vmem [shape: f32[8,1], index: 12, kind: input, shape index: {}]   ;;  %s5497_s13 = inlined_call_operand.vmem [shape: f32[8,2], index: 13, kind: input, shape index: {}]   ;;  %s5498_s14 = inlined_call_operand.vmem [shape: f32[4,8], index: 14, kind: input, shape index: {}]   ;;  %s5499_s15 = inlined_call_operand.vmem [shape: f32[4,2], index: 15, kind: input, shape index: {}]   ;;  %s5500_s16 = inlined_call_operand.vmem [shape: f32[2,8], index: 16, kind: input, shape index: {}]   ;;  %s5501_s17 = inlined_call_operand.vmem [shape: f32[2,2], index: 17, kind: input, shape index: {}]   ;;  %s5502_s18 = inlined_call_operand.vmem [shape: f32[2,2], index: 18, kind: input, shape index: {}]   ;;  %s5503_s19 = inlined_call_operand.vmem [shape: f32[2,2], index: 19, kind: input, shape index: {}]   ;;  %s5504_s20 = inlined_call_operand.vmem [shape: f32[4,4], index: 20, kind: input, shape index: {}]   ;;  %s5505_s21 = inlined_call_operand.vmem [shape: f32[4,2], index: 21, kind: input, shape index: {}]   ;;  %s5506_s22 = inlined_call_operand.vmem [shape: f32[8,4], index: 22, kind: input, shape index: {}]   ;;  %s5507_s23 = inlined_call_operand.vmem [shape: f32[8,2], index: 23, kind: input, shape index: {}]   ;;  %s5508_s24 = inlined_call_operand.vmem [shape: f32[8,16], index: 24, kind: input, shape index: {}]   ;;  %s5509_s25 = inlined_call_operand.vmem [shape: f32[8,2], index: 25, kind: input, shape index: {}]   ;;  %s5510_s26 = inlined_call_operand.vmem [shape: f32[8,512], index: 26, kind: output, shape index: {}]  }
   0x1   :  { %5552 = sst [smem:[#allocation22_spill]] %s5484_s0 }
   0x2   :  { %5553 = sst [smem:[#allocation23_spill]] %s5485_s1 }
   0x3   :  { %5554 = sst [smem:[#allocation24_spill]] %s5486_s2 }
   0x4   :  { %5555 = sst [smem:[#allocation25_spill]] %s5487_s3 }
   0x5   :  { %5556 = sst [smem:[#allocation26_spill]] %s5488_s4 }
   0x6   :  { %5557 = sst [smem:[#allocation27_spill]] %s5489_s5 }
   0x7   :  { %5558 = sst [smem:[#allocation28_spill]] %s5490_s6 }
   0x8   :  { %5559 = sst [smem:[#allocation29_spill]] %s5491_s7 }
   0x9   :  { %5560 = sst [smem:[#allocation30_spill]] %s5492_s8 }
   0xa   :  { %5561 = sst [smem:[#allocation31_spill]] %s5493_s9 }
   0xb   :  { %5562 = sst [smem:[#allocation32_spill]] %s5494_s10 }
   0xc   :  { %5563 = sst [smem:[#allocation33_spill]] %s5506_s22 }
   0xd   :  { %31 = vsyncpa [#allocation3], 0  ;;  %s4487_s27 = smov [#allocation2]   ;;  %s5564_s8 = sld [smem:[#allocation23_spill]] }
   0xe   :  { %s39_s3 = sshll.u32 %s4487_s27, 4  ;;  %s40_s3 = int_to_ptr.vmem [resolvable:$true] %s39_s3 }
  0x13   :  { %s4463_s4 = scalar_lea.hbm %s5564_s8, 20480 }
  0x14   :  { %p4464_p0 = scmp.ne.s32.totalorder %s5564_s8, %s4463_s4  ;;  %p4467_p1 = scmp.lt.u32.totalorder %s4463_s4, %s5564_s8 }
  0x16   :  { %p4469_p2 = pnand %p4467_p1, %p4464_p0 }
  0x18   :  { %4472 = shalt.err (!%p4469_p2)
}
  0x19   :  { %s4473_s30 = scalar_lea.vmem %s40_s3, 20480  ;;  %p4478_p4 = scmp.lt.s32.totalorder %s40_s3, %s40_s3 }
  0x1a   :  { %p4474_p3 = scmp.ne.s32.totalorder %s40_s3, %s4473_s30  ;;  %p4479_p5 = scmp.lt.s32.totalorder %s4473_s30, %s4473_s30 }
  0x1c   :  { %p4480_p6 = por %p4479_p5, %p4478_p4 }
  0x1e   :  { %p4481_p7 = pnand %p4480_p6, %p4474_p3 }
  0x20   :  { %4484 = shalt.err (!%p4481_p7)
}
  0x21   :  { %s4488_s2 = smov 640   ;;  %s4489_s5 = smov 40  }
  0x22   :  { %45 = dma.hbm_to_vmem [thread:$0]  %s5564_s8, 20480, %s40_s3, [#allocation3], %s4488_s2, %s4488_s2, %s4489_s5  }
  0x23   :  { %4485 = dma.done.wait [#allocation3], 20480  }
  0x24   :  { %4486 = vsyncadd [#allocation3], 4294946816  ;;  %v103_v0 = vld [vmem:[#allocation2 + $0x8] sm:$0xff]  ;;  %v108_v1 = vld [vmem:[#allocation2 + $0x30] sm:$0xff]  ;;  %v5519_v60 = vmov 5   ;;  %v5521_v63 = vmov 1  }
  0x25   :  { %v105_v2 = vld [vmem:[#allocation2 + $0x18] sm:$0xff]  ;;  %v4665_v3 = vpack.c.bf16 %v108_v1, %v103_v0  ;;  %v110_v4 = vld [vmem:[#allocation2 + $0x40] sm:$0xff]  ;;  %v107_v6 = vld [vmem:[#allocation2 + $0x28] sm:$0xff]  ;;  %4393 = vset.pattern.permute.xlu1 %v5519_v60  ;;  %4391 = vset.pattern.permute.xlu0 %v5521_v63  ;;  %s5575_s27 = sld [smem:[#allocation22_spill]]  ;;  %s5580_s28 = sld [smem:[#allocation27_spill]]  ;;  %vm793_vm0 = vcmask 523264  }
  0x26   :  { %v102_v5 = vld [vmem:[#allocation2] sm:$0xff]  ;;  %v4667_v7 = vpack.c.bf16 %v110_v4, %v105_v2  ;;  %v104_v9 = vld [vmem:[#allocation2 + $0x10] sm:$0xff]  ;;  %v109_v10 = vld [vmem:[#allocation2 + $0x38] sm:$0xff]  ;;  %s4499_s2 = smov 64   ;;  %s5603_s6 = sld [smem:[#allocation28_spill]]  ;;  %vm1117_vm1 = vcmask 130048  }
  0x27   :  { %v4669_v8 = vpack.c.bf16 %v107_v6, %v102_v5  ;;  %v113_v11 = vld [vmem:[#allocation2 + $0x58] sm:$0xff]  ;;  %3995 = vmatprep.subr.bf16.mxu0 %v4665_v3  ;;  %v4672_v12 = vpack.c.bf16 %v109_v10, %v104_v9  ;;  %v118_v13 = vld [vmem:[#allocation2 + $0x80] sm:$0xff]  ;;  %v115_v14 = vld [vmem:[#allocation2 + $0x68] sm:$0xff]  ;;  %s5604_s3 = sld [smem:[#allocation24_spill]]  ;;  %s4502_s1 = smov 96   ;;  %vm1121_vm2 = vcmask 261120  }
  0x28   :  { %v120_v15 = vld [vmem:[#allocation2 + $0x90] sm:$0xff]  ;;  %4059 = vmatprep.subr.bf16.mxu1 %v4667_v7  ;;  %v4676_v16 = vpack.c.bf16 %v118_v13, %v113_v11  ;;  %v117_v19 = vld [vmem:[#allocation2 + $0x78] sm:$0xff]  ;;  %v114_v20 = vld [vmem:[#allocation2 + $0x60] sm:$0xff]  ;;  %s4503_s7 = smov 80   ;;  %s4504_s8 = smov 32   ;;  %vm4508_vm3 = vmmov 0  }
  0x29   :  { %3997 = vmatpush1.bf16.msra.mxu0 %v4669_v8  ;;  %v4678_v17 = vpack.c.bf16 %v120_v15, %v115_v14  ;;  %v112_v18 = vld [vmem:[#allocation2 + $0x50] sm:$0xff]  ;;  %4061 = vmatpush1.bf16.msra.mxu1 %v4672_v12  ;;  %v119_v22 = vld [vmem:[#allocation2 + $0x88] sm:$0xff]  ;;  %v125_v27 = vld [vmem:[#allocation2 + $0xb8] sm:$0xff]  ;;  %s4505_s4 = smov 48   ;;  %s4506_s29 = smov 16   ;;  %vm1437_vm4 = vcmask 31744  }
  0x2a   :  { %v4681_v21 = vpack.c.bf16 %v117_v19, %v112_v18  ;;  %v123_v23 = vld [vmem:[#allocation2 + $0xa8] sm:$0xff]  ;;  %v128_v24 = vld [vmem:[#allocation2 + $0xd0] sm:$0xff]  ;;  %3999 = vmatprep.subr.bf16.mxu0 %v4676_v16  ;;  %v4685_v25 = vpack.c.bf16 %v119_v22, %v114_v20  ;;  %v130_v28 = vld [vmem:[#allocation2 + $0xe0] sm:$0xff]  ;;  %s5611_s5 = sld [smem:[#allocation25_spill]]  ;;  %s4513_s0 = smov 108   ;;  %vm1441_vm5 = vcmask 64512  }
  0x2b   :  { %4063 = vmatprep.subr.bf16.mxu1 %v4678_v17  ;;  %v4687_v26 = vpack.c.bf16 %v128_v24, %v123_v23  ;;  %v122_v29 = vld [vmem:[#allocation2 + $0xa0] sm:$0xff]  ;;  %v4689_v30 = vpack.c.bf16 %v130_v28, %v125_v27  ;;  %v127_v31 = vld [vmem:[#allocation2 + $0xc8] sm:$0xff]  ;;  %v124_v32 = vld [vmem:[#allocation2 + $0xb0] sm:$0xff]  ;;  %s4514_s9 = smov 100   ;;  %s5612_s22 = sld [smem:[#allocation29_spill]]  ;;  %vm1662_vm6 = vcmask 1043456  }
  0x2c   :  { %v129_v33 = vld [vmem:[#allocation2 + $0xd8] sm:$0xff]  ;;  %v4692_v34 = vpack.c.bf16 %v127_v31, %v122_v29  ;;  %v138_v36 = vld [vmem:[#allocation2 + $0x120] sm:$0xff]  ;;  %v135_v37 = vld [vmem:[#allocation2 + $0x108] sm:$0xff]  ;;  %vm1639_vm7 = vcmask 27648   ;;  %s5614_s30 = sld [smem:[#allocation31_spill]]  ;;  %vm1992_vm8 = vcmask 60416  }
  0x2d   :  { %4001 = vmatpush1.bf16.msra.mxu0 %v4681_v21  ;;  %v133_v35 = vld [vmem:[#allocation2 + $0xf8] sm:$0xff]  ;;  %4065 = vmatpush1.bf16.msra.mxu1 %v4685_v25  ;;  %v4696_v38 = vpack.c.bf16 %v129_v33, %v124_v32  ;;  %v140_v40 = vld [vmem:[#allocation2 + $0x130] sm:$0xff]  ;;  %v134_v44 = vld [vmem:[#allocation2 + $0x100] sm:$0xff]  ;;  %s5615_s10 = sld [smem:[#allocation32_spill]]  ;;  %vm2637_vm9 = vcmask 1041408   ;;  %vm2760_vm10 = vcmask 15360  }
  0x2e   :  { %4003 = vmatprep.subr.bf16.mxu0 %v4687_v26  ;;  %v4698_v39 = vpack.c.bf16 %v138_v36, %v133_v35  ;;  %v132_v41 = vld [vmem:[#allocation2 + $0xf0] sm:$0xff]  ;;  %v137_v42 = vld [vmem:[#allocation2 + $0x118] sm:$0xff]  ;;  %4067 = vmatprep.subr.bf16.mxu1 %v4689_v30  ;;  %v4701_v43 = vpack.c.bf16 %v140_v40, %v135_v37  ;;  %v139_v45 = vld [vmem:[#allocation2 + $0x128] sm:$0xff] }
  0x2f   :  { %v143_v46 = vld [vmem:[#allocation2 + $0x148] sm:$0xff]  ;;  %v148_v47 = vld [vmem:[#allocation2 + $0x170] sm:$0xff]  ;;  %v145_v48 = vld [vmem:[#allocation2 + $0x158] sm:$0xff]  ;;  %v4704_v50 = vpack.c.bf16 %v137_v42, %v132_v41  ;;  %v4708_v51 = vpack.c.bf16 %v139_v45, %v134_v44 }
  0x30   :  { %v150_v49 = vld [vmem:[#allocation2 + $0x180] sm:$0xff]  ;;  %v4710_v52 = vpack.c.bf16 %v148_v47, %v143_v46  ;;  %v147_v54 = vld [vmem:[#allocation2 + $0x168] sm:$0xff]  ;;  %v144_v55 = vld [vmem:[#allocation2 + $0x150] sm:$0xff] }
  0x31   :  { %4005 = vmatpush1.bf16.msra.mxu0 %v4692_v34  ;;  %4069 = vmatpush1.bf16.msra.mxu1 %v4696_v38  ;;  %v142_v53 = vld [vmem:[#allocation2 + $0x140] sm:$0xff]  ;;  %v4713_v56 = vpack.c.bf16 %v150_v49, %v145_v48  ;;  %v149_v57 = vld [vmem:[#allocation2 + $0x178] sm:$0xff]  ;;  %v155_v61 = vld [vmem:[#allocation2 + $0x1a8] sm:$0xff] }
  0x32   :  { %4007 = vmatprep.subr.bf16.mxu0 %v4698_v39  ;;  %4071 = vmatprep.subr.bf16.mxu1 %v4701_v43  ;;  %v153_v58 = vld [vmem:[#allocation2 + $0x198] sm:$0xff]  ;;  %v158_v59 = vld [vmem:[#allocation2 + $0x1c0] sm:$0xff]  ;;  %v160_v62 = vld [vmem:[#allocation2 + $0x1d0] sm:$0xff]  ;;  %v4718_v0 = vpack.c.bf16 %v147_v54, %v142_v53  ;;  %v4722_v1 = vpack.c.bf16 %v149_v57, %v144_v55 }
  0x33   :  { %v4724_v2 = vpack.c.bf16 %v158_v59, %v153_v58  ;;  %v152_v4 = vld [vmem:[#allocation2 + $0x190] sm:$0xff]  ;;  %v157_v5 = vld [vmem:[#allocation2 + $0x1b8] sm:$0xff]  ;;  %v154_v6 = vld [vmem:[#allocation2 + $0x1a0] sm:$0xff]  ;;  %v4727_v9 = vpack.c.bf16 %v160_v62, %v155_v61 }
  0x34   :  { %v159_v10 = vld [vmem:[#allocation2 + $0x1c8] sm:$0xff]  ;;  %v168_v13 = vld [vmem:[#allocation2 + $0x210] sm:$0xff]  ;;  %v165_v14 = vld [vmem:[#allocation2 + $0x1f8] sm:$0xff]  ;;  %v4730_v18 = vpack.c.bf16 %v157_v5, %v152_v4 }
  0x35   :  { %4009 = vmatpush1.bf16.msra.mxu0 %v4704_v50  ;;  %4073 = vmatpush1.bf16.msra.mxu1 %v4708_v51  ;;  %v163_v11 = vld [vmem:[#allocation2 + $0x1e8] sm:$0xff]  ;;  %v170_v15 = vld [vmem:[#allocation2 + $0x220] sm:$0xff]  ;;  %v4734_v19 = vpack.c.bf16 %v159_v10, %v154_v6  ;;  %v164_v24 = vld [vmem:[#allocation2 + $0x1f0] sm:$0xff] }
  0x36   :  { %4011 = vmatprep.subr.bf16.mxu0 %v4710_v52  ;;  %4075 = vmatprep.subr.bf16.mxu1 %v4713_v56  ;;  %v4736_v20 = vpack.c.bf16 %v168_v13, %v163_v11  ;;  %v162_v22 = vld [vmem:[#allocation2 + $0x1e0] sm:$0xff]  ;;  %v167_v23 = vld [vmem:[#allocation2 + $0x208] sm:$0xff]  ;;  %v4739_v27 = vpack.c.bf16 %v170_v15, %v165_v14  ;;  %v169_v28 = vld [vmem:[#allocation2 + $0x218] sm:$0xff] }
  0x37   :  { %v173_v29 = vld [vmem:[#allocation2 + $0x238] sm:$0xff]  ;;  %v178_v31 = vld [vmem:[#allocation2 + $0x260] sm:$0xff]  ;;  %v175_v32 = vld [vmem:[#allocation2 + $0x248] sm:$0xff]  ;;  %v4742_v35 = vpack.c.bf16 %v167_v23, %v162_v22  ;;  %v4746_v36 = vpack.c.bf16 %v169_v28, %v164_v24 }
  0x38   :  { %v180_v33 = vld [vmem:[#allocation2 + $0x270] sm:$0xff]  ;;  %v4748_v37 = vpack.c.bf16 %v178_v31, %v173_v29  ;;  %v177_v41 = vld [vmem:[#allocation2 + $0x258] sm:$0xff]  ;;  %v174_v42 = vld [vmem:[#allocation2 + $0x240] sm:$0xff] }
  0x39   :  { %4013 = vmatpush1.bf16.msra.mxu0 %v4718_v0  ;;  %4077 = vmatpush1.bf16.msra.mxu1 %v4722_v1  ;;  %5565 = vst [vmem:[#allocation5_spill] sm:$0xff] %v4746_v36  ;;  %v172_v40 = vld [vmem:[#allocation2 + $0x230] sm:$0xff]  ;;  %v4751_v44 = vpack.c.bf16 %v180_v33, %v175_v32  ;;  %v179_v45 = vld [vmem:[#allocation2 + $0x268] sm:$0xff]  ;;  %v185_v48 = vld [vmem:[#allocation2 + $0x298] sm:$0xff] }
  0x3a   :  { %4015 = vmatprep.subr.bf16.mxu0 %v4724_v2  ;;  %4079 = vmatprep.subr.bf16.mxu1 %v4727_v9  ;;  %v183_v46 = vld [vmem:[#allocation2 + $0x288] sm:$0xff]  ;;  %v188_v47 = vld [vmem:[#allocation2 + $0x2b0] sm:$0xff]  ;;  %v190_v49 = vld [vmem:[#allocation2 + $0x2c0] sm:$0xff]  ;;  %v4754_v53 = vpack.c.bf16 %v177_v41, %v172_v40  ;;  %v4758_v54 = vpack.c.bf16 %v179_v45, %v174_v42 }
  0x3b   :  { %5566 = vst [vmem:[#allocation6_spill] sm:$0xff] %v4751_v44  ;;  %v4760_v55 = vpack.c.bf16 %v188_v47, %v183_v46  ;;  %v182_v57 = vld [vmem:[#allocation2 + $0x280] sm:$0xff]  ;;  %v187_v58 = vld [vmem:[#allocation2 + $0x2a8] sm:$0xff]  ;;  %v184_v59 = vld [vmem:[#allocation2 + $0x290] sm:$0xff]  ;;  %v4763_v61 = vpack.c.bf16 %v190_v49, %v185_v48 }
  0x3c   :  { %5567 = vst [vmem:[#allocation7_spill] sm:$0xff] %v4758_v54  ;;  %v189_v62 = vld [vmem:[#allocation2 + $0x2b8] sm:$0xff]  ;;  %v198_v5 = vld [vmem:[#allocation2 + $0x300] sm:$0xff]  ;;  %v195_v6 = vld [vmem:[#allocation2 + $0x2e8] sm:$0xff]  ;;  %v4766_v11 = vpack.c.bf16 %v187_v58, %v182_v57 }
  0x3d   :  { %4017 = vmatpush1.bf16.msra.mxu0 %v4730_v18  ;;  %4081 = vmatpush1.bf16.msra.mxu1 %v4734_v19  ;;  %5568 = vst [vmem:[#allocation8_spill] sm:$0xff] %v4763_v61  ;;  %v193_v4 = vld [vmem:[#allocation2 + $0x2d8] sm:$0xff]  ;;  %v200_v10 = vld [vmem:[#allocation2 + $0x310] sm:$0xff]  ;;  %v4770_v13 = vpack.c.bf16 %v189_v62, %v184_v59  ;;  %v194_v23 = vld [vmem:[#allocation2 + $0x2e0] sm:$0xff] }
  0x3e   :  { %4019 = vmatprep.subr.bf16.mxu0 %v4736_v20  ;;  %4083 = vmatprep.subr.bf16.mxu1 %v4739_v27  ;;  %v4772_v14 = vpack.c.bf16 %v198_v5, %v193_v4  ;;  %v192_v15 = vld [vmem:[#allocation2 + $0x2d0] sm:$0xff]  ;;  %v197_v22 = vld [vmem:[#allocation2 + $0x2f8] sm:$0xff]  ;;  %v4775_v24 = vpack.c.bf16 %v200_v10, %v195_v6  ;;  %v199_v28 = vld [vmem:[#allocation2 + $0x308] sm:$0xff] }
  0x3f   :  { %5569 = vst [vmem:[#allocation9_spill] sm:$0xff] %v4770_v13  ;;  %v203_v29 = vld [vmem:[#allocation2 + $0x328] sm:$0xff]  ;;  %v208_v31 = vld [vmem:[#allocation2 + $0x350] sm:$0xff]  ;;  %v205_v32 = vld [vmem:[#allocation2 + $0x338] sm:$0xff]  ;;  %v4778_v40 = vpack.c.bf16 %v197_v22, %v192_v15  ;;  %v4782_v41 = vpack.c.bf16 %v199_v28, %v194_v23 }
  0x40   :  { %5570 = vst [vmem:[#allocation10_spill] sm:$0xff] %v4775_v24  ;;  %v210_v33 = vld [vmem:[#allocation2 + $0x360] sm:$0xff]  ;;  %v4784_v42 = vpack.c.bf16 %v208_v31, %v203_v29  ;;  %v207_v46 = vld [vmem:[#allocation2 + $0x348] sm:$0xff]  ;;  %v204_v47 = vld [vmem:[#allocation2 + $0x330] sm:$0xff] }
  0x41   :  { %4021 = vmatpush1.bf16.msra.mxu0 %v4742_v35  ;;  %4085 = vmatpush1.bf16.msra.mxu1 %v4746_v36  ;;  %5571 = vst [vmem:[#allocation11_spill] sm:$0xff] %v4782_v41  ;;  %v202_v45 = vld [vmem:[#allocation2 + $0x320] sm:$0xff]  ;;  %v4787_v48 = vpack.c.bf16 %v210_v33, %v205_v32  ;;  %v209_v49 = vld [vmem:[#allocation2 + $0x358] sm:$0xff]  ;;  %v215_v59 = vld [vmem:[#allocation2 + $0x388] sm:$0xff] }
  0x42   :  { %4023 = vmatprep.subr.bf16.mxu0 %v4748_v37  ;;  %4087 = vmatprep.subr.bf16.mxu1 %v4751_v44  ;;  %v213_v57 = vld [vmem:[#allocation2 + $0x378] sm:$0xff]  ;;  %v218_v58 = vld [vmem:[#allocation2 + $0x3a0] sm:$0xff]  ;;  %v220_v62 = vld [vmem:[#allocation2 + $0x3b0] sm:$0xff]  ;;  %v4790_v4 = vpack.c.bf16 %v207_v46, %v202_v45  ;;  %v4794_v6 = vpack.c.bf16 %v209_v49, %v204_v47 }
  0x43   :  { %5572 = vst [vmem:[#allocation12_spill] sm:$0xff] %v4787_v48  ;;  %v212_v5 = vld [vmem:[#allocation2 + $0x370] sm:$0xff]  ;;  %v4796_v10 = vpack.c.bf16 %v218_v58, %v213_v57  ;;  %v217_v15 = vld [vmem:[#allocation2 + $0x398] sm:$0xff]  ;;  %v214_v22 = vld [vmem:[#allocation2 + $0x380] sm:$0xff]  ;;  %v4799_v28 = vpack.c.bf16 %v220_v62, %v215_v59 }
  0x44   :  { %5573 = vst [vmem:[#allocation13_spill] sm:$0xff] %v4794_v6  ;;  %v219_v23 = vld [vmem:[#allocation2 + $0x3a8] sm:$0xff]  ;;  %v228_v31 = vld [vmem:[#allocation2 + $0x3f0] sm:$0xff]  ;;  %v225_v33 = vld [vmem:[#allocation2 + $0x3d8] sm:$0xff]  ;;  %v4809_v46 = vpack.c.bf16 %v217_v15, %v212_v5 }
  0x45   :  { %4025 = vmatpush1.bf16.msra.mxu0 %v4754_v53  ;;  %4089 = vmatpush1.bf16.msra.mxu1 %v4758_v54  ;;  %5574 = vst [vmem:[#allocation14_spill] sm:$0xff] %v4799_v28  ;;  %v223_v29 = vld [vmem:[#allocation2 + $0x3c8] sm:$0xff]  ;;  %v230_v45 = vld [vmem:[#allocation2 + $0x400] sm:$0xff]  ;;  %v4813_v47 = vpack.c.bf16 %v219_v23, %v214_v22  ;;  %v224_v59 = vld [vmem:[#allocation2 + $0x3d0] sm:$0xff] }
  0x46   :  { %4027 = vmatprep.subr.bf16.mxu0 %v4760_v55  ;;  %4091 = vmatprep.subr.bf16.mxu1 %v4763_v61  ;;  %v4804_v32 = vld [vmem:[%s5575_s27 + $0x8] sm:$0xff]  ;;  %v4815_v49 = vpack.c.bf16 %v228_v31, %v223_v29  ;;  %v222_v57 = vld [vmem:[#allocation2 + $0x3c0] sm:$0xff]  ;;  %v4818_v62 = vpack.c.bf16 %v230_v45, %v225_v33  ;;  %v229_v60 = vld [vmem:[#allocation2 + $0x3f8] sm:$0xff] }
  0x47   :  { %326 = vmatprep.mubr.f32.mxu0 %v4804_v32  ;;  %397 = vmatprep.mubr.f32.mxu1 %v4804_v32  ;;  %5576 = vst [vmem:[#allocation15_spill] sm:$0xff] %v4813_v47  ;;  %v227_v58 = vld [vmem:[#allocation2 + $0x3e8] sm:$0xff]  ;;  %v233_v63 = vld [vmem:[#allocation2 + $0x418] sm:$0xff]  ;;  %v240_v15 = vld [vmem:[#allocation2 + $0x450] sm:$0xff]  ;;  %v4825_v22 = vpack.c.bf16 %v229_v60, %v224_v59 }
  0x48   :  { %5577 = vst [vmem:[#allocation16_spill] sm:$0xff] %v4818_v62  ;;  %v235_v5 = vld [vmem:[#allocation2 + $0x428] sm:$0xff]  ;;  %v232_v29 = vld [vmem:[#allocation2 + $0x410] sm:$0xff]  ;;  %v237_v31 = vld [vmem:[#allocation2 + $0x438] sm:$0xff] }
  0x49   :  { %4029 = vmatpush1.bf16.msra.mxu0 %v4766_v11  ;;  %4093 = vmatpush1.bf16.msra.mxu1 %v4770_v13  ;;  %5578 = vst [vmem:[#allocation17_spill] sm:$0xff] %v4825_v22  ;;  %v234_v33 = vld [vmem:[#allocation2 + $0x420] sm:$0xff]  ;;  %v4830_v45 = vpack.c.bf16 %v240_v15, %v235_v5  ;;  %v247_v59 = vld [vmem:[#allocation2 + $0x488] sm:$0xff]  ;;  %v244_v5 = vld [vmem:[#allocation2 + $0x470] sm:$0xff] }
  0x4a   :  { %4031 = vmatprep.subr.bf16.mxu0 %v4772_v14  ;;  %4095 = vmatprep.subr.bf16.mxu1 %v4775_v24  ;;  %v248_v24 = vld [vmem:[#allocation2 + $0x490] sm:$0xff]  ;;  %v242_v60 = vld [vmem:[#allocation2 + $0x460] sm:$0xff]  ;;  %v249_v15 = vld [vmem:[#allocation2 + $0x498] sm:$0xff] }
  0x4b   :  { %5579 = vst [vmem:[#allocation18_spill] sm:$0xff] %v4830_v45  ;;  %v253_v13 = vld [vmem:[#allocation2 + $0x4b8] sm:$0xff]  ;;  %v258_v61 = vld [vmem:[#allocation2 + $0x4e0] sm:$0xff]  ;;  %v259_v54 = vld [vmem:[#allocation2 + $0x4e8] sm:$0xff] }
  0x4c   :  { %v186_v44 = vld [vmem:[#allocation2 + $0x2a0] sm:$0xff]  ;;  %v191_v36 = vld [vmem:[#allocation2 + $0x2c8] sm:$0xff] }
  0x4d   :  { %4033 = vmatpush1.bf16.msra.mxu0 %v4778_v40  ;;  %4097 = vmatpush1.bf16.msra.mxu1 %v4782_v41  ;;  %v243_v41 = vld [vmem:[#allocation2 + $0x468] sm:$0xff] }
  0x4e   :  { %4035 = vmatprep.subr.bf16.mxu0 %v4784_v42  ;;  %4099 = vmatprep.subr.bf16.mxu1 %v4787_v48  ;;  %v238_v48 = vld [vmem:[#allocation2 + $0x440] sm:$0xff] }
  0x4f   :  { %v4827_v23 = vpack.c.bf16 %v238_v48, %v233_v63  ;;  %v4839_v48 = vpack.c.bf16 %v248_v24, %v243_v41  ;;  %v4852_v24 = vpack.c.bf16 %v247_v59, %v242_v60  ;;  %v4856_v41 = vpack.c.bf16 %v249_v15, %v244_v5  ;;  %v106_v5 = vld [vmem:[#allocation2 + $0x20] sm:$0xff]  ;;  %v111_v15 = vld [vmem:[#allocation2 + $0x48] sm:$0xff] }
  0x50   :  { %v5539_v60 = vmov 7   ;;  %v5537_v59 = vmov 3  }
  0x51   :  { %4037 = vmatpush1.bf16.msra.mxu0 %v4790_v4  ;;  %4101 = vmatpush1.bf16.msra.mxu1 %v4794_v6  ;;  %v4821_v6 = vpack.c.bf16 %v227_v58, %v222_v57  ;;  %v245_v57 = vld [vmem:[#allocation2 + $0x478] sm:$0xff]  ;;  %v250_v58 = vld [vmem:[#allocation2 + $0x4a0] sm:$0xff]  ;;  %5581 = vst [vmem:[#allocation19_spill] sm:$0xff] %v4856_v41 }
  0x52   :  { %4039 = vmatprep.subr.bf16.mxu0 %v4796_v10  ;;  %4103 = vmatprep.subr.bf16.mxu1 %v4799_v28  ;;  %v239_v28 = vld [vmem:[#allocation2 + $0x448] sm:$0xff] }
  0x53   :  { %v4837_v63 = vpack.c.bf16 %v239_v28, %v234_v33  ;;  %v4858_v28 = vpack.c.bf16 %v258_v61, %v253_v13  ;;  %v252_v33 = vld [vmem:[#allocation2 + $0x4b0] sm:$0xff] }
  0x55   :  { %4041 = vmatpush1.bf16.msra.mxu0 %v4809_v46  ;;  %4105 = vmatpush1.bf16.msra.mxu1 %v4813_v47  ;;  %v4833_v47 = vpack.c.bf16 %v237_v31, %v232_v29  ;;  %v4847_v29 = vld [vmem:[%s5580_s28] sm:$0xff]  ;;  %v255_v31 = vld [vmem:[#allocation2 + $0x4c8] sm:$0xff] }
  0x56   :  { %4043 = vmatprep.subr.bf16.mxu0 %v4815_v49  ;;  %4107 = vmatprep.subr.bf16.mxu1 %v4818_v62  ;;  %v4842_v62 = vpack.c.bf16 %v250_v58, %v245_v57  ;;  %v257_v57 = vld [vmem:[#allocation2 + $0x4d8] sm:$0xff]  ;;  %v254_v58 = vld [vmem:[#allocation2 + $0x4c0] sm:$0xff] }
  0x57   :  { %513 = vperm.xlu1 %4393, %v4847_v29   ;;  %481 = vperm.xlu0 %4391, %v4847_v29   ;;  %v4866_v61 = vpack.c.bf16 %v257_v57, %v252_v33  ;;  %v4871_v13 = vpack.c.bf16 %v259_v54, %v254_v58  ;;  %v4881_v33 = vld [vmem:[%s5575_s27] sm:$0xff]  ;;  %v4883_v57 = vpack.c.bf16 %v111_v15, %v106_v5  ;;  %v5545_v54 = vmov 0   ;;  %v121_v58 = vld [vmem:[#allocation2 + $0x98] sm:$0xff] }
  0x58   :  { %v126_v15 = vld [vmem:[#allocation2 + $0xc0] sm:$0xff] }
  0x59   :  { %4045 = vmatpush1.bf16.msra.mxu0 %v4821_v6  ;;  %4109 = vmatpush1.bf16.msra.mxu1 %v4825_v22  ;;  %v260_v22 = vld [vmem:[#allocation2 + $0x4f0] sm:$0xff]  ;;  %5583 = vst [vmem:[#allocation21_spill] sm:$0xff] %v4871_v13 }
  0x5a   :  { %4047 = vmatprep.subr.bf16.mxu0 %v4827_v23  ;;  %4111 = vmatprep.subr.bf16.mxu1 %v4830_v45  ;;  %v4861_v45 = vpack.c.bf16 %v260_v22, %v255_v31  ;;  %v4873_v22 = vpack.c.bf16 %v191_v36, %v186_v44  ;;  %v196_v31 = vld [vmem:[#allocation2 + $0x2f0] sm:$0xff] }
  0x5b   :  { %4394 = vset.pattern.permute.xlu1 %v5539_v60  ;;  %4392 = vset.pattern.permute.xlu0 %v5537_v59  ;;  %v201_v59 = vld [vmem:[#allocation2 + $0x318] sm:$0xff]  ;;  %v116_v44 = vld [vmem:[#allocation2 + $0x70] sm:$0xff]  ;;  %v206_v60 = vld [vmem:[#allocation2 + $0x340] sm:$0xff] }
  0x5c   :  { %5582 = vst [vmem:[#allocation20_spill] sm:$0xff] %v4861_v45  ;;  %529 = vperm.xlu1 %4394, %v4847_v29   ;;  %497 = vperm.xlu0 %4392, %v4847_v29   ;;  %v4888_v36 = vpack.c.bf16 %v201_v59, %v196_v31  ;;  %v4896_v5 = vpack.c.bf16 %v121_v58, %v116_v44  ;;  %v4901_v59 = vld [vmem:[%s5575_s27 + $0x18] sm:$0xff]  ;;  %v131_v31 = vld [vmem:[#allocation2 + $0xe8] sm:$0xff] }
  0x5d   :  { %4049 = vmatpush1.bf16.msra.mxu0 %v4833_v47  ;;  %4113 = vmatpush1.bf16.msra.mxu1 %v4837_v63  ;;  %v4912_v44 = vpack.c.bf16 %v131_v31, %v126_v15  ;;  %v231_v58 = vld [vmem:[#allocation2 + $0x408] sm:$0xff]  ;;  %v241_v31 = vld [vmem:[#allocation2 + $0x458] sm:$0xff] }
  0x5e   :  { %4051 = vmatprep.subr.bf16.mxu0 %v4839_v48  ;;  %4115 = vmatprep.subr.bf16.mxu1 %v4842_v62 }
  0x60   :  { %4395 = vset.pattern.permute.xlu1 %v5545_v54  ;;  %v221_v54 = vld [vmem:[#allocation2 + $0x3b8] sm:$0xff] }
  0x61   :  { %4053 = vmatpush1.bf16.msra.mxu0 %v4852_v24  ;;  %4117 = vmatpush1.bf16.msra.mxu1 %v4856_v41  ;;  %v5543_v41 = vmov 2  }
  0x62   :  { %4055 = vmatprep.subr.bf16.mxu0 %v4858_v28  ;;  %4119 = vmatprep.subr.bf16.mxu1 %v4861_v45  ;;  %v211_v45 = vld [vmem:[#allocation2 + $0x368] sm:$0xff] }
  0x63   :  { %4396 = vset.pattern.permute.xlu0 %v5543_v41  ;;  %476 = vperm.xlu1 %4395, %v4847_v29   ;;  %v216_v41 = vld [vmem:[#allocation2 + $0x390] sm:$0xff] }
  0x64   :  { %491 = vperm.xlu0 %4396, %v4847_v29  }
  0x65   :  { %4057 = vmatpush1.bf16.msra.mxu0 %v4866_v61  ;;  %4121 = vmatpush1.bf16.msra.mxu1 %v4871_v13  ;;  %v5548_v13 = vmov 6  }
  0x66   :  { %4123 = vmatprep.subr.bf16.mxu0 %v4873_v22  ;;  %4155 = vmatprep.subr.bf16.mxu1 %v4665_v3  ;;  %v4905_v3 = vpack.c.bf16 %v211_v45, %v206_v60  ;;  %v136_v45 = vld [vmem:[#allocation2 + $0x110] sm:$0xff]  ;;  %v141_v60 = vld [vmem:[#allocation2 + $0x138] sm:$0xff] }
  0x67   :  { %v4923_v15 = vpack.c.bf16 %v141_v60, %v136_v45  ;;  %v5584_v45 = vmov 0   ;;  %v156_v60 = vld [vmem:[#allocation2 + $0x1b0] sm:$0xff] }
  0x68   :  { %327 = vmatmul.mubr.f32.vlgmr.msra.gmra.mrb[0].mxu0 %v4881_v33  ;;  %398 = vmatmul.mubr.f32.vlgmr.msra.gmra.mrb[0].mxu1 %v4881_v33 }
  0x69   :  { %4125 = vmatpush3.bf16.msra.mxu0 %v4883_v57  ;;  %4157 = vmatpush1.bf16.msra.mxu1 %v4669_v8  ;;  %v5550_v8 = vmov 4  }
  0x6a   :  { %4127 = vmatprep.subr.bf16.mxu0 %v4888_v36  ;;  %4159 = vmatprep.subr.bf16.mxu1 %v4676_v16  ;;  %v4917_v16 = vpack.c.bf16 %v221_v54, %v216_v41  ;;  %v151_v41 = vld [vmem:[#allocation2 + $0x188] sm:$0xff]  ;;  %v236_v54 = vld [vmem:[#allocation2 + $0x430] sm:$0xff] }
  0x6b   :  { %468 = vmatprep.mubr.f32.mxu0 %v4804_v32  ;;  %608 = vmatprep.mubr.f32.mxu1 %v4901_v59  ;;  %v226_v32 = vld [vmem:[#allocation2 + $0x3e0] sm:$0xff] }
  0x6c   :  { %4397 = vset.pattern.permute.xlu1 %v5550_v8  ;;  %4398 = vset.pattern.permute.xlu0 %v5548_v13 }
  0x6d   :  { %4129 = vmatpush3.bf16.msra.mxu0 %v4896_v5  ;;  %4161 = vmatpush1.bf16.msra.mxu1 %v4681_v21  ;;  %v4928_v21 = vpack.c.bf16 %v231_v58, %v226_v32  ;;  %v161_v32 = vld [vmem:[#allocation2 + $0x1d8] sm:$0xff]  ;;  %v246_v58 = vld [vmem:[#allocation2 + $0x480] sm:$0xff] }
  0x6e   :  { %4131 = vmatprep.subr.bf16.mxu0 %v4905_v3  ;;  %4163 = vmatprep.subr.bf16.mxu1 %v4687_v26  ;;  %v146_v26 = vld [vmem:[#allocation2 + $0x160] sm:$0xff]  ;;  %v4941_v8 = vpack.c.bf16 %v161_v32, %v156_v60  ;;  %v181_v32 = vld [vmem:[#allocation2 + $0x278] sm:$0xff] }
  0x6f   :  { %507 = vperm.xlu1 %4397, %v4847_v29   ;;  %523 = vperm.xlu0 %4398, %v4847_v29   ;;  %v4932_v13 = vpack.c.bf16 %v151_v41, %v146_v26  ;;  %v171_v41 = vld [vmem:[#allocation2 + $0x228] sm:$0xff] }
  0x71   :  { %4133 = vmatpush3.bf16.msra.mxu0 %v4912_v44  ;;  %4165 = vmatpush1.bf16.msra.mxu1 %v4692_v34  ;;  %v4937_v34 = vpack.c.bf16 %v241_v31, %v236_v54  ;;  %v256_v54 = vld [vmem:[#allocation2 + $0x4d0] sm:$0xff]  ;;  %v261_v31 = vld [vmem:[#allocation2 + $0x4f8] sm:$0xff] }
  0x72   :  { %4135 = vmatprep.subr.bf16.mxu0 %v4917_v16  ;;  %4167 = vmatprep.subr.bf16.mxu1 %v4698_v39  ;;  %v251_v39 = vld [vmem:[#allocation2 + $0x4a8] sm:$0xff]  ;;  %v4953_v60 = vpack.c.bf16 %v261_v31, %v256_v54 }
  0x73   :  { %4400 = vset.pattern.permute.xlu0 %v5584_v45  ;;  %v4945_v26 = vpack.c.bf16 %v251_v39, %v246_v58 }
  0x75   :  { %4137 = vmatpush3.bf16.msra.mxu0 %v4923_v15  ;;  %4169 = vmatpush1.bf16.msra.mxu1 %v4704_v50  ;;  %v166_v50 = vld [vmem:[#allocation2 + $0x200] sm:$0xff] }
  0x76   :  { %4139 = vmatprep.subr.bf16.mxu0 %v4928_v21  ;;  %4171 = vmatprep.subr.bf16.mxu1 %v4710_v52  ;;  %v4949_v52 = vpack.c.bf16 %v171_v41, %v166_v50 }
  0x79   :  { %4141 = vmatpush3.bf16.msra.mxu0 %v4932_v13  ;;  %4173 = vmatpush1.bf16.msra.mxu1 %v4718_v0  ;;  %v176_v0 = vld [vmem:[#allocation2 + $0x250] sm:$0xff] }
  0x7a   :  { %4143 = vmatprep.subr.bf16.mxu0 %v4937_v34  ;;  %4175 = vmatprep.subr.bf16.mxu1 %v4724_v2  ;;  %v4957_v58 = vpack.c.bf16 %v181_v32, %v176_v0  ;;  %v5594_v2 = vld [vmem:[#allocation14_spill] sm:$0xff] }
  0x7d   :  { %4145 = vmatpush3.bf16.msra.mxu0 %v4941_v8  ;;  %4177 = vmatpush1.bf16.msra.mxu1 %v4730_v18  ;;  %v5596_v18 = vld [vmem:[#allocation16_spill] sm:$0xff] }
  0x7e   :  { %4147 = vmatprep.subr.bf16.mxu0 %v4945_v26  ;;  %4179 = vmatprep.subr.bf16.mxu1 %v4736_v20  ;;  %v5598_v20 = vld [vmem:[#allocation18_spill] sm:$0xff] }
  0x81   :  { %4149 = vmatpush3.bf16.msra.mxu0 %v4949_v52  ;;  %4181 = vmatpush1.bf16.msra.mxu1 %v4742_v35  ;;  %v5600_v35 = vld [vmem:[#allocation20_spill] sm:$0xff] }
  0x82   :  { %4151 = vmatprep.subr.bf16.mxu0 %v4953_v60  ;;  %4183 = vmatprep.subr.bf16.mxu1 %v4748_v37  ;;  %v5601_v37 = vld [vmem:[#allocation21_spill] sm:$0xff] }
  0x85   :  { %4153 = vmatpush3.bf16.msra.mxu0 %v4957_v58  ;;  %4185 = vmatpush1.bf16.msra.mxu1 %v4754_v53  ;;  %v4498_v53 = vmov 8  }
  0x86   :  { %4219 = vmatprep.subr.bf16.mxu0 %v4667_v7  ;;  %4187 = vmatprep.subr.bf16.mxu1 %v4760_v55  ;;  %v5585_v7 = vld [vmem:[#allocation5_spill] sm:$0xff] }
  0x87   :  { %4399 = vset.pattern.permute.xlu1 %v4498_v53 }
  0x88   :  { %469 = vmatmul.mubr.f32.vlgmr.msra.gmra.mrb[2].mxu0 %v4881_v33 }
  0x89   :  { %4221 = vmatpush1.bf16.msra.mxu0 %v4672_v12  ;;  %679 = vmatprep.mubr.f32.mxu0 %v4901_v59  ;;  %v5586_v12 = vld [vmem:[#allocation6_spill] sm:$0xff] }
  0x8a   :  { %4189 = vmatpush1.bf16.msra.mxu1 %v4766_v11  ;;  %4223 = vmatprep.subr.bf16.mxu0 %v4678_v17  ;;  %v5587_v17 = vld [vmem:[#allocation7_spill] sm:$0xff] }
  0x8b   :  { %4191 = vmatprep.subr.bf16.mxu1 %v4772_v14 }
  0x8d   :  { %4225 = vmatpush1.bf16.msra.mxu0 %v4685_v25  ;;  %v99_v25 = vld [vmem:[%s5575_s27 + $0x10] sm:$0xff] }
  0x8e   :  { %4193 = vmatpush1.bf16.msra.mxu1 %v4778_v40  ;;  %4227 = vmatprep.subr.bf16.mxu0 %v4689_v30  ;;  %v5588_v30 = vld [vmem:[#allocation8_spill] sm:$0xff] }
  0x8f   :  { %4195 = vmatprep.subr.bf16.mxu1 %v4784_v42 }
  0x91   :  { %4229 = vmatpush1.bf16.msra.mxu0 %v4696_v38  ;;  %v5589_v38 = vld [vmem:[#allocation9_spill] sm:$0xff] }
  0x92   :  { %4197 = vmatpush1.bf16.msra.mxu1 %v4790_v4  ;;  %4231 = vmatprep.subr.bf16.mxu0 %v4701_v43  ;;  %v5590_v43 = vld [vmem:[#allocation10_spill] sm:$0xff] }
  0x93   :  { %4199 = vmatprep.subr.bf16.mxu1 %v4796_v10 }
  0x95   :  { %4233 = vmatpush1.bf16.msra.mxu0 %v4708_v51  ;;  %v5591_v51 = vld [vmem:[#allocation11_spill] sm:$0xff] }
  0x96   :  { %4201 = vmatpush1.bf16.msra.mxu1 %v4809_v46  ;;  %4235 = vmatprep.subr.bf16.mxu0 %v4713_v56  ;;  %v5592_v56 = vld [vmem:[#allocation12_spill] sm:$0xff] }
  0x97   :  { %4203 = vmatprep.subr.bf16.mxu1 %v4815_v49 }
  0x99   :  { %4237 = vmatpush1.bf16.msra.mxu0 %v4722_v1  ;;  %v5593_v1 = vld [vmem:[#allocation13_spill] sm:$0xff] }
  0x9a   :  { %4205 = vmatpush1.bf16.msra.mxu1 %v4821_v6  ;;  %4239 = vmatprep.subr.bf16.mxu0 %v4727_v9  ;;  %v5595_v9 = vld [vmem:[#allocation15_spill] sm:$0xff] }
  0x9b   :  { %4207 = vmatprep.subr.bf16.mxu1 %v4827_v23 }
  0x9d   :  { %4241 = vmatpush1.bf16.msra.mxu0 %v4734_v19  ;;  %v5597_v19 = vld [vmem:[#allocation17_spill] sm:$0xff] }
  0x9e   :  { %4209 = vmatpush1.bf16.msra.mxu1 %v4833_v47  ;;  %4243 = vmatprep.subr.bf16.mxu0 %v4739_v27  ;;  %v5599_v27 = vld [vmem:[#allocation19_spill] sm:$0xff] }
  0x9f   :  { %4211 = vmatprep.subr.bf16.mxu1 %v4839_v48 }
  0xa1   :  { %4245 = vmatpush1.bf16.msra.mxu0 %v5585_v7 }
  0xa2   :  { %4213 = vmatpush1.bf16.msra.mxu1 %v4852_v24  ;;  %4247 = vmatprep.subr.bf16.mxu0 %v5586_v12 }
  0xa3   :  { %4215 = vmatprep.subr.bf16.mxu1 %v4858_v28 }
  0xa5   :  { %4249 = vmatpush1.bf16.msra.mxu0 %v5587_v17 }
  0xa6   :  { %4217 = vmatpush1.bf16.msra.mxu1 %v4866_v61  ;;  %4251 = vmatprep.subr.bf16.mxu0 %v5588_v30 }
  0xa7   :  { %4283 = vmatprep.subr.bf16.mxu1 %v4873_v22 }
  0xa9   :  { %609 = vmatmul.mubr.f32.vlgmr.msra.gmra.mrb[2].mxu1 %v99_v25  ;;  %4253 = vmatpush1.bf16.msra.mxu0 %v5589_v38 }
  0xaa   :  { %4255 = vmatprep.subr.bf16.mxu0 %v5590_v43  ;;  %4285 = vmatpush3.bf16.msra.mxu1 %v4883_v57 }
  0xab   :  { %4287 = vmatprep.subr.bf16.mxu1 %v4888_v36  ;;  %750 = vmatprep.mubr.f32.mxu1 %v4901_v59 }
  0xad   :  { %4257 = vmatpush1.bf16.msra.mxu0 %v5591_v51 }
  0xae   :  { %4259 = vmatprep.subr.bf16.mxu0 %v5592_v56  ;;  %4289 = vmatpush3.bf16.msra.mxu1 %v4896_v5 }
  0xaf   :  { %4291 = vmatprep.subr.bf16.mxu1 %v4905_v3 }
  0xb1   :  { %4261 = vmatpush1.bf16.msra.mxu0 %v5593_v1 }
  0xb2   :  { %4263 = vmatprep.subr.bf16.mxu0 %v5594_v2  ;;  %4293 = vmatpush3.bf16.msra.mxu1 %v4912_v44 }
  0xb3   :  { %4295 = vmatprep.subr.bf16.mxu1 %v4917_v16 }
  0xb5   :  { %4265 = vmatpush1.bf16.msra.mxu0 %v5595_v9 }
  0xb6   :  { %4267 = vmatprep.subr.bf16.mxu0 %v5596_v18  ;;  %4297 = vmatpush3.bf16.msra.mxu1 %v4923_v15 }
  0xb7   :  { %4299 = vmatprep.subr.bf16.mxu1 %v4928_v21 }
  0xb9   :  { %4269 = vmatpush1.bf16.msra.mxu0 %v5597_v19 }
  0xba   :  { %4271 = vmatprep.subr.bf16.mxu0 %v5598_v20  ;;  %4301 = vmatpush3.bf16.msra.mxu1 %v4932_v13 }
  0xbb   :  { %4303 = vmatprep.subr.bf16.mxu1 %v4937_v34 }
  0xbd   :  { %4273 = vmatpush1.bf16.msra.mxu0 %v4837_v63  ;;  %v5602_v63 = vmov 1  }
  0xbe   :  { %4275 = vmatprep.subr.bf16.mxu0 %v4842_v62  ;;  %4305 = vmatpush3.bf16.msra.mxu1 %v4941_v8 }
  0xbf   :  { %4307 = vmatprep.subr.bf16.mxu1 %v4945_v26 }
  0xc1   :  { %4277 = vmatpush1.bf16.msra.mxu0 %v5599_v27 }
  0xc2   :  { %4279 = vmatprep.subr.bf16.mxu0 %v5600_v35  ;;  %4309 = vmatpush3.bf16.msra.mxu1 %v4949_v52 }
  0xc3   :  { %4311 = vmatprep.subr.bf16.mxu1 %v4953_v60 }
  0xc5   :  { %4281 = vmatpush1.bf16.msra.mxu0 %v5601_v37 }
  0xc6   :  { %4313 = vmatpush3.bf16.msra.mxu1 %v4957_v58 }
  0xc8   :  { %680 = vmatmul.mubr.f32.vlgmr.msra.gmra.mrb[4].mxu0 %v99_v25 }
  0xc9   :  { %751 = vmatmul.mubr.f32.vlgmr.msra.gmra.mrb[4].mxu1 %v99_v25 }
  0xd6   :  { %v482_v10 = vpop.permute.xlu0 %481  ;;  %v514_v48 = vpop.permute.xlu1 %513 }
  0xdb   :  { %v498_v62 = vpop.permute.xlu0 %497  ;;  %v530_v24 = vpop.permute.xlu1 %529 }
  0xe2   :  { %v477_v44 = vpop.permute.xlu1 %476 }
  0xe3   :  { %v492_v15 = vpop.permute.xlu0 %491 }
  0xee   :  { %v508_v8 = vpop.permute.xlu1 %507  ;;  %v524_v52 = vpop.permute.xlu0 %523 }
 0x13b   :  { %v328_v55 = vpop.f32.mrb[0].mxu0  ;;  %v5035_v14 = vpop.f32.mrb[0].mxu1 }
 0x13c   :  { %v330_v11 = vpop.f32.mrb[1].mxu0  ;;  %v5037_v40 = vpop.f32.mrb[1].mxu1  ;;  %v484_v5 = vmul.f32 %v482_v10, %v328_v55  ;;  %v479_v17 = vmul.f32 %v477_v44, %v328_v55  ;;  %v510_v9 = vmul.f32 %v508_v8, %v5035_v14 }
 0x13d   :  { %v500_v59 = vmul.f32 %v498_v62, %v330_v11  ;;  %v532_v3 = vmul.f32 %v530_v24, %v5037_v40  ;;  %v494_v30 = vmul.f32 %v492_v15, %v330_v11  ;;  %v526_v27 = vmul.f32 %v524_v52, %v5037_v40 }
 0x15b   :  { %v3858_v42 = vpop.f32.mrb[2].mxu0 }
 0x15c   :  { %v3859_v4 = vpop.f32.mrb[3].mxu0 }
 0x15d   :  { %v5039_v6 = vadd.f32 %v3859_v4, %v3858_v42 }
 0x17c   :  { %v610_v46 = vpop.f32.mrb[2].mxu1 }
 0x17d   :  { %v757_v47 = vmul.f32 %v610_v46, %v482_v10  ;;  %v612_v49 = vpop.f32.mrb[3].mxu1  ;;  %v756_v16 = vmul.f32 %v610_v46, %v477_v44  ;;  %v829_v44 = vld [vmem:[%s5604_s3 + $0x40] sm:$0xff] }
 0x17e   :  { %v765_v23 = vmul.f32 %v612_v49, %v498_v62  ;;  %v763_v34 = vmul.f32 %v612_v49, %v492_v15  ;;  %v5605_v15 = vmov 7  }
 0x17f   :  { %759 = vrot.lane.b32.xlu1 %v757_v47, %s4499_s2 }
 0x183   :  { %767 = vrot.lane.b32.xlu1 %v765_v23, %s4499_s2  ;;  %v824_v23 = vld [vmem:[%s5604_s3 + $0x18] sm:$0xff] }
 0x187   :  { %539 = vperm.xlu1 %4399, %v4847_v29   ;;  %v516_v29 = vmul.f32 %v514_v48, %v5035_v14  ;;  %v795_v14 = vld [vmem:[%s5603_s6] sm:$0xff] }
 0x18b   :  { %4401 = vset.pattern.permute.xlu1 %v5602_v63 }
 0x19b   :  { %v681_v28 = vpop.f32.mrb[4].mxu0 }
 0x19c   :  { %v773_v61 = vmul.f32 %v681_v28, %v514_v48  ;;  %v683_v13 = vpop.f32.mrb[5].mxu0  ;;  %v3893_v22 = vpop.f32.mrb[4].mxu1  ;;  %v771_v41 = vmul.f32 %v681_v28, %v508_v8  ;;  %v823_v28 = vld [vmem:[%s5604_s3 + $0x10] sm:$0xff] }
 0x19d   :  { %v781_v33 = vmul.f32 %v683_v13, %v530_v24  ;;  %v3894_v57 = vpop.f32.mrb[5].mxu1  ;;  %v779_v32 = vmul.f32 %v683_v13, %v524_v52  ;;  %v821_v24 = vld [vmem:[%s5604_s3] sm:$0xff]  ;;  %v831_v8 = vld [vmem:[%s5604_s3 + $0x50] sm:$0xff] }
 0x19e   :  { %775 = vrot.lane.b32.xlu0 %v773_v61, %s4499_s2  ;;  %v3895_v36 = vadd.f32 %v3894_v57, %v3893_v22  ;;  %v826_v61 = vld [vmem:[%s5604_s3 + $0x28] sm:$0xff]  ;;  %v4316_v13 = vpack.c.bf16 %v823_v28, %v821_v24  ;;  %v828_v22 = vld [vmem:[%s5604_s3 + $0x38] sm:$0xff]  ;;  %v827_v57 = vld [vmem:[%s5604_s3 + $0x30] sm:$0xff] }
 0x19f   :  { %783 = vrot.lane.b32.xlu1 %v781_v33, %s4499_s2  ;;  %v825_v33 = vld [vmem:[%s5604_s3 + $0x20] sm:$0xff] }
 0x1a2   :  { %486 = vrot.lane.b32.xlu0 %v484_v5, %s4499_s2  ;;  %v830_v5 = vld [vmem:[%s5604_s3 + $0x48] sm:$0xff] }
 0x1a3   :  { %502 = vrot.lane.b32.xlu1 %v500_v59, %s4499_s2  ;;  %v832_v59 = vld [vmem:[%s5604_s3 + $0x58] sm:$0xff] }
 0x1a6   :  { %518 = vrot.lane.b32.xlu0 %v516_v29, %s4499_s2  ;;  %v4320_v29 = vpack.c.bf16 %v827_v57, %v825_v33 }
 0x1a7   :  { %534 = vrot.lane.b32.xlu1 %v532_v3, %s4499_s2  ;;  %v4322_v3 = vpack.c.bf16 %v832_v59, %v830_v5 }
 0x1f1   :  { %v760_v21 = vpop.permute.xlu1 %759 }
 0x1f2   :  { %v762_v39 = vadd.f32 %v760_v21, %v756_v16  ;;  %v4324_v16 = vpack.c.bf16 %v831_v8, %v829_v44  ;;  %v834_v21 = vld [vmem:[%s5604_s3 + $0x68] sm:$0xff] }
 0x1f4   :  { %v764_v26 = vadd.f32 %v763_v34, %v762_v39  ;;  %v836_v34 = vld [vmem:[%s5604_s3 + $0x78] sm:$0xff] }
 0x1f5   :  { %v768_v50 = vpop.permute.xlu1 %767  ;;  %v4326_v39 = vpack.c.bf16 %v836_v34, %v834_v21 }
 0x1f6   :  { %v770_v54 = vadd.f32 %v768_v50, %v764_v26  ;;  %v833_v26 = vld [vmem:[%s5604_s3 + $0x60] sm:$0xff]  ;;  %v835_v50 = vld [vmem:[%s5604_s3 + $0x70] sm:$0xff] }
 0x1f8   :  { %v772_v31 = vadd.f32 %v771_v41, %v770_v54  ;;  %v4328_v41 = vpack.c.bf16 %v835_v50, %v833_v26  ;;  %v4500_v54 = vmov 0.0  }
 0x1f9   :  { %904 = vmatprep.mubr.f32.mxu0 %v4500_v54  ;;  %1061 = vmatprep.mubr.f32.mxu1 %v4500_v54 }
 0x206   :  { %v540_v60 = vpop.permute.xlu1 %539 }
 0x207   :  { %v787_v38 = vmul.f32 %v3895_v36, %v540_v60  ;;  %v542_v11 = vmul.f32 %v5039_v6, %v540_v60  ;;  %v822_v6 = vld [vmem:[%s5604_s3 + $0x8] sm:$0xff]  ;;  %v4318_v36 = vpack.c.bf16 %v828_v22, %v826_v61  ;;  %s4501_s3 = smov 112  }
 0x208   :  { %v4314_v48 = vpack.c.bf16 %v824_v23, %v822_v6 }
 0x20a   :  { %4315 = vmatprep.subr.bf16.mxu0 %v4314_v48  ;;  %4331 = vmatprep.subr.bf16.mxu1 %v4314_v48 }
 0x20b   :  { %4317 = vmatpush1.bf16.msra.mxu0 %v4316_v13  ;;  %4333 = vmatpush1.bf16.msra.mxu1 %v4316_v13 }
 0x20c   :  { %4319 = vmatprep.subr.bf16.mxu0 %v4318_v36  ;;  %4335 = vmatprep.subr.bf16.mxu1 %v4318_v36 }
 0x20f   :  { %4321 = vmatpush1.bf16.msra.mxu0 %v4320_v29  ;;  %4337 = vmatpush1.bf16.msra.mxu1 %v4320_v29 }
 0x210   :  { %v776_v0 = vpop.permute.xlu0 %775  ;;  %4323 = vmatprep.subr.bf16.mxu0 %v4322_v3  ;;  %4339 = vmatprep.subr.bf16.mxu1 %v4322_v3 }
 0x211   :  { %v778_v58 = vadd.f32 %v776_v0, %v772_v31  ;;  %v784_v7 = vpop.permute.xlu1 %783  ;;  %v3772_v31 = vld [vmem:[%s5580_s28 + $0x8] sm:$0xff] }
 0x213   :  { %v780_v12 = vadd.f32 %v779_v32, %v778_v58  ;;  %4325 = vmatpush1.bf16.msra.mxu0 %v4324_v16  ;;  %4341 = vmatpush1.bf16.msra.mxu1 %v4324_v16 }
 0x214   :  { %v487_v25 = vpop.permute.xlu0 %486  ;;  %4327 = vmatprep.subr.bf16.mxu0 %v4326_v39  ;;  %4343 = vmatprep.subr.bf16.mxu1 %v4326_v39 }
 0x215   :  { %v786_v43 = vadd.f32 %v784_v7, %v780_v12  ;;  %v489_v51 = vadd.f32 %v487_v25, %v479_v17  ;;  %v503_v2 = vpop.permute.xlu1 %502 }
 0x217   :  { %v788_v56 = vadd.f32 %v787_v38, %v786_v43  ;;  %v495_v1 = vadd.f32 %v494_v30, %v489_v51  ;;  %4329 = vmatpush1.bf16.msra.mxu0 %v4328_v41  ;;  %4345 = vmatpush1.bf16.msra.mxu1 %v4328_v41  ;;  %v5606_v30 = vmov 2   ;;  %v5607_v38 = vmov 3  }
 0x218   :  { %v519_v20 = vpop.permute.xlu0 %518  ;;  %v5608_v43 = vmov 4   ;;  %v5609_v51 = vmov 5  }
 0x219   :  { %v505_v18 = vadd.f32 %v503_v2, %v495_v1  ;;  %790 = vrot.lane.b32.xlu0 %v788_v56, %s4499_s2  ;;  %v535_v55 = vpop.permute.xlu1 %534  ;;  %v5610_v56 = vmov 6  }
 0x21b   :  { %v511_v19 = vadd.f32 %v510_v9, %v505_v18 }
 0x21d   :  { %v521_v35 = vadd.f32 %v519_v20, %v511_v19 }
 0x21f   :  { %v527_v37 = vadd.f32 %v526_v27, %v521_v35 }
 0x221   :  { %v537_v42 = vadd.f32 %v535_v55, %v527_v37 }
 0x223   :  { %v543_v4 = vadd.f32 %v542_v11, %v537_v42 }
 0x28b   :  { %v791_v10 = vpop.permute.xlu0 %790 }
 0x28c   :  { %v794_v46 = vsel %vm793_vm0, %v543_v4, %v791_v10 }
 0x28d   :  { %796 = vadd.xlane.f32.xlu1 %v794_v46 }
 0x29e   :  { %815 = vperm.xlu1 %4401, %v795_v14  }
 0x31a   :  { %v797_v47 = vpop.xlane.xlu1 %796 }
 0x31b   :  { %v799_v49 = vmul.f32 0.0078125, %v797_v47 }
 0x31d   :  { %v800_v40 = vsub.f32 %v794_v46, %v799_v49 }
 0x31e   :  { %v816_v12 = vpop.permute.xlu1 %815 }
 0x31f   :  { %v801_v62 = vmul.f32 %v800_v40, %v800_v40 }
 0x321   :  { %802 = vadd.xlane.f32.xlu0 %v801_v62 }
 0x337   :  { %810 = vperm.xlu0 %4400, %v795_v14  }
 0x33b   :  { %4407 = vset.pattern.permute.xlu0 %v5605_v15 }
 0x33c   :  { %978 = vperm.xlu0 %4407, %v3772_v31  }
 0x340   :  { %4409 = vset.pattern.permute.xlu0 %v4498_v53 }
 0x3ae   :  { %v803_v52 = vpop.xlane.xlu0 %802 }
 0x3af   :  { %v804_v60 = vmul.f32 0.0078125, %v803_v52 }
 0x3b1   :  { %v805_v0 = vadd.f32 1e-05, %v804_v60 }
 0x3b3   :  { %4429 = vrsqrt.f32 %v805_v0 }
 0x3b6   :  { %v811_v58 = vpop.permute.xlu0 %810 }
 0x3bd   :  { %v4430_v32 = vpop.eup %4429 }
 0x3be   :  { %v807_v7 = vmul.f32 %v4430_v32, %v800_v40  ;;  %v979_v40 = vpop.permute.xlu0 %978 }
 0x3c0   :  { %v813_v17 = vmul.f32 %v811_v58, %v807_v7 }
 0x3c2   :  { %v818_v25 = vadd.f32 %v816_v12, %v813_v17 }
 0x3c4   :  { %993 = vrot.lane.b32.xlu1 %v818_v25, %s4499_s2  ;;  %3773 = vmatmul.mubr.msk.f32.vlgmr.msra.gmra.mrb[6].mxu0 %vm793_vm0, %v818_v25 }
 0x3c5   :  { %3929 = vmatprep.mubr.msk.f32.mxu0 %vm4508_vm3, %v4500_v54 }
 0x3c8   :  { %918 = vperm.xlu1 %4401, %v3772_v31  }
 0x3cc   :  { %4402 = vset.pattern.permute.xlu1 %v5606_v30 }
 0x3cd   :  { %928 = vperm.xlu1 %4402, %v3772_v31  }
 0x3d1   :  { %4403 = vset.pattern.permute.xlu1 %v5607_v38 }
 0x3d2   :  { %938 = vperm.xlu1 %4403, %v3772_v31  }
 0x3d6   :  { %4404 = vset.pattern.permute.xlu1 %v5608_v43 }
 0x3d7   :  { %948 = vperm.xlu1 %4404, %v3772_v31  }
 0x3db   :  { %4405 = vset.pattern.permute.xlu1 %v5609_v51 }
 0x3dc   :  { %958 = vperm.xlu1 %4405, %v3772_v31  }
 0x3e0   :  { %4406 = vset.pattern.permute.xlu1 %v5610_v56 }
 0x3e1   :  { %968 = vperm.xlu1 %4406, %v3772_v31  }
 0x3e5   :  { %4408 = vset.pattern.permute.xlu1 %v5584_v45 }
 0x3e6   :  { %913 = vperm.xlu1 %4408, %v3772_v31  }
 0x3ea   :  { %4411 = vset.pattern.permute.xlu1 %v5602_v63 }
 0x436   :  { %v994_v1 = vpop.permute.xlu1 %993 }
 0x437   :  { %3774 = vmatmul.mubr.msk.f32.vlgmr.msra.gmra.mrb[6].mxu1 %vm793_vm0, %v994_v1 }
 0x438   :  { %3936 = vmatprep.mubr.msk.f32.mxu1 %vm4508_vm3, %v4500_v54 }
 0x447   :  { %v919_v18 = vpop.permute.xlu1 %918 }
 0x44c   :  { %v929_v19 = vpop.permute.xlu1 %928 }
 0x451   :  { %v939_v20 = vpop.permute.xlu1 %938 }
 0x456   :  { %v949_v27 = vpop.permute.xlu1 %948 }
 0x45b   :  { %v959_v42 = vpop.permute.xlu1 %958 }
 0x460   :  { %v969_v10 = vpop.permute.xlu1 %968 }
 0x465   :  { %v914_v13 = vpop.permute.xlu1 %913 }
 0x497   :  { %v5126_v2 = vpop.f32.mrb[6].mxu0 }
 0x498   :  { %v908_v9 = vpop.f32.mrb[7].mxu0  ;;  %v921_v49 = vmul.f32 %v919_v18, %v5126_v2  ;;  %v941_v6 = vmul.f32 %v939_v20, %v5126_v2  ;;  %v931_v23 = vmul.f32 %v929_v19, %v5126_v2  ;;  %v961_v48 = vmul.f32 %v959_v42, %v5126_v2 }
 0x499   :  { %v951_v24 = vmul.f32 %v949_v27, %v5126_v2  ;;  %v981_v28 = vmul.f32 %v979_v40, %v5126_v2  ;;  %v971_v61 = vmul.f32 %v969_v10, %v5126_v2  ;;  %v916_v60 = vmul.f32 %v914_v13, %v5126_v2 }
 0x50a   :  { %v1063_v35 = vpop.f32.mrb[6].mxu1 }
 0x50b   :  { %v1065_v37 = vpop.f32.mrb[7].mxu1  ;;  %v1069_v55 = vmul.f32 %v1063_v35, %v919_v18  ;;  %v1075_v11 = vmul.f32 %v1063_v35, %v929_v19  ;;  %v1081_v4 = vmul.f32 %v1063_v35, %v939_v20  ;;  %v1087_v46 = vmul.f32 %v1063_v35, %v949_v27 }
 0x50c   :  { %v1099_v14 = vmul.f32 %v1063_v35, %v969_v10  ;;  %v1093_v47 = vmul.f32 %v1063_v35, %v959_v42  ;;  %v1105_v62 = vmul.f32 %v1063_v35, %v979_v40  ;;  %v1068_v57 = vmul.f32 %v1063_v35, %v914_v13  ;;  %v3775_v42 = vld [vmem:[%s5603_s6 + $0x8] sm:$0xff] }
 0x50d   :  { %1071 = vrot.lane.b32.xlu1 %v1069_v55, %s4501_s3  ;;  %1077 = vrot.lane.b32.xlu0 %v1075_v11, %s4502_s1  ;;  %v1150_v40 = vld [vmem:[%s5611_s5 + $0x8] sm:$0xff] }
 0x511   :  { %988 = vperm.xlu0 %4409, %v3772_v31   ;;  %1083 = vrot.lane.b32.xlu1 %v1081_v4, %s4503_s7 }
 0x515   :  { %1089 = vrot.lane.b32.xlu1 %v1087_v46, %s4499_s2  ;;  %1101 = vrot.lane.b32.xlu0 %v1099_v14, %s4504_s8 }
 0x516   :  { %4410 = vset.pattern.permute.xlu0 %v5584_v45 }
 0x519   :  { %1095 = vrot.lane.b32.xlu1 %v1093_v47, %s4505_s4  ;;  %923 = vrot.lane.b32.xlu0 %v921_v49, %s4501_s3  ;;  %v1149_v49 = vld [vmem:[%s5611_s5] sm:$0xff] }
 0x51d   :  { %1107 = vrot.lane.b32.xlu1 %v1105_v62, %s4506_s29  ;;  %943 = vrot.lane.b32.xlu0 %v941_v6, %s4503_s7  ;;  %v4347_v62 = vpack.c.bf16 %v1150_v40, %v1149_v49  ;;  %v4507_v6 = vmov 0.0|0.0  }
 0x51e   :  { %4346 = vmatprep.subr.bf16.mxu0 %v4507_v6  ;;  %4349 = vmatprep.subr.bf16.mxu1 %v4507_v6 }
 0x51f   :  { %4348 = vmatpush3.bf16.msra.mxu0 %v4347_v62  ;;  %4351 = vmatpush3.bf16.msra.mxu1 %v4347_v62 }
 0x520   :  { %3944 = vmatprep.subr.mxu1 %v4500_v54 }
 0x521   :  { %933 = vrot.lane.b32.xlu1 %v931_v23, %s4502_s1  ;;  %963 = vrot.lane.b32.xlu0 %v961_v48, %s4505_s4  ;;  %s4510_s4 = smov 120  }
 0x525   :  { %953 = vrot.lane.b32.xlu1 %v951_v24, %s4499_s2  ;;  %983 = vrot.lane.b32.xlu0 %v981_v28, %s4506_s29  ;;  %s4512_s2 = smov 104  }
 0x529   :  { %973 = vrot.lane.b32.xlu1 %v971_v61, %s4504_s8 }
 0x57f   :  { %v1072_v22 = vpop.permute.xlu1 %1071  ;;  %v1078_v59 = vpop.permute.xlu0 %1077 }
 0x580   :  { %v1074_v36 = vadd.f32 %v1072_v22, %v1068_v57 }
 0x582   :  { %v1080_v29 = vadd.f32 %v1078_v59, %v1074_v36 }
 0x583   :  { %v1084_v33 = vpop.permute.xlu1 %1083 }
 0x584   :  { %v1086_v44 = vadd.f32 %v1084_v33, %v1080_v29 }
 0x587   :  { %v1090_v5 = vpop.permute.xlu1 %1089 }
 0x588   :  { %v1092_v21 = vadd.f32 %v1090_v5, %v1086_v44 }
 0x58b   :  { %v1096_v3 = vpop.permute.xlu1 %1095 }
 0x58c   :  { %v1098_v39 = vadd.f32 %v1096_v3, %v1092_v21 }
 0x58f   :  { %v1108_v8 = vpop.permute.xlu1 %1107 }
 0x590   :  { %v989_v16 = vpop.permute.xlu0 %988 }
 0x591   :  { %v991_v34 = vmul.f32 %v989_v16, %v908_v9  ;;  %v1111_v31 = vmul.f32 %v1065_v37, %v989_v16 }
 0x593   :  { %v934_v41 = vpop.permute.xlu1 %933 }
 0x594   :  { %v1102_v26 = vpop.permute.xlu0 %1101 }
 0x595   :  { %v1104_v50 = vadd.f32 %v1102_v26, %v1098_v39 }
 0x597   :  { %v1110_v52 = vadd.f32 %v1108_v8, %v1104_v50  ;;  %v954_v12 = vpop.permute.xlu1 %953 }
 0x598   :  { %v924_v0 = vpop.permute.xlu0 %923 }
 0x599   :  { %v926_v32 = vadd.f32 %v924_v0, %v916_v60  ;;  %v1112_v58 = vadd.f32 %v1111_v31, %v1110_v52 }
 0x59b   :  { %1114 = vrot.lane.b32.xlu1 %v1112_v58, %s4506_s29  ;;  %v936_v7 = vadd.f32 %v934_v41, %v926_v32  ;;  %v974_v19 = vpop.permute.xlu1 %973  ;;  %s4511_s29 = smov 116  }
 0x59c   :  { %v944_v17 = vpop.permute.xlu0 %943 }
 0x59d   :  { %v946_v25 = vadd.f32 %v944_v17, %v936_v7 }
 0x59f   :  { %v956_v1 = vadd.f32 %v954_v12, %v946_v25 }
 0x5a0   :  { %v964_v18 = vpop.permute.xlu0 %963 }
 0x5a1   :  { %v966_v9 = vadd.f32 %v964_v18, %v956_v1 }
 0x5a3   :  { %v976_v20 = vadd.f32 %v974_v19, %v966_v9 }
 0x5a4   :  { %v984_v27 = vpop.permute.xlu0 %983 }
 0x5a5   :  { %v986_v35 = vadd.f32 %v984_v27, %v976_v20 }
 0x5a7   :  { %v992_v37 = vadd.f32 %v991_v34, %v986_v35 }
 0x60d   :  { %v1115_v2 = vpop.permute.xlu1 %1114 }
 0x60e   :  { %v1118_v55 = vsel %vm1117_vm1, %v992_v37, %v1115_v2 }
 0x60f   :  { %v1122_v11 = vsel %vm1121_vm2, %v1118_v55, 0.0 }
 0x610   :  { %1123 = vadd.xlane.f32.xlu0 %v1122_v11 }
 0x626   :  { %1138 = vperm.xlu0 %4410, %v3775_v42  }
 0x62a   :  { %4415 = vset.pattern.permute.xlu0 %v5609_v51  ;;  %v3776_v51 = vld [vmem:[%s5580_s28 + $0x10] sm:$0xff]  ;;  %s4509_s28 = smov 124  }
 0x62b   :  { %1271 = vperm.xlu0 %4415, %v3776_v51  }
 0x62f   :  { %4418 = vset.pattern.permute.xlu0 %v4498_v53 }
 0x630   :  { %1301 = vperm.xlu0 %4418, %v3776_v51  }
 0x634   :  { %4420 = vset.pattern.permute.xlu0 %v5584_v45 }
 0x69d   :  { %v1124_v4 = vpop.xlane.xlu0 %1123 }
 0x69e   :  { %v1126_v10 = vmul.f32 0.03125, %v1124_v4 }
 0x6a0   :  { %v1127_v46 = vsub.f32 %v1118_v55, %v1126_v10 }
 0x6a2   :  { %v1128_v14 = vmul.f32 %v1127_v46, %v1127_v46 }
 0x6a4   :  { %v1129_v47 = vsel %vm1121_vm2, %v1128_v14, 0.0 }
 0x6a5   :  { %1130 = vadd.xlane.f32.xlu1 %v1129_v47  ;;  %v1139_v61 = vpop.permute.xlu0 %1138 }
 0x6aa   :  { %v1272_v21 = vpop.permute.xlu0 %1271 }
 0x6af   :  { %v1302_v50 = vpop.permute.xlu0 %1301 }
 0x6b6   :  { %1143 = vperm.xlu1 %4411, %v3775_v42  }
 0x732   :  { %v1131_v23 = vpop.xlane.xlu1 %1130 }
 0x733   :  { %v1132_v48 = vmul.f32 0.03125, %v1131_v23 }
 0x735   :  { %v1133_v24 = vadd.f32 1e-05, %v1132_v48 }
 0x736   :  { %v1144_v22 = vpop.permute.xlu1 %1143 }
 0x737   :  { %4431 = vrsqrt.f32 %v1133_v24 }
 0x741   :  { %v4432_v28 = vpop.eup %4431 }
 0x742   :  { %v1135_v13 = vmul.f32 %v4432_v28, %v1127_v46 }
 0x744   :  { %v1141_v33 = vmul.f32 %v1139_v61, %v1135_v13 }
 0x746   :  { %v1146_v57 = vadd.f32 %v1144_v22, %v1141_v33 }
 0x748   :  { %1310 = vrot.lane.b32.xlu1 %v1146_v57, %s4501_s3  ;;  %3930 = vmatmul.mubr.msk.f32.vlgmr.msra.gmra.mrb[8].mxu0 %vm1117_vm1, %v1146_v57 }
 0x74c   :  { %1231 = vperm.xlu1 %4411, %v3776_v51  }
 0x750   :  { %4412 = vset.pattern.permute.xlu1 %v5606_v30 }
 0x751   :  { %1241 = vperm.xlu1 %4412, %v3776_v51  }
 0x755   :  { %4413 = vset.pattern.permute.xlu1 %v5607_v38 }
 0x756   :  { %1251 = vperm.xlu1 %4413, %v3776_v51  }
 0x75a   :  { %4414 = vset.pattern.permute.xlu1 %v5608_v43 }
 0x75b   :  { %1261 = vperm.xlu1 %4414, %v3776_v51  }
 0x75f   :  { %4416 = vset.pattern.permute.xlu1 %v5610_v56 }
 0x760   :  { %1281 = vperm.xlu1 %4416, %v3776_v51  }
 0x764   :  { %4417 = vset.pattern.permute.xlu1 %v5605_v15 }
 0x765   :  { %1291 = vperm.xlu1 %4417, %v3776_v51  }
 0x769   :  { %4419 = vset.pattern.permute.xlu1 %v5584_v45 }
 0x76a   :  { %1226 = vperm.xlu1 %4419, %v3776_v51  }
 0x76e   :  { %4421 = vset.pattern.permute.xlu1 %v5602_v63 }
 0x7ba   :  { %v1311_v53 = vpop.permute.xlu1 %1310 }
 0x7bb   :  { %3937 = vmatmul.mubr.msk.f32.vlgmr.msra.gmra.mrb[8].mxu1 %vm1117_vm1, %v1311_v53 }
 0x7bc   :  { %3946 = vmatprep.mubr.msk.f32.mxu1 %vm4508_vm3, %v4500_v54 }
 0x7cb   :  { %v1232_v43 = vpop.permute.xlu1 %1231 }
 0x7d0   :  { %v1242_v56 = vpop.permute.xlu1 %1241 }
 0x7d5   :  { %v1252_v36 = vpop.permute.xlu1 %1251 }
 0x7da   :  { %v1262_v5 = vpop.permute.xlu1 %1261 }
 0x7df   :  { %v1282_v16 = vpop.permute.xlu1 %1281 }
 0x7e4   :  { %v1292_v26 = vpop.permute.xlu1 %1291 }
 0x7e9   :  { %v1227_v25 = vpop.permute.xlu1 %1226 }
 0x81b   :  { %v5179_v30 = vpop.f32.mrb[8].mxu0 }
 0x81c   :  { %v3931_v38 = vpop.f32.mrb[9].mxu0  ;;  %v1234_v52 = vmul.f32 %v1232_v43, %v5179_v30  ;;  %v1244_v60 = vmul.f32 %v1242_v56, %v5179_v30  ;;  %v1254_v0 = vmul.f32 %v1252_v36, %v5179_v30  ;;  %v1264_v32 = vmul.f32 %v1262_v5, %v5179_v30 }
 0x81d   :  { %v1274_v58 = vmul.f32 %v1272_v21, %v5179_v30  ;;  %v1284_v7 = vmul.f32 %v1282_v16, %v5179_v30  ;;  %v1304_v12 = vmul.f32 %v1302_v50, %v5179_v30  ;;  %v1294_v17 = vmul.f32 %v1292_v26, %v5179_v30 }
 0x81e   :  { %v1229_v40 = vmul.f32 %v1227_v25, %v5179_v30 }
 0x88e   :  { %v1380_v15 = vpop.f32.mrb[8].mxu1 }
 0x88f   :  { %v3938_v59 = vpop.f32.mrb[9].mxu1  ;;  %v1385_v29 = vmul.f32 %v1380_v15, %v1232_v43  ;;  %v1391_v3 = vmul.f32 %v1380_v15, %v1242_v56  ;;  %v1397_v44 = vmul.f32 %v1380_v15, %v1252_v36  ;;  %v1403_v8 = vmul.f32 %v1380_v15, %v1262_v5  ;;  %v3779_v5 = vld [vmem:[%s5603_s6 + $0x10] sm:$0xff]  ;;  %s5613_s6 = sld [smem:[#allocation30_spill]] }
 0x890   :  { %v1415_v34 = vmul.f32 %v1380_v15, %v1282_v16  ;;  %v1409_v39 = vmul.f32 %v1380_v15, %v1272_v21  ;;  %v1421_v41 = vmul.f32 %v1380_v15, %v1292_v26  ;;  %v1427_v31 = vmul.f32 %v1380_v15, %v1302_v50 }
 0x891   :  { %1387 = vrot.lane.b32.xlu1 %v1385_v29, %s4509_s28  ;;  %1393 = vrot.lane.b32.xlu0 %v1391_v3, %s4510_s4  ;;  %v1384_v1 = vmul.f32 %v1380_v15, %v1227_v25 }
 0x895   :  { %1399 = vrot.lane.b32.xlu1 %v1397_v44, %s4511_s29  ;;  %1405 = vrot.lane.b32.xlu0 %v1403_v8, %s4501_s3  ;;  %v1467_v8 = vld [vmem:[%s5612_s22] sm:$0xff]  ;;  %v1470_v16 = vld [vmem:[%s5613_s6 + $0x8] sm:$0xf] }
 0x896   :  { %3941 = vmatprep.mubr.msk.f32.mxu0 %vm1441_vm5, %v1467_v8  ;;  %v1469_v21 = vld [vmem:[%s5613_s6] sm:$0xff] }
 0x899   :  { %1417 = vrot.lane.b32.xlu0 %v1415_v34, %s4512_s2  ;;  %1411 = vrot.lane.b32.xlu1 %v1409_v39, %s4513_s0 }
 0x89d   :  { %1423 = vrot.lane.b32.xlu1 %v1421_v41, %s4514_s9  ;;  %1429 = vrot.lane.b32.xlu0 %v1427_v31, %s4502_s1 }
 0x8a1   :  { %1236 = vrot.lane.b32.xlu1 %v1234_v52, %s4509_s28  ;;  %1246 = vrot.lane.b32.xlu0 %v1244_v60, %s4510_s4 }
 0x8a5   :  { %1256 = vrot.lane.b32.xlu1 %v1254_v0, %s4511_s29  ;;  %1266 = vrot.lane.b32.xlu0 %v1264_v32, %s4501_s3  ;;  %s4515_s3 = smov 4   ;;  %v1468_v32 = vld [vmem:[%s5612_s22 + $0x8] sm:$0xf] }
 0x8a9   :  { %1276 = vrot.lane.b32.xlu1 %v1274_v58, %s4513_s0  ;;  %1286 = vrot.lane.b32.xlu0 %v1284_v7, %s4512_s2  ;;  %s5616_s2 = sld [smem:[#allocation26_spill]]  ;;  %s5617_s0 = sld [smem:[#allocation33_spill]] }
 0x8ad   :  { %1296 = vrot.lane.b32.xlu1 %v1294_v17, %s4514_s9  ;;  %1306 = vrot.lane.b32.xlu0 %v1304_v12, %s4502_s1 }
 0x903   :  { %v1388_v18 = vpop.permute.xlu1 %1387  ;;  %v1394_v9 = vpop.permute.xlu0 %1393 }
 0x904   :  { %v1390_v19 = vadd.f32 %v1388_v18, %v1384_v1 }
 0x906   :  { %v1396_v20 = vadd.f32 %v1394_v9, %v1390_v19 }
 0x907   :  { %v1400_v27 = vpop.permute.xlu1 %1399  ;;  %v1406_v35 = vpop.permute.xlu0 %1405 }
 0x908   :  { %v1402_v37 = vadd.f32 %v1400_v27, %v1396_v20 }
 0x90a   :  { %v1408_v2 = vadd.f32 %v1406_v35, %v1402_v37 }
 0x90b   :  { %v1412_v55 = vpop.permute.xlu1 %1411  ;;  %v1418_v11 = vpop.permute.xlu0 %1417 }
 0x90c   :  { %v1414_v42 = vadd.f32 %v1412_v55, %v1408_v2 }
 0x90e   :  { %v1420_v4 = vadd.f32 %v1418_v11, %v1414_v42 }
 0x90f   :  { %v1424_v10 = vpop.permute.xlu1 %1423  ;;  %v1430_v14 = vpop.permute.xlu0 %1429 }
 0x910   :  { %v1426_v46 = vadd.f32 %v1424_v10, %v1420_v4 }
 0x912   :  { %v1432_v47 = vadd.f32 %v1430_v14, %v1426_v46 }
 0x913   :  { %v1237_v49 = vpop.permute.xlu1 %1236  ;;  %v1247_v6 = vpop.permute.xlu0 %1246 }
 0x914   :  { %1434 = vrot.lane.b32.xlu1 %v1432_v47, %s4515_s3  ;;  %v1239_v62 = vadd.f32 %v1237_v49, %v1229_v40 }
 0x916   :  { %v1249_v51 = vadd.f32 %v1247_v6, %v1239_v62 }
 0x917   :  { %v1257_v23 = vpop.permute.xlu1 %1256  ;;  %v1267_v24 = vpop.permute.xlu0 %1266 }
 0x918   :  { %v1259_v48 = vadd.f32 %v1257_v23, %v1249_v51 }
 0x91a   :  { %v1269_v28 = vadd.f32 %v1267_v24, %v1259_v48 }
 0x91b   :  { %v1277_v61 = vpop.permute.xlu1 %1276  ;;  %v1287_v22 = vpop.permute.xlu0 %1286 }
 0x91c   :  { %v1279_v13 = vadd.f32 %v1277_v61, %v1269_v28 }
 0x91e   :  { %v1289_v33 = vadd.f32 %v1287_v22, %v1279_v13 }
 0x91f   :  { %v1297_v57 = vpop.permute.xlu1 %1296  ;;  %v1307_v38 = vpop.permute.xlu0 %1306 }
 0x920   :  { %v1299_v53 = vadd.f32 %v1297_v57, %v1289_v33 }
 0x922   :  { %v1309_v43 = vadd.f32 %v1307_v38, %v1299_v53 }
 0x986   :  { %v1435_v56 = vpop.permute.xlu1 %1434 }
 0x987   :  { %v1438_v30 = vsel %vm1437_vm4, %v1309_v43, %v1435_v56 }
 0x988   :  { %v1442_v36 = vsel %vm1441_vm5, %v1438_v30, 0.0 }
 0x989   :  { %1443 = vadd.xlane.f32.xlu0 %v1442_v36 }
 0x99f   :  { %1458 = vperm.xlu0 %4420, %v3779_v5  }
 0xa16   :  { %v1444_v15 = vpop.xlane.xlu0 %1443 }
 0xa17   :  { %v1446_v59 = vmul.f32 0.125, %v1444_v15 }
 0xa19   :  { %v1447_v29 = vsub.f32 %v1438_v30, %v1446_v59 }
 0xa1b   :  { %v1448_v3 = vmul.f32 %v1447_v29, %v1447_v29 }
 0xa1d   :  { %v1449_v44 = vsel %vm1441_vm5, %v1448_v3, 0.0 }
 0xa1e   :  { %1450 = vadd.xlane.f32.xlu1 %v1449_v44  ;;  %v1459_v41 = vpop.permute.xlu0 %1458 }
 0xa2f   :  { %1463 = vperm.xlu1 %4421, %v3779_v5  }
 0xa33   :  { %4422 = vset.pattern.permute.xlu1 %v5584_v45 }
 0xa34   :  { %1478 = vperm.xlu1 %4422, %v1470_v16  }
 0xa38   :  { %1473 = vperm.xlu1 %4422, %v1469_v21  }
 0xa3c   :  { %4423 = vset.pattern.permute.xlu1 %v5602_v63 }
 0xaab   :  { %v1451_v34 = vpop.xlane.xlu1 %1450 }
 0xaac   :  { %v1452_v39 = vmul.f32 0.125, %v1451_v34 }
 0xaae   :  { %v1453_v26 = vadd.f32 1e-05, %v1452_v39 }
 0xaaf   :  { %v1464_v52 = vpop.permute.xlu1 %1463 }
 0xab0   :  { %4433 = vrsqrt.f32 %v1453_v26 }
 0xab3   :  { %v1479_v58 = vpop.permute.xlu1 %1478 }
 0xab7   :  { %v1474_v12 = vpop.permute.xlu1 %1473 }
 0xaba   :  { %v4434_v50 = vpop.eup %4433 }
 0xabb   :  { %v1455_v31 = vmul.f32 %v4434_v50, %v1447_v29 }
 0xabd   :  { %v1461_v60 = vmul.f32 %v1459_v41, %v1455_v31 }
 0xabf   :  { %v5215_v0 = vadd.f32 %v1464_v52, %v1461_v60  ;;  %v1914_v52 = vld [vmem:[%s5614_s30] sm:$0xf] }
 0xac1   :  { %3939 = vmatprep.subr.mxu0 %v5215_v0 }
 0xac2   :  { %3940 = vmatpush3.msra.mxu0 %v5215_v0 }
 0xac3   :  { %3942 = vmatmul.mubr.msk.f32.vlgmr.msra.gmra.mrb[10].mxu0 %vm1441_vm5, %v1468_v32  ;;  %3949 = vmatprep.subr.mxu0 %v4500_v54 }
 0xac4   :  { %3951 = vmatprep.mubr.msk.f32.mxu0 %vm4508_vm3, %v4500_v54 }
 0xb96   :  { %v3943_v7 = vpop.f32.mrb[10].mxu0 }
 0xb97   :  { %v1559_v17 = vadd.f32 %v3943_v7, %v1479_v58  ;;  %v1553_v25 = vpop.f32.mrb[11].mxu0 }
 0xb98   :  { %v1554_v1 = vadd.f32 %v1553_v25, %v1474_v12  ;;  %v1991_v12 = vld [vmem:[%s5615_s10] sm:$0xf] }
 0xb99   :  { %1737 = vrot.lane.b32.xlu1 %v1559_v17, %s4509_s28  ;;  %3945 = vmatpush3.xpose.msk.msra.mxu1 %vm1437_vm4, %v1559_v17  ;;  %v2018_v17 = vld [vmem:[%s5496_s12] sm:$0xff] }
 0xb9a   :  { %v1563_v18 = vrot.slane %v1554_v1, 4  ;;  %3950 = vmatpush3.msk.msra.mxu0 %vm1662_vm6, %v1554_v1  ;;  %3954 = vmatprep.subr.mxu1 %v4500_v54 }
 0xb9b   :  { %3959 = vmatprep.subr.mxu0 %v4500_v54 }
 0xb9c   :  { %3947 = vmatmul.mubr.msk.f32.vlgmr.msra.gmra.mrb[10].mxu1 %vm1437_vm4, %v1563_v18 }
 0xb9d   :  { %1735 = vrot.lane.b32.xlu1 %v1563_v18, %s4509_s28  ;;  %3956 = vmatprep.mubr.msk.f32.mxu1 %vm4508_vm3, %v4500_v54 }
 0xba1   :  { %1832 = vrot.lane.b32.xlu1 %v1554_v1, %s4509_s28 }
 0xc0b   :  { %v1738_v9 = vpop.permute.xlu1 %1737 }
 0xc0c   :  { %3955 = vmatpush3.xpose.msk.msra.mxu1 %vm1437_vm4, %v1738_v9 }
 0xc0d   :  { %3964 = vmatprep.subr.mxu1 %v4500_v54 }
 0xc0f   :  { %v1736_v19 = vpop.permute.xlu1 %1735 }
 0xc10   :  { %3957 = vmatmul.mubr.msk.f32.vlgmr.msra.gmra.mrb[12].mxu1 %vm1437_vm4, %v1736_v19 }
 0xc11   :  { %3966 = vmatprep.mubr.msk.f32.mxu1 %vm4508_vm3, %v4500_v54 }
 0xc13   :  { %v1833_v28 = vpop.permute.xlu1 %1832 }
 0xc6f   :  { %v1635_v20 = vpop.f32.mrb[10].mxu1 }
 0xc70   :  { %v1640_v27 = vsel %vm1639_vm7, %v1635_v20, -inf  ;;  %v3948_v35 = vpop.f32.mrb[11].mxu1 }
 0xc71   :  { %v1641_v37 = vrot.slane %v1640_v27, 4 }
 0xc73   :  { %v1642_v2 = vmax.f32 %v1640_v27, %v1641_v37 }
 0xc75   :  { %v1643_v55 = vrot.slane %v1642_v2, 2 }
 0xc77   :  { %v1644_v11 = vmax.f32 %v1642_v2, %v1643_v55 }
 0xc79   :  { %v1645_v42 = vrot.slane %v1644_v11, 1 }
 0xc7b   :  { %v1646_v4 = vmax.f32 %v1644_v11, %v1645_v42 }
 0xc7d   :  { %v1647_v10 = vsub.f32 %v1635_v20, %v1646_v4 }
 0xc7f   :  { %v1648_v46 = vmul.f32 1.442695, %v1647_v10  ;;  %v2017_v10 = vld [vmem:[%s5495_s11] sm:$0xff] }
 0xc81   :  { %4435 = vpow2.f32 %v1648_v46 }
 0xc8b   :  { %v4436_v14 = vpop.eup %4435 }
 0xc8c   :  { %v1650_v47 = vsel %vm1639_vm7, %v4436_v14, 0.0 }
 0xc8d   :  { %v1651_v49 = vrot.slane %v1650_v47, 4 }
 0xc8f   :  { %v1652_v40 = vadd.f32 %v1651_v49, %v1650_v47 }
 0xc91   :  { %v1653_v62 = vrot.slane %v1652_v40, 2 }
 0xc93   :  { %v1654_v6 = vadd.f32 %v1653_v62, %v1652_v40  ;;  %v2100_v62 = vld [vmem:[%s5497_s13] sm:$0xff] }
 0xc95   :  { %v1655_v51 = vrot.slane %v1654_v6, 1 }
 0xc97   :  { %v1656_v23 = vadd.f32 %v1655_v51, %v1654_v6 }
 0xc99   :  { %4437 = vrcp.f32 %v1656_v23 }
 0xca3   :  { %v4438_v48 = vpop.eup %4437 }
 0xca4   :  { %v1658_v24 = vmul.f32 %v4438_v48, %v4436_v14 }
 0xca6   :  { %3952 = vmatmul.mubr.msk.f32.vlgmr.msra.gmra.mrb[12].mxu0 %vm1437_vm4, %v1658_v24 }
 0xca7   :  { %3960 = vmatpush3.msk.msra.mxu0 %vm1662_vm6, %v1833_v28  ;;  %3961 = vmatprep.mubr.msk.f32.mxu0 %vm4508_vm3, %v4500_v54  ;;  %v2127_v28 = vld [vmem:[%s5616_s2] sm:$0xff] }
 0xca8   :  { %3969 = vmatprep.subr.mxu0 %v4500_v54 }
 0xce3   :  { %v1809_v61 = vpop.f32.mrb[12].mxu1 }
 0xce4   :  { %v1813_v13 = vsel %vm1639_vm7, %v1809_v61, -inf  ;;  %v3958_v22 = vpop.f32.mrb[13].mxu1 }
 0xce5   :  { %v1814_v33 = vrot.slane %v1813_v13, 4  ;;  %v5296_v22 = vld [vmem:[%s5575_s27 + $0x18] sm:$0xff] }
 0xce7   :  { %v1815_v57 = vmax.f32 %v1813_v13, %v1814_v33  ;;  %v5290_v13 = vld [vmem:[%s5575_s27 + $0x8] sm:$0xff] }
 0xce9   :  { %v1816_v53 = vrot.slane %v1815_v57, 2 }
 0xceb   :  { %v1817_v38 = vmax.f32 %v1815_v57, %v1816_v53 }
 0xced   :  { %v1818_v43 = vrot.slane %v1817_v38, 1 }
 0xcef   :  { %v1819_v56 = vmax.f32 %v1817_v38, %v1818_v43 }
 0xcf1   :  { %v1820_v30 = vsub.f32 %v1809_v61, %v1819_v56  ;;  %v2129_v61 = vcombine.high %v2127_v28, %v2127_v28 }
 0xcf3   :  { %v1821_v36 = vmul.f32 1.442695, %v1820_v30 }
 0xcf5   :  { %4439 = vpow2.f32 %v1821_v36 }
 0xcff   :  { %v4440_v5 = vpop.eup %4439 }
 0xd00   :  { %v1823_v15 = vsel %vm1639_vm7, %v4440_v5, 0.0 }
 0xd01   :  { %v1824_v59 = vrot.slane %v1823_v15, 4 }
 0xd03   :  { %v1825_v29 = vadd.f32 %v1824_v59, %v1823_v15 }
 0xd05   :  { %v1826_v3 = vrot.slane %v1825_v29, 2 }
 0xd07   :  { %v1827_v44 = vadd.f32 %v1826_v3, %v1825_v29  ;;  %v5305_v29 = vld [vmem:[%s5575_s27] sm:$0xff] }
 0xd08   :  { %v2291_v3 = vld [vmem:[%s5498_s14] sm:$0xf] }
 0xd09   :  { %v1828_v8 = vrot.slane %v1827_v44, 1 }
 0xd0b   :  { %v1829_v16 = vadd.f32 %v1828_v8, %v1827_v44  ;;  %v5324_v8 = vld [vmem:[%s5575_s27 + $0x10] sm:$0xff] }
 0xd0d   :  { %4441 = vrcp.f32 %v1829_v16 }
 0xd17   :  { %v4442_v21 = vpop.eup %4441 }
 0xd18   :  { %v1831_v34 = vmul.f32 %v4442_v21, %v4440_v5 }
 0xd1a   :  { %3962 = vmatmul.mubr.msk.f32.vlgmr.msra.gmra.mrb[14].mxu0 %vm1437_vm4, %v1831_v34 }
 0xd1b   :  { %3971 = vmatprep.mubr.msk.f32.mxu0 %vm4508_vm3, %v4500_v54 }
 0xd79   :  { %v1731_v39 = vpop.f32.mrb[12].mxu0 }
 0xd7a   :  { %v3953_v26 = vpop.f32.mrb[13].mxu0 }
 0xded   :  { %v1905_v50 = vpop.f32.mrb[14].mxu0 }
 0xdee   :  { %1910 = vrot.lane.b32.xlu1 %v1905_v50, %s4515_s3  ;;  %v3963_v41 = vpop.f32.mrb[15].mxu0 }
 0xe60   :  { %v1911_v31 = vpop.permute.xlu1 %1910 }
 0xe61   :  { %v1913_v60 = vsel %vm1437_vm4, %v1731_v39, %v1911_v31 }
 0xe62   :  { %3965 = vmatpush3.msk.msra.mxu1 %vm1662_vm6, %v1913_v60 }
 0xe63   :  { %3967 = vmatmul.mubr.msk.f32.vlgmr.msra.gmra.mrb[14].mxu1 %vm1437_vm4, %v1914_v52  ;;  %3794 = vmatprep.subr.msk.mxu1 %vm1662_vm6, %v2129_v61 }
 0xe64   :  { %2201 = vmatprep.mubr.f32.mxu1 %v4500_v54  ;;  %3795 = vmatpush1.msk.msra.mxu1 %vm1662_vm6, %v2127_v28 }
 0xe65   :  { %2295 = vmatprep.subr.mxu1 %v5290_v13 }
 0xf36   :  { %v1987_v32 = vpop.f32.mrb[14].mxu1 }
 0xf37   :  { %v3968_v58 = vpop.f32.mrb[15].mxu1  ;;  %v1993_v7 = vsel %vm1992_vm8, %v1987_v32, 0.0 }
 0xf38   :  { %1994 = vadd.xlane.f32.xlu0 %v1993_v7 }
 0xf4e   :  { %2008 = vperm.xlu0 %4420, %v1991_v12  }
 0xf52   :  { %2021 = vperm.xlu0 %4420, %v2018_v17  }
 0xfc5   :  { %v1995_v25 = vpop.xlane.xlu0 %1994 }
 0xfc6   :  { %v1996_v1 = vmul.f32 0.125, %v1995_v25 }
 0xfc8   :  { %v1997_v18 = vsub.f32 %v1987_v32, %v1996_v1 }
 0xfca   :  { %v1998_v9 = vmul.f32 %v1997_v18, %v1997_v18 }
 0xfcc   :  { %v1999_v19 = vsel %vm1992_vm8, %v1998_v9, 0.0 }
 0xfcd   :  { %2000 = vadd.xlane.f32.xlu1 %v1999_v19  ;;  %v2009_v55 = vpop.permute.xlu0 %2008 }
 0xfd1   :  { %v2022_v46 = vpop.permute.xlu0 %2021 }
 0xfde   :  { %2013 = vperm.xlu1 %4423, %v1991_v12  }
0x105a   :  { %v2001_v20 = vpop.xlane.xlu1 %2000 }
0x105b   :  { %v2002_v27 = vmul.f32 0.125, %v2001_v20 }
0x105d   :  { %v2003_v35 = vadd.f32 1e-05, %v2002_v27 }
0x105e   :  { %v2014_v11 = vpop.permute.xlu1 %2013 }
0x105f   :  { %4443 = vrsqrt.f32 %v2003_v35 }
0x1069   :  { %v4444_v37 = vpop.eup %4443 }
0x106a   :  { %v2005_v2 = vmul.f32 %v4444_v37, %v1997_v18 }
0x106c   :  { %v2011_v42 = vmul.f32 %v2009_v55, %v2005_v2 }
0x106e   :  { %v2016_v4 = vadd.f32 %v2014_v11, %v2011_v42  ;;  %v2636_v11 = vld [vmem:[%s5501_s17] sm:$0x3] }
0x106f   :  { %v2437_v42 = vld [vmem:[%s5499_s15] sm:$0xf] }
0x1070   :  { %3970 = vmatpush3.msk.msra.mxu0 %vm1662_vm6, %v2016_v4 }
0x1071   :  { %3972 = vmatmul.mubr.msk.f32.vlgmr.msra.gmra.mrb[16].mxu0 %vm1437_vm4, %v2017_v10  ;;  %3797 = vmatprep.subr.msk.mxu0 %vm1662_vm6, %v2129_v61 }
0x1072   :  { %2276 = vmatprep.mubr.f32.mxu0 %v4500_v54  ;;  %3798 = vmatpush1.msk.msra.mxu0 %vm1662_vm6, %v2127_v28 }
0x1073   :  { %2366 = vmatprep.subr.mxu0 %v5296_v22 }
0x1144   :  { %v2096_v14 = vpop.f32.mrb[16].mxu0 }
0x1145   :  { %v2097_v47 = vadd.f32 %v2096_v14, %v2022_v46  ;;  %v3973_v49 = vpop.f32.mrb[17].mxu0 }
0x1147   :  { %v2101_v40 = vsel %vm1441_vm5, %v2097_v47, 0.0 }
0x1148   :  { %2102 = vadd.xlane.f32.xlu1 %v2101_v40 }
0x1159   :  { %2121 = vperm.xlu1 %4423, %v2100_v62  }
0x115d   :  { %4424 = vset.pattern.permute.xlu1 %v5584_v45 }
0x11d5   :  { %v2103_v6 = vpop.xlane.xlu1 %2102 }
0x11d6   :  { %v2104_v51 = vmul.f32 0.125, %v2103_v6 }
0x11d8   :  { %v2105_v23 = vsub.f32 %v2097_v47, %v2104_v51 }
0x11d9   :  { %v2122_v36 = vpop.permute.xlu1 %2121 }
0x11da   :  { %v2106_v48 = vmul.f32 %v2105_v23, %v2105_v23 }
0x11dc   :  { %v2107_v24 = vsel %vm1441_vm5, %v2106_v48, 0.0 }
0x11dd   :  { %2108 = vadd.xlane.f32.xlu0 %v2107_v24 }
0x11f3   :  { %2116 = vperm.xlu0 %4420, %v2100_v62  }
0x11f7   :  { %4425 = vset.pattern.permute.xlu0 %v5602_v63 }
0x126a   :  { %v2109_v33 = vpop.xlane.xlu0 %2108 }
0x126b   :  { %v2110_v57 = vmul.f32 0.125, %v2109_v33 }
0x126d   :  { %v2111_v53 = vadd.f32 1e-05, %v2110_v57 }
0x126f   :  { %4445 = vrsqrt.f32 %v2111_v53 }
0x1272   :  { %v2117_v56 = vpop.permute.xlu0 %2116 }
0x1279   :  { %v4446_v38 = vpop.eup %4445 }
0x127a   :  { %v2113_v43 = vmul.f32 %v4446_v38, %v2105_v23 }
0x127c   :  { %v2119_v30 = vmul.f32 %v2117_v56, %v2113_v43 }
0x127e   :  { %v2124_v5 = vadd.f32 %v2122_v36, %v2119_v30 }
0x1280   :  { %v2125_v15 = vadd.f32 %v2124_v5, %v5215_v0  ;;  %v2490_v0 = vld [vmem:[%s5500_s16] sm:$0x3] }
0x1282   :  { %v2126_v59 = vmax.f32 %v2125_v15, 0.0 }
0x1284   :  { %2208 = vrot.lane.b32.xlu1 %v2126_v59, %s4509_s28  ;;  %3796 = vmatmul.mubr.msk.f32.vlgmr.msra.gmra.mrb[16].mxu1 %vm1437_vm4, %v2126_v59 }
0x1285   :  { %2296 = vmatpush1.msra.mxu1 %v5305_v29  ;;  %2359 = vmatprep.mubr.f32.mxu1 %v4500_v54 }
0x1286   :  { %2494 = vmatprep.subr.mxu1 %v5290_v13 }
0x1288   :  { %3800 = vmatmul.mubr.msk.f32.vlgmr.msra.gmra.mrb[18].mxu1 %vm1441_vm5, %v2291_v3 }
0x1289   :  { %2495 = vmatpush1.msra.mxu1 %v5305_v29  ;;  %2558 = vmatprep.mubr.f32.mxu1 %v4500_v54 }
0x128c   :  { %3802 = vmatmul.mubr.msk.f32.vlgmr.msra.gmra.mrb[20].mxu1 %vm1441_vm5, %v2490_v0 }
0x12f6   :  { %v2209_v44 = vpop.permute.xlu1 %2208 }
0x12f7   :  { %3799 = vmatmul.mubr.msk.f32.vlgmr.msra.gmra.mrb[18].mxu0 %vm1437_vm4, %v2209_v44 }
0x12f8   :  { %2367 = vmatpush1.msra.mxu0 %v5324_v8  ;;  %2430 = vmatprep.mubr.f32.mxu0 %v4500_v54 }
0x12f9   :  { %2565 = vmatprep.subr.mxu0 %v5296_v22 }
0x12fb   :  { %3801 = vmatmul.mubr.msk.f32.vlgmr.msra.gmra.mrb[20].mxu0 %vm1441_vm5, %v2291_v3 }
0x12fc   :  { %2566 = vmatpush1.msra.mxu0 %v5324_v8  ;;  %2629 = vmatprep.mubr.f32.mxu0 %v4500_v54 }
0x12fd   :  { %3974 = vmatprep.subr.mxu0 %v4500_v54 }
0x12ff   :  { %3803 = vmatmul.mubr.msk.f32.vlgmr.msra.gmra.mrb[22].mxu0 %vm1441_vm5, %v2490_v0 }
0x1300   :  { %3976 = vmatprep.mubr.msk.f32.mxu0 %vm4508_vm3, %v4500_v54 }
0x1357   :  { %v5336_v16 = vpop.f32.mrb[16].mxu1 }
0x1358   :  { %v5338_v21 = vpop.f32.mrb[17].mxu1 }
0x135b   :  { %v2361_v34 = vpop.f32.mrb[18].mxu1 }
0x135c   :  { %v2438_v39 = vsel %vm1662_vm6, %v2361_v34, 0.0  ;;  %v2363_v26 = vpop.f32.mrb[19].mxu1 }
0x135d   :  { %v2439_v50 = vsel %vm1662_vm6, %v2363_v26, 0.0 }
0x135e   :  { %v2440_v41 = vadd.f32 %v2439_v50, %v2438_v39  ;;  %v2689_v50 = vld [vmem:[%s5502_s18] sm:$0x3] }
0x135f   :  { %v2560_v31 = vpop.f32.mrb[20].mxu1  ;;  %3975 = vmatpush3.xpose.msk.msra.mxu0 %vm2760_vm10, %v2689_v50 }
0x1360   :  { %v2638_v52 = vsel %vm2637_vm9, %v2560_v31, 0.0  ;;  %v2562_v60 = vpop.f32.mrb[21].mxu1  ;;  %3979 = vmatprep.subr.mxu0 %v4500_v54 }
0x1361   :  { %v2639_v32 = vsel %vm2637_vm9, %v2562_v60, 0.0 }
0x1362   :  { %v2640_v58 = vadd.f32 %v2639_v32, %v2638_v52 }
0x13ca   :  { %v5344_v7 = vpop.f32.mrb[18].mxu0 }
0x13cb   :  { %v5346_v12 = vpop.f32.mrb[19].mxu0 }
0x13ce   :  { %v2432_v17 = vpop.f32.mrb[20].mxu0 }
0x13cf   :  { %v2441_v25 = vsel %vm1662_vm6, %v2432_v17, 0.0  ;;  %v2434_v1 = vpop.f32.mrb[21].mxu0 }
0x13d0   :  { %v2442_v18 = vadd.f32 %v2441_v25, %v2440_v41  ;;  %v2443_v9 = vsel %vm1662_vm6, %v2434_v1, 0.0 }
0x13d2   :  { %v2444_v19 = vadd.f32 %v2443_v9, %v2442_v18  ;;  %v2631_v20 = vpop.f32.mrb[22].mxu0 }
0x13d3   :  { %v2641_v27 = vsel %vm2637_vm9, %v2631_v20, 0.0  ;;  %v2633_v35 = vpop.f32.mrb[23].mxu0 }
0x13d4   :  { %v2642_v37 = vadd.f32 %v2641_v27, %v2640_v58  ;;  %v2643_v2 = vsel %vm2637_vm9, %v2633_v35, 0.0  ;;  %2445 = vadd.xlane.f32.xlu1 %v2444_v19 }
0x13d6   :  { %v2644_v55 = vadd.f32 %v2643_v2, %v2642_v37 }
0x13d8   :  { %2645 = vadd.xlane.f32.xlu0 %v2644_v55 }
0x13e5   :  { %2674 = vperm.xlu1 %4424, %v2636_v11  }
0x13e9   :  { %2475 = vperm.xlu1 %4424, %v2437_v42  }
0x13ed   :  { %4426 = vset.pattern.permute.xlu1 %v5602_v63 }
0x13ee   :  { %2483 = vperm.xlu1 %4426, %v2437_v42  }
0x13f2   :  { %4427 = vset.pattern.permute.xlu1 %v5584_v45 }
0x1461   :  { %v2446_v4 = vpop.xlane.xlu1 %2445 }
0x1462   :  { %v2448_v10 = vmul.f32 0.001953125, %v2446_v4 }
0x1464   :  { %v2449_v46 = vsub.f32 %v2361_v34, %v2448_v10  ;;  %v2450_v14 = vsub.f32 %v2363_v26, %v2448_v10  ;;  %v5360_v47 = vsub.f32 %v2432_v17, %v2448_v10  ;;  %v2452_v49 = vsub.f32 %v2434_v1, %v2448_v10 }
0x1465   :  { %v2646_v40 = vpop.xlane.xlu0 %2645  ;;  %v2675_v58 = vpop.permute.xlu1 %2674 }
0x1466   :  { %v2647_v62 = vmul.f32 0.001953125, %v2646_v40  ;;  %v2453_v6 = vmul.f32 %v2449_v46, %v2449_v46  ;;  %v2454_v51 = vmul.f32 %v2450_v14, %v2450_v14  ;;  %v2455_v23 = vmul.f32 %v5360_v47, %v5360_v47 }
0x1467   :  { %v2456_v48 = vmul.f32 %v2452_v49, %v2452_v49 }
0x1468   :  { %v2648_v24 = vsub.f32 %v2560_v31, %v2647_v62  ;;  %v2649_v63 = vsub.f32 %v2562_v60, %v2647_v62  ;;  %v2457_v28 = vsel %vm1662_vm6, %v2453_v6, 0.0  ;;  %v2458_v45 = vsel %vm1662_vm6, %v2454_v51, 0.0 }
0x1469   :  { %v2459_v61 = vadd.f32 %v2458_v45, %v2457_v28  ;;  %v2650_v33 = vsub.f32 %v2631_v20, %v2647_v62  ;;  %v2460_v57 = vsel %vm1662_vm6, %v2455_v23, 0.0  ;;  %v2651_v53 = vsub.f32 %v2633_v35, %v2647_v62  ;;  %v2476_v25 = vpop.permute.xlu1 %2475 }
0x146a   :  { %v2652_v38 = vmul.f32 %v2648_v24, %v2648_v24  ;;  %v2653_v43 = vmul.f32 %v2649_v63, %v2649_v63  ;;  %v2462_v36 = vsel %vm1662_vm6, %v2456_v48, 0.0 }
0x146b   :  { %v2461_v56 = vadd.f32 %v2460_v57, %v2459_v61  ;;  %v2654_v30 = vmul.f32 %v2650_v33, %v2650_v33  ;;  %v2655_v5 = vmul.f32 %v2651_v53, %v2651_v53 }
0x146c   :  { %v2656_v15 = vsel %vm2637_vm9, %v2652_v38, 0.0  ;;  %v2657_v59 = vsel %vm2637_vm9, %v2653_v43, 0.0 }
0x146d   :  { %v2463_v3 = vadd.f32 %v2462_v36, %v2461_v56  ;;  %v2658_v0 = vadd.f32 %v2657_v59, %v2656_v15  ;;  %v2659_v44 = vsel %vm2637_vm9, %v2654_v30, 0.0  ;;  %v2661_v39 = vsel %vm2637_vm9, %v2655_v5, 0.0  ;;  %v2484_v19 = vpop.permute.xlu1 %2483 }
0x146f   :  { %2464 = vadd.xlane.f32.xlu0 %v2463_v3  ;;  %v2660_v34 = vadd.f32 %v2659_v44, %v2658_v0 }
0x1471   :  { %v2662_v26 = vadd.f32 %v2661_v39, %v2660_v34 }
0x1473   :  { %2663 = vadd.xlane.f32.xlu0 %v2662_v26 }
0x1489   :  { %2682 = vperm.xlu0 %4425, %v2636_v11  }
0x14fc   :  { %v2465_v41 = vpop.xlane.xlu0 %2464 }
0x14fd   :  { %v2466_v31 = vmul.f32 0.001953125, %v2465_v41 }
0x14ff   :  { %v2467_v52 = vadd.f32 1e-05, %v2466_v31 }
0x1500   :  { %v2664_v60 = vpop.xlane.xlu0 %2663 }
0x1501   :  { %4447 = vrsqrt.f32 %v2467_v52  ;;  %v2665_v32 = vmul.f32 0.001953125, %v2664_v60 }
0x1503   :  { %v2666_v17 = vadd.f32 1e-05, %v2665_v32 }
0x1505   :  { %4449 = vrsqrt.f32 %v2666_v17 }
0x1508   :  { %v2683_v4 = vpop.permute.xlu0 %2682 }
0x150b   :  { %v4448_v1 = vpop.eup %4447 }
0x150c   :  { %v2470_v18 = vmul.f32 %v4448_v1, %v2450_v14  ;;  %v2469_v2 = vmul.f32 %v4448_v1, %v2449_v46  ;;  %v2472_v11 = vmul.f32 %v4448_v1, %v2452_v49  ;;  %v2471_v6 = vmul.f32 %v4448_v1, %v5360_v47 }
0x150e   :  { %v2479_v9 = vmul.f32 %v2476_v25, %v2470_v18  ;;  %v2478_v51 = vmul.f32 %v2476_v25, %v2469_v2  ;;  %v2480_v49 = vmul.f32 %v2476_v25, %v2471_v6  ;;  %v3006_v18 = vlaneseq }
0x150f   :  { %v4450_v20 = vpop.eup %4449 }
0x1510   :  { %v2668_v27 = vmul.f32 %v4450_v20, %v2648_v24  ;;  %v2669_v35 = vmul.f32 %v4450_v20, %v2649_v63  ;;  %v2671_v37 = vmul.f32 %v4450_v20, %v2651_v53  ;;  %v2670_v55 = vmul.f32 %v4450_v20, %v2650_v33 }
0x1511   :  { %v2487_v42 = vadd.f32 %v2484_v19, %v2479_v9  ;;  %v2481_v24 = vmul.f32 %v2476_v25, %v2472_v11  ;;  %v2486_v63 = vadd.f32 %v2484_v19, %v2478_v51  ;;  %v2488_v45 = vadd.f32 %v2484_v19, %v2480_v49 }
0x1512   :  { %v2677_v10 = vmul.f32 %v2675_v58, %v2668_v27  ;;  %v2678_v40 = vmul.f32 %v2675_v58, %v2669_v35  ;;  %v2680_v62 = vmul.f32 %v2675_v58, %v2671_v37  ;;  %v2679_v48 = vmul.f32 %v2675_v58, %v2670_v55  ;;  %v2984_v27 = vld [vmem:[%s5503_s19] sm:$0x3]  ;;  %s4516_s19 = smov 2  }
0x1513   :  { %2754 = vmatprep.mubr.f32.mxu1 %v2487_v42  ;;  %v2489_v47 = vadd.f32 %v2484_v19, %v2481_v24  ;;  %v3007_v19 = vshrl.u32 %v3006_v18, 7 }
0x1514   :  { %v5378_v23 = vadd.f32 %v2683_v4, %v2677_v10  ;;  %v5380_v14 = vadd.f32 %v2683_v4, %v2678_v40  ;;  %v5383_v46 = vadd.f32 %v2683_v4, %v2680_v62  ;;  %v5387_v28 = vadd.f32 %v2683_v4, %v2679_v48  ;;  %v3016_v62 = vld [vmem:[%s5504_s20] sm:$0xf] }
0x1515   :  { %v3008_v20 = vsub.s32 0, %v3007_v19  ;;  %v3013_v35 = vsub.s32 1, %v3007_v19 }
0x1516   :  { %2690 = vmatprep.subr.mxu1 %v5380_v14 }
0x1517   :  { %2691 = vmatpush1.xpose.msra.mxu1 %v5378_v23  ;;  %v3009_v37 = vrot.slane %v2984_v27, %v3008_v20  ;;  %v3014_v11 = vrot.slane %v2984_v27, %v3013_v35 }
0x1518   :  { %2837 = vmatprep.subr.mxu1 %v5383_v46 }
0x151a   :  { %2755 = vmatmul.mubr.f32.vlgmr.msra.gmra.mrb[22].mxu1 %v2486_v63 }
0x151b   :  { %2838 = vmatpush1.xpose.msra.mxu1 %v5387_v28  ;;  %2901 = vmatprep.mubr.f32.mxu1 %v2489_v47 }
0x151c   :  { %3984 = vmatprep.subr.mxu1 %v4500_v54 }
0x151e   :  { %2902 = vmatmul.mubr.f32.vlgmr.msra.gmra.mrb[24].mxu1 %v2488_v45 }
0x151f   :  { %3986 = vmatprep.mubr.msk.f32.mxu1 %vm4508_vm3, %v4500_v54 }
0x15ed   :  { %v2756_v61 = vpop.f32.mrb[22].mxu1 }
0x15ee   :  { %v2758_v33 = vpop.f32.mrb[23].mxu1  ;;  %3977 = vmatmul.mubr.msk.f32.vlgmr.msra.gmra.mrb[24].mxu0 %vm2760_vm10, %v2756_v61 }
0x15ef   :  { %3980 = vmatpush3.xpose.msk.msra.mxu0 %vm2760_vm10, %v2689_v50  ;;  %3981 = vmatprep.mubr.msk.f32.mxu0 %vm4508_vm3, %v4500_v54 }
0x15f0   :  { %3989 = vmatprep.subr.mxu0 %v4500_v54 }
0x15f1   :  { %v2903_v57 = vpop.f32.mrb[24].mxu1 }
0x15f2   :  { %v2905_v53 = vpop.f32.mrb[25].mxu1  ;;  %3982 = vmatmul.mubr.msk.f32.vlgmr.msra.gmra.mrb[26].mxu0 %vm2760_vm10, %v2903_v57  ;;  %v3094_v4 = vrot.slane %v2903_v57, 4 }
0x15f3   :  { %3991 = vmatprep.mubr.msk.f32.mxu0 %vm4508_vm3, %v4500_v54 }
0x16c1   :  { %v2833_v38 = vpop.f32.mrb[24].mxu0 }
0x16c2   :  { %v3978_v43 = vpop.f32.mrb[25].mxu0 }
0x16c5   :  { %v2976_v56 = vpop.f32.mrb[26].mxu0 }
0x16c6   :  { %v2981_v30 = vrot.slane %v2976_v56, 4  ;;  %v3983_v36 = vpop.f32.mrb[27].mxu0 }
0x16c8   :  { %v2983_v5 = vsel %vm1662_vm6, %v2833_v38, %v2981_v30 }
0x16c9   :  { %v2985_v15 = vsel %vm2760_vm10, %v2983_v5, 0.0 }
0x16ca   :  { %v2986_v59 = vrot.slane %v2985_v15, 4 }
0x16cc   :  { %v2987_v3 = vadd.f32 %v2986_v59, %v2985_v15 }
0x16ce   :  { %v2988_v0 = vrot.slane %v2987_v3, 2 }
0x16d0   :  { %v2989_v44 = vadd.f32 %v2988_v0, %v2987_v3 }
0x16d2   :  { %v2990_v34 = vrot.slane %v2989_v44, 1 }
0x16d4   :  { %v2991_v39 = vadd.f32 %v2990_v34, %v2989_v44  ;;  %v3363_v34 = vld [vmem:[%s5617_s0] sm:$0xff] }
0x16d6   :  { %v2992_v26 = vmul.f32 0.125, %v2991_v39 }
0x16d8   :  { %v2993_v50 = vsub.f32 %v2983_v5, %v2992_v26 }
0x16da   :  { %v2994_v41 = vmul.f32 %v2993_v50, %v2993_v50 }
0x16dc   :  { %v2995_v31 = vsel %vm2760_vm10, %v2994_v41, 0.0 }
0x16dd   :  { %v2996_v52 = vrot.slane %v2995_v31, 4 }
0x16df   :  { %v2997_v60 = vadd.f32 %v2996_v52, %v2995_v31 }
0x16e1   :  { %v2998_v32 = vrot.slane %v2997_v60, 2 }
0x16e3   :  { %v2999_v58 = vadd.f32 %v2998_v32, %v2997_v60 }
0x16e5   :  { %v3000_v17 = vrot.slane %v2999_v58, 1 }
0x16e7   :  { %v3001_v25 = vadd.f32 %v3000_v17, %v2999_v58  ;;  %v3521_v17 = vld [vmem:[%s5507_s23] sm:$0xff] }
0x16e9   :  { %v3002_v1 = vmul.f32 0.125, %v3001_v25 }
0x16eb   :  { %v3003_v9 = vadd.f32 1e-05, %v3002_v1 }
0x16ed   :  { %4451 = vrsqrt.f32 %v3003_v9 }
0x16f7   :  { %v4452_v2 = vpop.eup %4451 }
0x16f8   :  { %v3005_v55 = vmul.f32 %v4452_v2, %v2993_v50 }
0x16fa   :  { %v3010_v42 = vmul.f32 %v3009_v37, %v3005_v55 }
0x16fc   :  { %v3015_v10 = vadd.f32 %v3014_v11, %v3010_v42 }
0x16fe   :  { %v3017_v40 = vadd.f32 %v3015_v10, %v2756_v61  ;;  %v3096_v6 = vadd.f32 %v3094_v4, %v3015_v10 }
0x1700   :  { %3985 = vmatpush3.msk.msra.mxu1 %vm1662_vm6, %v3017_v40  ;;  %v3098_v51 = vrot.slane %v3096_v6, 4 }
0x1701   :  { %3812 = vmatprep.subr.msk.mxu1 %vm2637_vm9, %v5380_v14  ;;  %3987 = vmatmul.mubr.msk.f32.vlgmr.msra.gmra.mrb[26].mxu1 %vm1437_vm4, %v3016_v62 }
0x1702   :  { %3990 = vmatpush3.msk.msra.mxu0 %vm1662_vm6, %v3098_v51  ;;  %3813 = vmatpush1.msk.msra.mxu1 %vm2637_vm9, %v5378_v23 }
0x1703   :  { %3992 = vmatmul.mubr.msk.f32.vlgmr.msra.gmra.mrb[28].mxu0 %vm1437_vm4, %v3016_v62  ;;  %3815 = vmatprep.subr.msk.mxu0 %vm2637_vm9, %v5383_v46  ;;  %v3176_v46 = vld [vmem:[%s5505_s21] sm:$0xf]  ;;  %s4517_s21 = smov 126  }
0x1704   :  { %3816 = vmatpush1.msk.msra.mxu0 %vm2637_vm9, %v5387_v28  ;;  %3275 = vmatprep.mubr.f32.mxu1 %v4500_v54 }
0x1705   :  { %3356 = vmatprep.mubr.f32.mxu0 %v4500_v54 }
0x17d4   :  { %v3090_v14 = vpop.f32.mrb[26].mxu1 }
0x17d5   :  { %v3988_v48 = vpop.f32.mrb[27].mxu1 }
0x17d6   :  { %v3167_v24 = vpop.f32.mrb[28].mxu0 }
0x17d7   :  { %3172 = vrot.lane.b32.xlu1 %v3167_v24, %s4516_s19  ;;  %v3993_v49 = vpop.f32.mrb[29].mxu0 }
0x1849   :  { %v3173_v63 = vpop.permute.xlu1 %3172 }
0x184a   :  { %v3175_v23 = vsel %vm2760_vm10, %v3090_v14, %v3173_v63 }
0x184b   :  { %v3177_v47 = vsel %vm1639_vm7, %v3175_v23, 0.0 }
0x184c   :  { %3178 = vadd.xlane.f32.xlu1 %v3177_v47  ;;  %v2283_v47 = vmul.f32 %v5305_v29, %v5336_v16 }
0x185d   :  { %3193 = vperm.xlu1 %4427, %v3176_v46  }
0x18d9   :  { %v3179_v28 = vpop.xlane.xlu1 %3178 }
0x18da   :  { %v3181_v45 = vmul.f32 0.25, %v3179_v28  ;;  %v2285_v28 = vmul.f32 %v5324_v8, %v5344_v7 }
0x18dc   :  { %v3182_v61 = vsub.f32 %v3175_v23, %v3181_v45  ;;  %v2286_v45 = vmul.f32 %v5296_v22, %v5346_v12 }
0x18dd   :  { %v3194_v30 = vpop.permute.xlu1 %3193 }
0x18de   :  { %v3183_v33 = vmul.f32 %v3182_v61, %v3182_v61  ;;  %v2290_v12 = vadd.f32 %v5296_v22, %v2286_v45 }
0x18e0   :  { %v3184_v57 = vsel %vm1639_vm7, %v3183_v33, 0.0 }
0x18e1   :  { %3185 = vadd.xlane.f32.xlu0 %v3184_v57 }
0x18f7   :  { %3198 = vperm.xlu0 %4425, %v3176_v46   ;;  %v2284_v46 = vmul.f32 %v5290_v13, %v5338_v21  ;;  %v2287_v21 = vadd.f32 %v5305_v29, %v2283_v47 }
0x18f9   :  { %v2288_v7 = vadd.f32 %v5290_v13, %v2284_v46 }
0x196e   :  { %v3186_v53 = vpop.xlane.xlu0 %3185 }
0x196f   :  { %v3187_v38 = vmul.f32 0.25, %v3186_v53 }
0x1971   :  { %v3188_v43 = vadd.f32 1e-05, %v3187_v38 }
0x1973   :  { %4453 = vrsqrt.f32 %v3188_v43 }
0x1976   :  { %v3199_v15 = vpop.permute.xlu0 %3198 }
0x197d   :  { %v4454_v56 = vpop.eup %4453 }
0x197e   :  { %v3190_v36 = vmul.f32 %v4454_v56, %v3182_v61 }
0x1980   :  { %v3196_v5 = vmul.f32 %v3194_v30, %v3190_v36  ;;  %v2289_v36 = vadd.f32 %v5324_v8, %v2285_v28 }
0x1982   :  { %v3201_v59 = vadd.f32 %v3199_v15, %v3196_v5 }
0x1984   :  { %3282 = vrot.lane.b32.xlu1 %v3201_v59, %s4517_s21  ;;  %3814 = vmatmul.mubr.msk.f32.vlgmr.msra.gmra.mrb[28].mxu1 %vm2760_vm10, %v3201_v59 }
0x1985   :  { %3443 = vmatprep.mubr.f32.mxu1 %v4500_v54 }
0x19f6   :  { %v3283_v3 = vpop.permute.xlu1 %3282 }
0x19f7   :  { %3817 = vmatmul.mubr.msk.f32.vlgmr.msra.gmra.mrb[30].mxu0 %vm2760_vm10, %v3283_v3 }
0x19f8   :  { %3514 = vmatprep.mubr.f32.mxu0 %v4500_v54 }
0x1a57   :  { %v3277_v0 = vpop.f32.mrb[28].mxu1 }
0x1a58   :  { %v3279_v44 = vpop.f32.mrb[29].mxu1 }
0x1a59   :  { %3818 = vmatprep.subr.msk.mxu1 %vm1662_vm6, %v3279_v44 }
0x1a5a   :  { %3819 = vmatpush1.msk.msra.mxu1 %vm1662_vm6, %v3277_v0 }
0x1a5b   :  { %3820 = vmatmul.mubr.msk.f32.vlgmr.msra.gmra.mrb[30].mxu1 %vm1437_vm4, %v3363_v34 }
0x1a5c   :  { %3641 = vmatprep.mubr.f32.mxu1 %v4500_v54 }
0x1aca   :  { %v3358_v39 = vpop.f32.mrb[30].mxu0 }
0x1acb   :  { %v3360_v26 = vpop.f32.mrb[31].mxu0 }
0x1acc   :  { %3821 = vmatprep.subr.msk.mxu0 %vm1662_vm6, %v3360_v26 }
0x1acd   :  { %3822 = vmatpush1.msk.msra.mxu0 %vm1662_vm6, %v3358_v39 }
0x1ace   :  { %3823 = vmatmul.mubr.msk.f32.vlgmr.msra.gmra.mrb[32].mxu0 %vm1437_vm4, %v3363_v34 }
0x1acf   :  { %3712 = vmatprep.mubr.f32.mxu0 %v4500_v54 }
0x1b2e   :  { %v3445_v50 = vpop.f32.mrb[30].mxu1 }
0x1b2f   :  { %v3447_v41 = vpop.f32.mrb[31].mxu1 }
0x1b30   :  { %v3522_v31 = vadd.f32 %v3447_v41, %v3445_v50 }
0x1ba1   :  { %v3516_v52 = vpop.f32.mrb[32].mxu0 }
0x1ba2   :  { %v3523_v60 = vadd.f32 %v3522_v31, %v3516_v52  ;;  %v3518_v32 = vpop.f32.mrb[33].mxu0 }
0x1ba4   :  { %v3524_v58 = vadd.f32 %v3523_v60, %v3518_v32 }
0x1ba6   :  { %3525 = vadd.xlane.f32.xlu1 %v3524_v58 }
0x1bb7   :  { %3550 = vperm.xlu1 %4427, %v3521_v17  }
0x1c33   :  { %v3526_v25 = vpop.xlane.xlu1 %3525 }
0x1c34   :  { %v3527_v1 = vmul.f32 0.001953125, %v3526_v25 }
0x1c36   :  { %v3528_v18 = vsub.f32 %v3445_v50, %v3527_v1  ;;  %v3529_v9 = vsub.f32 %v3447_v41, %v3527_v1  ;;  %v3530_v19 = vsub.f32 %v3516_v52, %v3527_v1  ;;  %v3531_v20 = vsub.f32 %v3518_v32, %v3527_v1  ;;  %v3719_v52 = vld [vmem:[%s5509_s25] sm:$0xff] }
0x1c37   :  { %v3551_v48 = vpop.permute.xlu1 %3550 }
0x1c38   :  { %v3532_v54 = vmul.f32 %v3528_v18, %v3528_v18  ;;  %v3533_v27 = vmul.f32 %v3529_v9, %v3529_v9  ;;  %v3534_v35 = vmul.f32 %v3530_v19, %v3530_v19  ;;  %v3535_v2 = vmul.f32 %v3531_v20, %v3531_v20 }
0x1c3a   :  { %v3536_v37 = vadd.f32 %v3533_v27, %v3532_v54 }
0x1c3c   :  { %v3537_v55 = vadd.f32 %v3536_v37, %v3534_v35 }
0x1c3e   :  { %v3538_v11 = vadd.f32 %v3537_v55, %v3535_v2 }
0x1c40   :  { %3539 = vadd.xlane.f32.xlu0 %v3538_v11 }
0x1c56   :  { %3558 = vperm.xlu0 %4425, %v3521_v17  }
0x1ccd   :  { %v3540_v42 = vpop.xlane.xlu0 %3539 }
0x1cce   :  { %v3541_v4 = vmul.f32 0.001953125, %v3540_v42 }
0x1cd0   :  { %v3542_v10 = vadd.f32 1e-05, %v3541_v4 }
0x1cd2   :  { %4455 = vrsqrt.f32 %v3542_v10 }
0x1cd5   :  { %v3559_v61 = vpop.permute.xlu0 %3558 }
0x1cdc   :  { %v4456_v40 = vpop.eup %4455 }
0x1cdd   :  { %v3544_v62 = vmul.f32 %v4456_v40, %v3528_v18  ;;  %v3545_v6 = vmul.f32 %v4456_v40, %v3529_v9  ;;  %v3546_v51 = vmul.f32 %v4456_v40, %v3530_v19  ;;  %v3547_v14 = vmul.f32 %v4456_v40, %v3531_v20 }
0x1cdf   :  { %v3553_v24 = vmul.f32 %v3551_v48, %v3544_v62  ;;  %v3554_v49 = vmul.f32 %v3551_v48, %v3545_v6  ;;  %v3555_v63 = vmul.f32 %v3551_v48, %v3546_v51  ;;  %v3556_v23 = vmul.f32 %v3551_v48, %v3547_v14 }
0x1ce1   :  { %v3561_v33 = vadd.f32 %v3559_v61, %v3553_v24  ;;  %v3562_v57 = vadd.f32 %v3559_v61, %v3554_v49  ;;  %v3563_v53 = vadd.f32 %v3559_v61, %v3555_v63  ;;  %v3564_v38 = vadd.f32 %v3559_v61, %v3556_v23 }
0x1ce3   :  { %v3565_v43 = vadd.f32 %v5305_v29, %v3561_v33  ;;  %v3567_v56 = vadd.f32 %v5324_v8, %v3563_v53  ;;  %v3566_v16 = vadd.f32 %v5290_v13, %v3562_v57  ;;  %v3568_v30 = vadd.f32 %v5296_v22, %v3564_v38  ;;  %v3573_v13 = vld [vmem:[%s5508_s24] sm:$0xff] }
0x1ce5   :  { %v3569_v5 = vmax.f32 %v3565_v43, 0.0  ;;  %v3571_v15 = vmax.f32 %v3567_v56, 0.0  ;;  %v3570_v59 = vmax.f32 %v3566_v16, 0.0  ;;  %v3572_v3 = vmax.f32 %v3568_v30, 0.0 }
0x1ce7   :  { %v4352_v0 = vpack.c.bf16 %v3570_v59, %v2288_v7  ;;  %v4356_v44 = vpack.c.bf16 %v3572_v3, %v2290_v12  ;;  %v4354_v34 = vpack.c.bf16 %v3569_v5, %v2287_v21  ;;  %v4358_v39 = vpack.c.bf16 %v3571_v15, %v2289_v36 }
0x1ce9   :  { %4353 = vmatprep.subr.bf16.mxu1 %v4352_v0  ;;  %4357 = vmatprep.subr.bf16.mxu0 %v4356_v44 }
0x1cea   :  { %4355 = vmatpush1.bf16.msra.mxu1 %v4354_v34  ;;  %4359 = vmatpush1.bf16.msra.mxu0 %v4358_v39 }
0x1ced   :  { %3824 = vmatmul.mubr.msk.f32.vlgmr.msra.gmra.mrb[32].mxu1 %vm1117_vm1, %v3573_v13  ;;  %3825 = vmatmul.mubr.msk.f32.vlgmr.msra.gmra.mrb[34].mxu0 %vm1117_vm1, %v3573_v13 }
0x1dc0   :  { %v3643_v22 = vpop.f32.mrb[32].mxu1  ;;  %v3714_v29 = vpop.f32.mrb[34].mxu0 }
0x1dc1   :  { %v3645_v8 = vpop.f32.mrb[33].mxu1  ;;  %v3716_v26 = vpop.f32.mrb[35].mxu0 }
0x1dc2   :  { %v3720_v50 = vadd.f32 %v3645_v8, %v3643_v22 }
0x1dc4   :  { %v3721_v41 = vadd.f32 %v3720_v50, %v3714_v29 }
0x1dc6   :  { %v3722_v31 = vadd.f32 %v3721_v41, %v3716_v26 }
0x1dc8   :  { %3723 = vadd.xlane.f32.xlu1 %v3722_v31 }
0x1dd9   :  { %3748 = vperm.xlu1 %4427, %v3719_v52  }
0x1e55   :  { %v3724_v60 = vpop.xlane.xlu1 %3723 }
0x1e56   :  { %v3725_v32 = vmul.f32 0.001953125, %v3724_v60 }
0x1e58   :  { %v3726_v58 = vsub.f32 %v3643_v22, %v3725_v32  ;;  %v3727_v17 = vsub.f32 %v3645_v8, %v3725_v32  ;;  %v3728_v25 = vsub.f32 %v3714_v29, %v3725_v32  ;;  %v3729_v1 = vsub.f32 %v3716_v26, %v3725_v32 }
0x1e59   :  { %v3749_v62 = vpop.permute.xlu1 %3748 }
0x1e5a   :  { %v3730_v18 = vmul.f32 %v3726_v58, %v3726_v58  ;;  %v3731_v9 = vmul.f32 %v3727_v17, %v3727_v17  ;;  %v3732_v19 = vmul.f32 %v3728_v25, %v3728_v25  ;;  %v3733_v54 = vmul.f32 %v3729_v1, %v3729_v1 }
0x1e5c   :  { %v3734_v20 = vadd.f32 %v3731_v9, %v3730_v18 }
0x1e5e   :  { %v3735_v27 = vadd.f32 %v3734_v20, %v3732_v19 }
0x1e60   :  { %v3736_v35 = vadd.f32 %v3735_v27, %v3733_v54 }
0x1e62   :  { %3737 = vadd.xlane.f32.xlu0 %v3736_v35 }
0x1e78   :  { %3756 = vperm.xlu0 %4425, %v3719_v52  }
0x1eef   :  { %v3738_v37 = vpop.xlane.xlu0 %3737 }
0x1ef0   :  { %v3739_v2 = vmul.f32 0.001953125, %v3738_v37 }
0x1ef2   :  { %v3740_v55 = vadd.f32 1e-05, %v3739_v2 }
0x1ef4   :  { %4457 = vrsqrt.f32 %v3740_v55 }
0x1ef7   :  { %v3757_v24 = vpop.permute.xlu0 %3756 }
0x1efe   :  { %v4458_v11 = vpop.eup %4457 }
0x1eff   :  { %v3742_v42 = vmul.f32 %v4458_v11, %v3726_v58  ;;  %v3743_v4 = vmul.f32 %v4458_v11, %v3727_v17  ;;  %v3744_v10 = vmul.f32 %v4458_v11, %v3728_v25  ;;  %v3745_v40 = vmul.f32 %v4458_v11, %v3729_v1 }
0x1f01   :  { %v3751_v6 = vmul.f32 %v3749_v62, %v3742_v42  ;;  %v3752_v51 = vmul.f32 %v3749_v62, %v3743_v4  ;;  %v3753_v14 = vmul.f32 %v3749_v62, %v3744_v10  ;;  %v3754_v48 = vmul.f32 %v3749_v62, %v3745_v40 }
0x1f03   :  { %v3759_v49 = vadd.f32 %v3757_v24, %v3751_v6  ;;  %v3760_v63 = vadd.f32 %v3757_v24, %v3752_v51  ;;  %v3761_v23 = vadd.f32 %v3757_v24, %v3753_v14  ;;  %v3762_v47 = vadd.f32 %v3757_v24, %v3754_v48 }
0x1f05   :  { %3763 = vst [vmem:[%s5510_s26] sm:$0xff] %v3759_v49  ;;  %3764 = vst [vmem:[%s5510_s26 + $0x8] sm:$0xff] %v3760_v63 }
0x1f06   :  { %3765 = vst [vmem:[%s5510_s26 + $0x10] sm:$0xff] %v3761_v23  ;;  %3766 = vst [vmem:[%s5510_s26 + $0x18] sm:$0xff] %v3762_v47 }
0x1f07   :  { %3771 = vsyncpa [#allocation3], 1 }

</bundles_post_ra>
